<compile_context>
chip_gen: v6e
topology: v6e:2x2x1
jax: 0.10.0
libtpu: 0.0.40
codegen_flags: <defaults>
</compile_context>

<pallas_src>
import functools

import jax
import jax.numpy as jnp
from jax.experimental import pallas as pl
from jax.experimental.pallas import tpu as pltpu  # noqa: F401  (kept for parity)

# Model hyper-parameters (synthetic, small).
VOCAB = 64
MAX_SEQ = 16
HIDDEN = 32
NUM_HEADS = 2
FFN = 64
NUM_LAYERS = 2
CLS_PAD = 128          # lane-dense padded classifier width (real logits = 2)


# ----------------------------- kernel helpers -----------------------------


def _gelu_tanh(x):
    # TODO(synk): HF BERT default is exact erf GELU; tanh approximation kept here.
    c = 0.7978845608028654  # sqrt(2/pi)
    return 0.5 * x * (1.0 + jnp.tanh(c * (x + 0.044715 * x * x * x)))


def _layernorm(x, g, b, eps):
    mean = jnp.mean(x, axis=-1, keepdims=True)
    xc = x - mean
    var = jnp.mean(xc * xc, axis=-1, keepdims=True)
    return xc * jax.lax.rsqrt(var + eps) * g + b


# --------------------- single fused bi-encoder kernel ---------------------


def _biencoder_kernel(emb_ref, mask_ref, eg_ref, eb_ref,
                      wqkv_ref, bqkv_ref, wo_ref, bo_ref, ln1g_ref, ln1b_ref,
                      w1_ref, b1_ref, w2_ref, b2_ref, ln2g_ref, ln2b_ref,
                      wp_ref, bp_ref, wc_ref, bc_ref,
                      o_ref, *, B, S, NH, Dh, L, eps, rep_pos):
    """Entire BiEncoder forward in one kernel invocation (no grid)."""
    H = NH * Dh
    scale = 1.0 / float(Dh) ** 0.5
    logits = jnp.zeros((B, CLS_PAD), jnp.float32)

    for e in range(2):                                  # both encoders, unrolled
        mask = mask_ref[e]                              # (B, S) additive, f32
        # Embedding LayerNorm — hidden state lives in values from here on.
        x = _layernorm(emb_ref[e], eg_ref[e], eb_ref[e], eps)   # (B*S, H) f32

        for l in range(L):                              # all layers unrolled
            # ---- fused QKV projection: one fat MXU push over all B*S rows ----
            qkv = jnp.dot(x.astype(jnp.bfloat16), wqkv_ref[e, l],
                          preferred_element_type=jnp.float32) + bqkv_ref[e, l]

            # ---- attention, batched over B, register-resident context ----
            attn = jnp.zeros((B * S, H), jnp.float32)
            for h in range(NH):
                qh = qkv[:, h * Dh:(h + 1) * Dh].reshape(B, S, Dh)
                kh = qkv[:, H + h * Dh:H + (h + 1) * Dh].reshape(B, S, Dh)
                vh = qkv[:, 2 * H + h * Dh:2 * H + (h + 1) * Dh].reshape(B, S, Dh)
                s = jnp.einsum('bqd,bkd->bqk',
                               qh.astype(jnp.bfloat16), kh.astype(jnp.bfloat16),
                               preferred_element_type=jnp.float32) * scale
                s = s + mask[:, None, :]                # broadcast mask in-kernel
                s = s - jnp.max(s, axis=-1, keepdims=True)
                p = jnp.exp(s)
                p = p * pl.reciprocal(jnp.sum(p, axis=-1, keepdims=True),
                                      approx=True)
                ctx_h = jnp.einsum('bqk,bkd->bqd',
                                   p.astype(jnp.bfloat16), vh.astype(jnp.bfloat16),
                                   preferred_element_type=jnp.float32)
                # Fold this head's output projection (no VMEM staging, no concat).
                attn = attn + jnp.dot(
                    ctx_h.reshape(B * S, Dh).astype(jnp.bfloat16),
                    wo_ref[e, l, h], preferred_element_type=jnp.float32)

            attn = attn + bo_ref[e, l]
            h1 = _layernorm(attn + x, ln1g_ref[e, l], ln1b_ref[e, l], eps)

            # ---- FFN (gelu) + add & LayerNorm ----
            ff = jnp.dot(h1.astype(jnp.bfloat16), w1_ref[e, l],
                         preferred_element_type=jnp.float32) + b1_ref[e, l]
            ff = _gelu_tanh(ff)
            ff = jnp.dot(ff.astype(jnp.bfloat16), w2_ref[e, l],
                         preferred_element_type=jnp.float32) + b2_ref[e, l]
            x = _layernorm(ff + h1, ln2g_ref[e, l], ln2b_ref[e, l], eps)

        # ---- pooler (tanh dense on representation token) + classifier half ----
        rep = x.reshape(B, S, H)[:, rep_pos, :]                     # (B, H)
        pooled = jnp.tanh(jnp.dot(rep.astype(jnp.bfloat16), wp_ref[e],
                                  preferred_element_type=jnp.float32) + bp_ref[e])
        logits = logits + jnp.dot(pooled.astype(jnp.bfloat16), wc_ref[e],
                                  preferred_element_type=jnp.float32)

    # Lane-dense (B, 128) store; real logits occupy the first 2 lanes.
    o_ref[...] = logits + bc_ref[...]


# ------------------------------- parameters -------------------------------


def _init_bert_params(key):
    def nrm(k, shape, s=0.02):
        return jax.random.normal(k, shape, jnp.float32) * s

    keys = iter(jax.random.split(key, 4 + NUM_LAYERS * 6))
    params = {
        "word_emb": nrm(next(keys), (VOCAB, HIDDEN)),
        "pos_emb": nrm(next(keys), (MAX_SEQ, HIDDEN)),
        "seg_emb": nrm(next(keys), (2, HIDDEN)),
        "emb_ln_g": jnp.ones((HIDDEN,), jnp.float32),
        "emb_ln_b": jnp.zeros((HIDDEN,), jnp.float32),
        "wp": nrm(next(keys), (HIDDEN, HIDDEN)),
        "bp": jnp.zeros((HIDDEN,), jnp.float32),
        "layers": [],
    }
    for _ in range(NUM_LAYERS):
        params["layers"].append({
            "wq": nrm(next(keys), (HIDDEN, HIDDEN)),
            "wk": nrm(next(keys), (HIDDEN, HIDDEN)),
            "wv": nrm(next(keys), (HIDDEN, HIDDEN)),
            "wo": nrm(next(keys), (HIDDEN, HIDDEN)),
            "bq": jnp.zeros((HIDDEN,), jnp.float32),
            "bk": jnp.zeros((HIDDEN,), jnp.float32),
            "bv": jnp.zeros((HIDDEN,), jnp.float32),
            "bo": jnp.zeros((HIDDEN,), jnp.float32),
            "ln1_g": jnp.ones((HIDDEN,), jnp.float32),
            "ln1_b": jnp.zeros((HIDDEN,), jnp.float32),
            "w1": nrm(next(keys), (HIDDEN, FFN)),
            "b1": jnp.zeros((FFN,), jnp.float32),
            "w2": nrm(next(keys), (FFN, HIDDEN)),
            "b2": jnp.zeros((HIDDEN,), jnp.float32),
            "ln2_g": jnp.ones((HIDDEN,), jnp.float32),
            "ln2_b": jnp.zeros((HIDDEN,), jnp.float32),
        })
    return params


def _pack_encoder(p):
    """Pre-fuse QKV, pre-split wo by head, reshape biases, cast weights to bf16 once."""
    ls = p["layers"]
    Dh = HIDDEN // NUM_HEADS

    def stk(fn):
        return jnp.stack([fn(l) for l in ls], axis=0)

    return {
        "word_emb": p["word_emb"],
        "pos_emb": p["pos_emb"],
        "seg_emb": p["seg_emb"],
        "emb_ln_g": p["emb_ln_g"].reshape(1, HIDDEN),
        "emb_ln_b": p["emb_ln_b"].reshape(1, HIDDEN),
        "wp": p["wp"].astype(jnp.bfloat16),
        "bp": p["bp"].reshape(1, HIDDEN),
        "wqkv": stk(lambda l: jnp.concatenate(
            [l["wq"], l["wk"], l["wv"]], axis=1)).astype(jnp.bfloat16),
        "bqkv": stk(lambda l: jnp.concatenate(
            [l["bq"], l["bk"], l["bv"]]).reshape(1, 3 * HIDDEN)),
        "wo": stk(lambda l: l["wo"].reshape(NUM_HEADS, Dh, HIDDEN)).astype(jnp.bfloat16),
        "bo": stk(lambda l: l["bo"].reshape(1, HIDDEN)),
        "ln1_g": stk(lambda l: l["ln1_g"].reshape(1, HIDDEN)),
        "ln1_b": stk(lambda l: l["ln1_b"].reshape(1, HIDDEN)),
        "w1": stk(lambda l: l["w1"]).astype(jnp.bfloat16),
        "b1": stk(lambda l: l["b1"].reshape(1, FFN)),
        "w2": stk(lambda l: l["w2"]).astype(jnp.bfloat16),
        "b2": stk(lambda l: l["b2"].reshape(1, HIDDEN)),
        "ln2_g": stk(lambda l: l["ln2_g"].reshape(1, HIDDEN)),
        "ln2_b": stk(lambda l: l["ln2_b"].reshape(1, HIDDEN)),
    }


def init_biencoder_params(key):
    kq, kp, kc = jax.random.split(key, 3)
    q = _pack_encoder(_init_bert_params(kq))
    p = _pack_encoder(_init_bert_params(kp))
    # Stack the two BERTs along a leading axis: index 0 = query_model, 1 = passage_model.
    encoders = jax.tree_util.tree_map(lambda a, b: jnp.stack([a, b], axis=0), q, p)
    wc = jax.random.normal(kc, (2 * HIDDEN, 2), jnp.float32) * 0.02
    # Split classifier weight per encoder and zero-pad to 128 output lanes
    # so the kernel's logits store is lane-dense.
    wc_split = jnp.stack([wc[:HIDDEN], wc[HIDDEN:]], axis=0)          # (2, H, 2)
    wc_pad = jnp.pad(wc_split, ((0, 0), (0, 0), (0, CLS_PAD - 2)))
    return {
        "encoders": encoders,
        "wc": wc_pad.astype(jnp.bfloat16),                            # (2, H, 128)
        "bc": jnp.zeros((1, CLS_PAD), jnp.float32),
    }


# --------------------------------- forward ---------------------------------


def biencoder_forward(params, query_ids, query_segments, query_attention_mask,
                      passage_ids, passage_segments, passage_attention_mask,
                      encoder_type=None, representation_token_pos=0):
    """Mirrors BiEncoder.forward (returns classifier logits, shape (B, 2))."""
    # TODO(synk): fix_q_encoder / fix_p_encoder only gate gradients (torch.no_grad);
    # forward semantics are identical, so no inference-time equivalent is needed.
    # TODO(synk): per-layer hidden_states tuple / full sequence output are not
    # materialized — only the pooled representation feeds the classifier.
    idx_q = 0 if (encoder_type is None or encoder_type == "query") else 1
    idx_p = 1 if (encoder_type is None or encoder_type == "passage") else 0
    if (idx_q, idx_p) == (0, 1):
        enc = params["encoders"]
    else:
        sel = jnp.array([idx_q, idx_p], jnp.int32)
        enc = jax.tree_util.tree_map(lambda a: a[sel], params["encoders"])

    # Batch query + passage encoders along a leading axis of size 2.
    ids = jnp.stack([query_ids, passage_ids], axis=0)
    segs = jnp.stack([query_segments, passage_segments], axis=0)
    masks = jnp.stack([query_attention_mask, passage_attention_mask], axis=0)

    E, B, S = ids.shape
    BS = B * S

    # Embedding gathers stay in plain JAX (no clean tiny-gather Pallas path).
    emb = (jax.vmap(lambda t, i: t[i])(enc["word_emb"], ids)
           + jax.vmap(lambda t, i: t[i])(enc["seg_emb"], segs)
           + enc["pos_emb"][:, :S][:, None, :, :])
    emb = emb.reshape(E, BS, HIDDEN).astype(jnp.float32)

    add_mask = (1.0 - masks.astype(jnp.float32)) * -1e9              # (2, B, S)

    kern = functools.partial(
        _biencoder_kernel, B=B, S=S, NH=NUM_HEADS, Dh=HIDDEN // NUM_HEADS,
        L=NUM_LAYERS, eps=1e-12, rep_pos=int(representation_token_pos))

    # Single pallas_call, no grid: everything (both encoders, all layers,
    # pooler, classifier) runs in one kernel invocation, fully VMEM-resident.
    logits_pad = pl.pallas_call(
        kern,
        out_shape=jax.ShapeDtypeStruct((B, CLS_PAD), jnp.float32),
    )(emb, add_mask, enc["emb_ln_g"], enc["emb_ln_b"],
      enc["wqkv"], enc["bqkv"], enc["wo"], enc["bo"],
      enc["ln1_g"], enc["ln1_b"], enc["w1"], enc["b1"],
      enc["w2"], enc["b2"], enc["ln2_g"], enc["ln2_b"],
      enc["wp"], enc["bp"], params["wc"], params["bc"])

    return logits_pad[:, :2]


# ----------------------------------- main -----------------------------------

if __name__ == "__main__":
    B, S = 2, 8
    key = jax.random.PRNGKey(0)
    k_params, k_q, k_p = jax.random.split(key, 3)

    params = init_biencoder_params(k_params)

    query_ids = jax.random.randint(k_q, (B, S), 0, VOCAB, dtype=jnp.int32)
    passage_ids = jax.random.randint(k_p, (B, S), 0, VOCAB, dtype=jnp.int32)
    query_segments = jnp.zeros((B, S), jnp.int32)
    passage_segments = jnp.zeros((B, S), jnp.int32)
    # simple masks: queries fully valid, passages with last two tokens padded
    query_attention_mask = jnp.ones((B, S), jnp.int32)
    passage_attention_mask = jnp.concatenate(
        [jnp.ones((B, S - 2), jnp.int32), jnp.zeros((B, 2), jnp.int32)], axis=1)

    fwd = jax.jit(functools.partial(
        biencoder_forward, encoder_type=None, representation_token_pos=0))

    logits = fwd(params, query_ids, query_segments, query_attention_mask,
                 passage_ids, passage_segments, passage_attention_mask)
    logits = jax.block_until_ready(logits)

    assert logits.shape == (B, 2), logits.shape
    assert logits.dtype == jnp.float32
    assert bool(jnp.all(jnp.isfinite(logits)))
    print("KERNEL_OK")
</pallas_src>

<mosaic_0001>
module attributes {stable_mosaic.version = 11 : i64} {
  func.func @_biencoder_kernel(%arg0: memref<2x16x32xf32, #tpu.memory_space<vmem>>, %arg1: memref<2x2x8xf32, #tpu.memory_space<vmem>>, %arg2: memref<2x1x32xf32, #tpu.memory_space<vmem>>, %arg3: memref<2x1x32xf32, #tpu.memory_space<vmem>>, %arg4: memref<2x2x32x96xbf16, #tpu.memory_space<vmem>>, %arg5: memref<2x2x1x96xf32, #tpu.memory_space<vmem>>, %arg6: memref<2x2x2x16x32xbf16, #tpu.memory_space<vmem>>, %arg7: memref<2x2x1x32xf32, #tpu.memory_space<vmem>>, %arg8: memref<2x2x1x32xf32, #tpu.memory_space<vmem>>, %arg9: memref<2x2x1x32xf32, #tpu.memory_space<vmem>>, %arg10: memref<2x2x32x64xbf16, #tpu.memory_space<vmem>>, %arg11: memref<2x2x1x64xf32, #tpu.memory_space<vmem>>, %arg12: memref<2x2x64x32xbf16, #tpu.memory_space<vmem>>, %arg13: memref<2x2x1x32xf32, #tpu.memory_space<vmem>>, %arg14: memref<2x2x1x32xf32, #tpu.memory_space<vmem>>, %arg15: memref<2x2x1x32xf32, #tpu.memory_space<vmem>>, %arg16: memref<2x32x32xbf16, #tpu.memory_space<vmem>>, %arg17: memref<2x1x32xf32, #tpu.memory_space<vmem>>, %arg18: memref<2x32x128xbf16, #tpu.memory_space<vmem>>, %arg19: memref<1x128xf32, #tpu.memory_space<vmem>>, %arg20: memref<2x128xf32, #tpu.memory_space<vmem>>) attributes {dimension_semantics = [], scalar_prefetch = 0 : i64, scratch_operands = 0 : i64, tpu.core_type = #tpu.core_type<tc>} {
    %cst = arith.constant 0.000000e+00 : f32
    %0 = vector.broadcast %cst : f32 to vector<2x128xf32>
    %c0 = arith.constant 0 : index
    %c0_0 = arith.constant 0 : index
    %c0_1 = arith.constant 0 : index
    %1 = vector.load %arg1[%c0, %c0_0, %c0_1] : memref<2x2x8xf32, #tpu.memory_space<vmem>>, vector<1x2x8xf32>
    %2 = vector.shape_cast %1 : vector<1x2x8xf32> to vector<2x8xf32>
    %c0_2 = arith.constant 0 : index
    %c0_3 = arith.constant 0 : index
    %c0_4 = arith.constant 0 : index
    %3 = vector.load %arg0[%c0_2, %c0_3, %c0_4] : memref<2x16x32xf32, #tpu.memory_space<vmem>>, vector<1x16x32xf32>
    %4 = vector.shape_cast %3 : vector<1x16x32xf32> to vector<16x32xf32>
    %c0_5 = arith.constant 0 : index
    %c0_6 = arith.constant 0 : index
    %c0_7 = arith.constant 0 : index
    %5 = vector.load %arg2[%c0_5, %c0_6, %c0_7] : memref<2x1x32xf32, #tpu.memory_space<vmem>>, vector<1x1x32xf32>
    %6 = vector.shape_cast %5 : vector<1x1x32xf32> to vector<1x32xf32>
    %c0_8 = arith.constant 0 : index
    %c0_9 = arith.constant 0 : index
    %c0_10 = arith.constant 0 : index
    %7 = vector.load %arg3[%c0_8, %c0_9, %c0_10] : memref<2x1x32xf32, #tpu.memory_space<vmem>>, vector<1x1x32xf32>
    %8 = vector.shape_cast %7 : vector<1x1x32xf32> to vector<1x32xf32>
    %cst_11 = arith.constant dense<0.000000e+00> : vector<16xf32>
    %9 = vector.multi_reduction <add>, %4, %cst_11 [1] : vector<16x32xf32> to vector<16xf32>
    %10 = vector.shape_cast %9 : vector<16xf32> to vector<16x1xf32>
    %cst_12 = arith.constant 3.200000e+01 : f32
    %11 = vector.broadcast %cst_12 : f32 to vector<16x1xf32>
    %12 = arith.divf %10, %11 : vector<16x1xf32>
    %13 = vector.broadcast %12 : vector<16x1xf32> to vector<16x32xf32>
    %14 = arith.subf %4, %13 : vector<16x32xf32>
    %15 = arith.mulf %14, %14 : vector<16x32xf32>
    %cst_13 = arith.constant dense<0.000000e+00> : vector<16xf32>
    %16 = vector.multi_reduction <add>, %15, %cst_13 [1] : vector<16x32xf32> to vector<16xf32>
    %17 = vector.shape_cast %16 : vector<16xf32> to vector<16x1xf32>
    %cst_14 = arith.constant 3.200000e+01 : f32
    %18 = vector.broadcast %cst_14 : f32 to vector<16x1xf32>
    %19 = arith.divf %17, %18 : vector<16x1xf32>
    %cst_15 = arith.constant 9.99999996E-13 : f32
    %20 = vector.broadcast %cst_15 : f32 to vector<16x1xf32>
    %21 = arith.addf %19, %20 : vector<16x1xf32>
    %22 = math.rsqrt %21 : vector<16x1xf32>
    %23 = vector.broadcast %22 : vector<16x1xf32> to vector<16x32xf32>
    %24 = arith.mulf %14, %23 : vector<16x32xf32>
    %25 = vector.broadcast %6 : vector<1x32xf32> to vector<16x32xf32>
    %26 = arith.mulf %24, %25 : vector<16x32xf32>
    %27 = vector.broadcast %8 : vector<1x32xf32> to vector<16x32xf32>
    %28 = arith.addf %26, %27 : vector<16x32xf32>
    %29 = arith.truncf %28 : vector<16x32xf32> to vector<16x32xbf16>
    %c0_16 = arith.constant 0 : index
    %c0_17 = arith.constant 0 : index
    %c0_18 = arith.constant 0 : index
    %c0_19 = arith.constant 0 : index
    %30 = vector.load %arg4[%c0_16, %c0_17, %c0_18, %c0_19] : memref<2x2x32x96xbf16, #tpu.memory_space<vmem>>, vector<1x1x32x96xbf16>
    %31 = vector.shape_cast %30 : vector<1x1x32x96xbf16> to vector<32x96xbf16>
    %cst_20 = arith.constant dense<0.000000e+00> : vector<16x96xf32>
    %32 = tpu.matmul %29, %31, %cst_20 {dimension_numbers = #tpu.dot_dimension_numbers<[1], [0], [0], [1], [0, 0, 1, 1], [], []>} : vector<16x32xbf16>, vector<32x96xbf16>, vector<16x96xf32> -> vector<16x96xf32>
    %c0_21 = arith.constant 0 : index
    %c0_22 = arith.constant 0 : index
    %c0_23 = arith.constant 0 : index
    %c0_24 = arith.constant 0 : index
    %33 = vector.load %arg5[%c0_21, %c0_22, %c0_23, %c0_24] : memref<2x2x1x96xf32, #tpu.memory_space<vmem>>, vector<1x1x1x96xf32>
    %34 = vector.shape_cast %33 : vector<1x1x1x96xf32> to vector<1x96xf32>
    %35 = vector.broadcast %34 : vector<1x96xf32> to vector<16x96xf32>
    %36 = arith.addf %32, %35 : vector<16x96xf32>
    %cst_25 = arith.constant 0.000000e+00 : f32
    %37 = vector.broadcast %cst_25 : f32 to vector<16x32xf32>
    %38 = vector.extract_strided_slice %36 {offsets = [0, 0], sizes = [16, 16], strides = [1, 1]} : vector<16x96xf32> to vector<16x16xf32>
    %39 = vector.shape_cast %38 : vector<16x16xf32> to vector<2x8x16xf32>
    %40 = vector.extract_strided_slice %36 {offsets = [0, 32], sizes = [16, 16], strides = [1, 1]} : vector<16x96xf32> to vector<16x16xf32>
    %41 = vector.shape_cast %40 : vector<16x16xf32> to vector<2x8x16xf32>
    %42 = vector.extract_strided_slice %36 {offsets = [0, 64], sizes = [16, 16], strides = [1, 1]} : vector<16x96xf32> to vector<16x16xf32>
    %43 = vector.shape_cast %42 : vector<16x16xf32> to vector<2x8x16xf32>
    %44 = arith.truncf %39 : vector<2x8x16xf32> to vector<2x8x16xbf16>
    %45 = arith.truncf %41 : vector<2x8x16xf32> to vector<2x8x16xbf16>
    "tpu.trace_start"() <{level = 10 : i32, message = "bqd,bkd->bqk"}> : () -> ()
    %cst_26 = arith.constant dense<0.000000e+00> : vector<2x8x8xf32>
    %46 = tpu.matmul %44, %45, %cst_26 {dimension_numbers = #tpu.dot_dimension_numbers<[2], [2], [1], [1], [0, 0, 0, 1, 1, 1], [0], [0]>} : vector<2x8x16xbf16>, vector<2x8x16xbf16>, vector<2x8x8xf32> -> vector<2x8x8xf32>
    "tpu.trace_stop"() : () -> ()
    %cst_27 = arith.constant 2.500000e-01 : f32
    %47 = vector.broadcast %cst_27 : f32 to vector<2x8x8xf32>
    %48 = arith.mulf %46, %47 : vector<2x8x8xf32>
    %49 = vector.shape_cast %2 : vector<2x8xf32> to vector<2x1x8xf32>
    %50 = vector.broadcast %49 : vector<2x1x8xf32> to vector<2x8x8xf32>
    %51 = arith.addf %48, %50 : vector<2x8x8xf32>
    %cst_28 = arith.constant dense<0xFF800000> : vector<2x8xf32>
    %52 = vector.multi_reduction <maximumf>, %51, %cst_28 [2] : vector<2x8x8xf32> to vector<2x8xf32>
    %53 = vector.shape_cast %52 : vector<2x8xf32> to vector<2x8x1xf32>
    %54 = vector.broadcast %53 : vector<2x8x1xf32> to vector<2x8x8xf32>
    %55 = arith.subf %51, %54 : vector<2x8x8xf32>
    %56 = math.exp %55 : vector<2x8x8xf32>
    %cst_29 = arith.constant dense<0.000000e+00> : vector<2x8xf32>
    %57 = vector.multi_reduction <add>, %56, %cst_29 [2] : vector<2x8x8xf32> to vector<2x8xf32>
    %58 = vector.shape_cast %57 : vector<2x8xf32> to vector<2x8x1xf32>
    %59 = tpu.reciprocal %58 {approx = true} : vector<2x8x1xf32> -> vector<2x8x1xf32>
    %60 = vector.broadcast %59 : vector<2x8x1xf32> to vector<2x8x8xf32>
    %61 = arith.mulf %56, %60 : vector<2x8x8xf32>
    %62 = arith.truncf %61 : vector<2x8x8xf32> to vector<2x8x8xbf16>
    %63 = arith.truncf %43 : vector<2x8x16xf32> to vector<2x8x16xbf16>
    "tpu.trace_start"() <{level = 10 : i32, message = "bqk,bkd->bqd"}> : () -> ()
    %cst_30 = arith.constant dense<0.000000e+00> : vector<2x8x16xf32>
    %64 = tpu.matmul %62, %63, %cst_30 {dimension_numbers = #tpu.dot_dimension_numbers<[2], [1], [1], [2], [0, 0, 0, 1, 1, 2], [0], [0]>} : vector<2x8x8xbf16>, vector<2x8x16xbf16>, vector<2x8x16xf32> -> vector<2x8x16xf32>
    "tpu.trace_stop"() : () -> ()
    %65 = vector.shape_cast %64 : vector<2x8x16xf32> to vector<16x16xf32>
    %66 = arith.truncf %65 : vector<16x16xf32> to vector<16x16xbf16>
    %c0_31 = arith.constant 0 : index
    %c0_32 = arith.constant 0 : index
    %c0_33 = arith.constant 0 : index
    %c0_34 = arith.constant 0 : index
    %c0_35 = arith.constant 0 : index
    %67 = vector.load %arg6[%c0_31, %c0_32, %c0_33, %c0_34, %c0_35] : memref<2x2x2x16x32xbf16, #tpu.memory_space<vmem>>, vector<1x1x1x16x32xbf16>
    %68 = vector.shape_cast %67 : vector<1x1x1x16x32xbf16> to vector<16x32xbf16>
    %cst_36 = arith.constant dense<0.000000e+00> : vector<16x32xf32>
    %69 = tpu.matmul %66, %68, %cst_36 {dimension_numbers = #tpu.dot_dimension_numbers<[1], [0], [0], [1], [0, 0, 1, 1], [], []>} : vector<16x16xbf16>, vector<16x32xbf16>, vector<16x32xf32> -> vector<16x32xf32>
    %70 = arith.addf %37, %69 : vector<16x32xf32>
    %71 = vector.extract_strided_slice %36 {offsets = [0, 16], sizes = [16, 16], strides = [1, 1]} : vector<16x96xf32> to vector<16x16xf32>
    %72 = vector.shape_cast %71 : vector<16x16xf32> to vector<2x8x16xf32>
    %73 = vector.extract_strided_slice %36 {offsets = [0, 48], sizes = [16, 16], strides = [1, 1]} : vector<16x96xf32> to vector<16x16xf32>
    %74 = vector.shape_cast %73 : vector<16x16xf32> to vector<2x8x16xf32>
    %75 = vector.extract_strided_slice %36 {offsets = [0, 80], sizes = [16, 16], strides = [1, 1]} : vector<16x96xf32> to vector<16x16xf32>
    %76 = vector.shape_cast %75 : vector<16x16xf32> to vector<2x8x16xf32>
    %77 = arith.truncf %72 : vector<2x8x16xf32> to vector<2x8x16xbf16>
    %78 = arith.truncf %74 : vector<2x8x16xf32> to vector<2x8x16xbf16>
    "tpu.trace_start"() <{level = 10 : i32, message = "bqd,bkd->bqk"}> : () -> ()
    %cst_37 = arith.constant dense<0.000000e+00> : vector<2x8x8xf32>
    %79 = tpu.matmul %77, %78, %cst_37 {dimension_numbers = #tpu.dot_dimension_numbers<[2], [2], [1], [1], [0, 0, 0, 1, 1, 1], [0], [0]>} : vector<2x8x16xbf16>, vector<2x8x16xbf16>, vector<2x8x8xf32> -> vector<2x8x8xf32>
    "tpu.trace_stop"() : () -> ()
    %cst_38 = arith.constant 2.500000e-01 : f32
    %80 = vector.broadcast %cst_38 : f32 to vector<2x8x8xf32>
    %81 = arith.mulf %79, %80 : vector<2x8x8xf32>
    %82 = vector.shape_cast %2 : vector<2x8xf32> to vector<2x1x8xf32>
    %83 = vector.broadcast %82 : vector<2x1x8xf32> to vector<2x8x8xf32>
    %84 = arith.addf %81, %83 : vector<2x8x8xf32>
    %cst_39 = arith.constant dense<0xFF800000> : vector<2x8xf32>
    %85 = vector.multi_reduction <maximumf>, %84, %cst_39 [2] : vector<2x8x8xf32> to vector<2x8xf32>
    %86 = vector.shape_cast %85 : vector<2x8xf32> to vector<2x8x1xf32>
    %87 = vector.broadcast %86 : vector<2x8x1xf32> to vector<2x8x8xf32>
    %88 = arith.subf %84, %87 : vector<2x8x8xf32>
    %89 = math.exp %88 : vector<2x8x8xf32>
    %cst_40 = arith.constant dense<0.000000e+00> : vector<2x8xf32>
    %90 = vector.multi_reduction <add>, %89, %cst_40 [2] : vector<2x8x8xf32> to vector<2x8xf32>
    %91 = vector.shape_cast %90 : vector<2x8xf32> to vector<2x8x1xf32>
    %92 = tpu.reciprocal %91 {approx = true} : vector<2x8x1xf32> -> vector<2x8x1xf32>
    %93 = vector.broadcast %92 : vector<2x8x1xf32> to vector<2x8x8xf32>
    %94 = arith.mulf %89, %93 : vector<2x8x8xf32>
    %95 = arith.truncf %94 : vector<2x8x8xf32> to vector<2x8x8xbf16>
    %96 = arith.truncf %76 : vector<2x8x16xf32> to vector<2x8x16xbf16>
    "tpu.trace_start"() <{level = 10 : i32, message = "bqk,bkd->bqd"}> : () -> ()
    %cst_41 = arith.constant dense<0.000000e+00> : vector<2x8x16xf32>
    %97 = tpu.matmul %95, %96, %cst_41 {dimension_numbers = #tpu.dot_dimension_numbers<[2], [1], [1], [2], [0, 0, 0, 1, 1, 2], [0], [0]>} : vector<2x8x8xbf16>, vector<2x8x16xbf16>, vector<2x8x16xf32> -> vector<2x8x16xf32>
    "tpu.trace_stop"() : () -> ()
    %98 = vector.shape_cast %97 : vector<2x8x16xf32> to vector<16x16xf32>
    %99 = arith.truncf %98 : vector<16x16xf32> to vector<16x16xbf16>
    %c0_42 = arith.constant 0 : index
    %c0_43 = arith.constant 0 : index
    %c1 = arith.constant 1 : index
    %c0_44 = arith.constant 0 : index
    %c0_45 = arith.constant 0 : index
    %100 = vector.load %arg6[%c0_42, %c0_43, %c1, %c0_44, %c0_45] : memref<2x2x2x16x32xbf16, #tpu.memory_space<vmem>>, vector<1x1x1x16x32xbf16>
    %101 = vector.shape_cast %100 : vector<1x1x1x16x32xbf16> to vector<16x32xbf16>
    %cst_46 = arith.constant dense<0.000000e+00> : vector<16x32xf32>
    %102 = tpu.matmul %99, %101, %cst_46 {dimension_numbers = #tpu.dot_dimension_numbers<[1], [0], [0], [1], [0, 0, 1, 1], [], []>} : vector<16x16xbf16>, vector<16x32xbf16>, vector<16x32xf32> -> vector<16x32xf32>
    %103 = arith.addf %70, %102 : vector<16x32xf32>
    %c0_47 = arith.constant 0 : index
    %c0_48 = arith.constant 0 : index
    %c0_49 = arith.constant 0 : index
    %c0_50 = arith.constant 0 : index
    %104 = vector.load %arg7[%c0_47, %c0_48, %c0_49, %c0_50] : memref<2x2x1x32xf32, #tpu.memory_space<vmem>>, vector<1x1x1x32xf32>
    %105 = vector.shape_cast %104 : vector<1x1x1x32xf32> to vector<1x32xf32>
    %106 = vector.broadcast %105 : vector<1x32xf32> to vector<16x32xf32>
    %107 = arith.addf %103, %106 : vector<16x32xf32>
    %108 = arith.addf %107, %28 : vector<16x32xf32>
    %c0_51 = arith.constant 0 : index
    %c0_52 = arith.constant 0 : index
    %c0_53 = arith.constant 0 : index
    %c0_54 = arith.constant 0 : index
    %109 = vector.load %arg8[%c0_51, %c0_52, %c0_53, %c0_54] : memref<2x2x1x32xf32, #tpu.memory_space<vmem>>, vector<1x1x1x32xf32>
    %110 = vector.shape_cast %109 : vector<1x1x1x32xf32> to vector<1x32xf32>
    %c0_55 = arith.constant 0 : index
    %c0_56 = arith.constant 0 : index
    %c0_57 = arith.constant 0 : index
    %c0_58 = arith.constant 0 : index
    %111 = vector.load %arg9[%c0_55, %c0_56, %c0_57, %c0_58] : memref<2x2x1x32xf32, #tpu.memory_space<vmem>>, vector<1x1x1x32xf32>
    %112 = vector.shape_cast %111 : vector<1x1x1x32xf32> to vector<1x32xf32>
    %cst_59 = arith.constant dense<0.000000e+00> : vector<16xf32>
    %113 = vector.multi_reduction <add>, %108, %cst_59 [1] : vector<16x32xf32> to vector<16xf32>
    %114 = vector.shape_cast %113 : vector<16xf32> to vector<16x1xf32>
    %cst_60 = arith.constant 3.200000e+01 : f32
    %115 = vector.broadcast %cst_60 : f32 to vector<16x1xf32>
    %116 = arith.divf %114, %115 : vector<16x1xf32>
    %117 = vector.broadcast %116 : vector<16x1xf32> to vector<16x32xf32>
    %118 = arith.subf %108, %117 : vector<16x32xf32>
    %119 = arith.mulf %118, %118 : vector<16x32xf32>
    %cst_61 = arith.constant dense<0.000000e+00> : vector<16xf32>
    %120 = vector.multi_reduction <add>, %119, %cst_61 [1] : vector<16x32xf32> to vector<16xf32>
    %121 = vector.shape_cast %120 : vector<16xf32> to vector<16x1xf32>
    %cst_62 = arith.constant 3.200000e+01 : f32
    %122 = vector.broadcast %cst_62 : f32 to vector<16x1xf32>
    %123 = arith.divf %121, %122 : vector<16x1xf32>
    %cst_63 = arith.constant 9.99999996E-13 : f32
    %124 = vector.broadcast %cst_63 : f32 to vector<16x1xf32>
    %125 = arith.addf %123, %124 : vector<16x1xf32>
    %126 = math.rsqrt %125 : vector<16x1xf32>
    %127 = vector.broadcast %126 : vector<16x1xf32> to vector<16x32xf32>
    %128 = arith.mulf %118, %127 : vector<16x32xf32>
    %129 = vector.broadcast %110 : vector<1x32xf32> to vector<16x32xf32>
    %130 = arith.mulf %128, %129 : vector<16x32xf32>
    %131 = vector.broadcast %112 : vector<1x32xf32> to vector<16x32xf32>
    %132 = arith.addf %130, %131 : vector<16x32xf32>
    %133 = arith.truncf %132 : vector<16x32xf32> to vector<16x32xbf16>
    %c0_64 = arith.constant 0 : index
    %c0_65 = arith.constant 0 : index
    %c0_66 = arith.constant 0 : index
    %c0_67 = arith.constant 0 : index
    %134 = vector.load %arg10[%c0_64, %c0_65, %c0_66, %c0_67] : memref<2x2x32x64xbf16, #tpu.memory_space<vmem>>, vector<1x1x32x64xbf16>
    %135 = vector.shape_cast %134 : vector<1x1x32x64xbf16> to vector<32x64xbf16>
    %cst_68 = arith.constant dense<0.000000e+00> : vector<16x64xf32>
    %136 = tpu.matmul %133, %135, %cst_68 {dimension_numbers = #tpu.dot_dimension_numbers<[1], [0], [0], [1], [0, 0, 1, 1], [], []>} : vector<16x32xbf16>, vector<32x64xbf16>, vector<16x64xf32> -> vector<16x64xf32>
    %c0_69 = arith.constant 0 : index
    %c0_70 = arith.constant 0 : index
    %c0_71 = arith.constant 0 : index
    %c0_72 = arith.constant 0 : index
    %137 = vector.load %arg11[%c0_69, %c0_70, %c0_71, %c0_72] : memref<2x2x1x64xf32, #tpu.memory_space<vmem>>, vector<1x1x1x64xf32>
    %138 = vector.shape_cast %137 : vector<1x1x1x64xf32> to vector<1x64xf32>
    %139 = vector.broadcast %138 : vector<1x64xf32> to vector<16x64xf32>
    %140 = arith.addf %136, %139 : vector<16x64xf32>
    %cst_73 = arith.constant 5.000000e-01 : f32
    %141 = vector.broadcast %cst_73 : f32 to vector<16x64xf32>
    %142 = arith.mulf %141, %140 : vector<16x64xf32>
    %cst_74 = arith.constant 4.471500e-02 : f32
    %143 = vector.broadcast %cst_74 : f32 to vector<16x64xf32>
    %144 = arith.mulf %143, %140 : vector<16x64xf32>
    %145 = arith.mulf %144, %140 : vector<16x64xf32>
    %146 = arith.mulf %145, %140 : vector<16x64xf32>
    %147 = arith.addf %140, %146 : vector<16x64xf32>
    %cst_75 = arith.constant 0.797884583 : f32
    %148 = vector.broadcast %cst_75 : f32 to vector<16x64xf32>
    %149 = arith.mulf %148, %147 : vector<16x64xf32>
    %150 = math.tanh %149 : vector<16x64xf32>
    %cst_76 = arith.constant 1.000000e+00 : f32
    %151 = vector.broadcast %cst_76 : f32 to vector<16x64xf32>
    %152 = arith.addf %151, %150 : vector<16x64xf32>
    %153 = arith.mulf %142, %152 : vector<16x64xf32>
    %154 = arith.truncf %153 : vector<16x64xf32> to vector<16x64xbf16>
    %c0_77 = arith.constant 0 : index
    %c0_78 = arith.constant 0 : index
    %c0_79 = arith.constant 0 : index
    %c0_80 = arith.constant 0 : index
    %155 = vector.load %arg12[%c0_77, %c0_78, %c0_79, %c0_80] : memref<2x2x64x32xbf16, #tpu.memory_space<vmem>>, vector<1x1x64x32xbf16>
    %156 = vector.shape_cast %155 : vector<1x1x64x32xbf16> to vector<64x32xbf16>
    %cst_81 = arith.constant dense<0.000000e+00> : vector<16x32xf32>
    %157 = tpu.matmul %154, %156, %cst_81 {dimension_numbers = #tpu.dot_dimension_numbers<[1], [0], [0], [1], [0, 0, 1, 1], [], []>} : vector<16x64xbf16>, vector<64x32xbf16>, vector<16x32xf32> -> vector<16x32xf32>
    %c0_82 = arith.constant 0 : index
    %c0_83 = arith.constant 0 : index
    %c0_84 = arith.constant 0 : index
    %c0_85 = arith.constant 0 : index
    %158 = vector.load %arg13[%c0_82, %c0_83, %c0_84, %c0_85] : memref<2x2x1x32xf32, #tpu.memory_space<vmem>>, vector<1x1x1x32xf32>
    %159 = vector.shape_cast %158 : vector<1x1x1x32xf32> to vector<1x32xf32>
    %160 = vector.broadcast %159 : vector<1x32xf32> to vector<16x32xf32>
    %161 = arith.addf %157, %160 : vector<16x32xf32>
    %162 = arith.addf %161, %132 : vector<16x32xf32>
    %c0_86 = arith.constant 0 : index
    %c0_87 = arith.constant 0 : index
    %c0_88 = arith.constant 0 : index
    %c0_89 = arith.constant 0 : index
    %163 = vector.load %arg14[%c0_86, %c0_87, %c0_88, %c0_89] : memref<2x2x1x32xf32, #tpu.memory_space<vmem>>, vector<1x1x1x32xf32>
    %164 = vector.shape_cast %163 : vector<1x1x1x32xf32> to vector<1x32xf32>
    %c0_90 = arith.constant 0 : index
    %c0_91 = arith.constant 0 : index
    %c0_92 = arith.constant 0 : index
    %c0_93 = arith.constant 0 : index
    %165 = vector.load %arg15[%c0_90, %c0_91, %c0_92, %c0_93] : memref<2x2x1x32xf32, #tpu.memory_space<vmem>>, vector<1x1x1x32xf32>
    %166 = vector.shape_cast %165 : vector<1x1x1x32xf32> to vector<1x32xf32>
    %cst_94 = arith.constant dense<0.000000e+00> : vector<16xf32>
    %167 = vector.multi_reduction <add>, %162, %cst_94 [1] : vector<16x32xf32> to vector<16xf32>
    %168 = vector.shape_cast %167 : vector<16xf32> to vector<16x1xf32>
    %cst_95 = arith.constant 3.200000e+01 : f32
    %169 = vector.broadcast %cst_95 : f32 to vector<16x1xf32>
    %170 = arith.divf %168, %169 : vector<16x1xf32>
    %171 = vector.broadcast %170 : vector<16x1xf32> to vector<16x32xf32>
    %172 = arith.subf %162, %171 : vector<16x32xf32>
    %173 = arith.mulf %172, %172 : vector<16x32xf32>
    %cst_96 = arith.constant dense<0.000000e+00> : vector<16xf32>
    %174 = vector.multi_reduction <add>, %173, %cst_96 [1] : vector<16x32xf32> to vector<16xf32>
    %175 = vector.shape_cast %174 : vector<16xf32> to vector<16x1xf32>
    %cst_97 = arith.constant 3.200000e+01 : f32
    %176 = vector.broadcast %cst_97 : f32 to vector<16x1xf32>
    %177 = arith.divf %175, %176 : vector<16x1xf32>
    %cst_98 = arith.constant 9.99999996E-13 : f32
    %178 = vector.broadcast %cst_98 : f32 to vector<16x1xf32>
    %179 = arith.addf %177, %178 : vector<16x1xf32>
    %180 = math.rsqrt %179 : vector<16x1xf32>
    %181 = vector.broadcast %180 : vector<16x1xf32> to vector<16x32xf32>
    %182 = arith.mulf %172, %181 : vector<16x32xf32>
    %183 = vector.broadcast %164 : vector<1x32xf32> to vector<16x32xf32>
    %184 = arith.mulf %182, %183 : vector<16x32xf32>
    %185 = vector.broadcast %166 : vector<1x32xf32> to vector<16x32xf32>
    %186 = arith.addf %184, %185 : vector<16x32xf32>
    %187 = arith.truncf %186 : vector<16x32xf32> to vector<16x32xbf16>
    %c0_99 = arith.constant 0 : index
    %c1_100 = arith.constant 1 : index
    %c0_101 = arith.constant 0 : index
    %c0_102 = arith.constant 0 : index
    %188 = vector.load %arg4[%c0_99, %c1_100, %c0_101, %c0_102] : memref<2x2x32x96xbf16, #tpu.memory_space<vmem>>, vector<1x1x32x96xbf16>
    %189 = vector.shape_cast %188 : vector<1x1x32x96xbf16> to vector<32x96xbf16>
    %cst_103 = arith.constant dense<0.000000e+00> : vector<16x96xf32>
    %190 = tpu.matmul %187, %189, %cst_103 {dimension_numbers = #tpu.dot_dimension_numbers<[1], [0], [0], [1], [0, 0, 1, 1], [], []>} : vector<16x32xbf16>, vector<32x96xbf16>, vector<16x96xf32> -> vector<16x96xf32>
    %c0_104 = arith.constant 0 : index
    %c1_105 = arith.constant 1 : index
    %c0_106 = arith.constant 0 : index
    %c0_107 = arith.constant 0 : index
    %191 = vector.load %arg5[%c0_104, %c1_105, %c0_106, %c0_107] : memref<2x2x1x96xf32, #tpu.memory_space<vmem>>, vector<1x1x1x96xf32>
    %192 = vector.shape_cast %191 : vector<1x1x1x96xf32> to vector<1x96xf32>
    %193 = vector.broadcast %192 : vector<1x96xf32> to vector<16x96xf32>
    %194 = arith.addf %190, %193 : vector<16x96xf32>
    %cst_108 = arith.constant 0.000000e+00 : f32
    %195 = vector.broadcast %cst_108 : f32 to vector<16x32xf32>
    %196 = vector.extract_strided_slice %194 {offsets = [0, 0], sizes = [16, 16], strides = [1, 1]} : vector<16x96xf32> to vector<16x16xf32>
    %197 = vector.shape_cast %196 : vector<16x16xf32> to vector<2x8x16xf32>
    %198 = vector.extract_strided_slice %194 {offsets = [0, 32], sizes = [16, 16], strides = [1, 1]} : vector<16x96xf32> to vector<16x16xf32>
    %199 = vector.shape_cast %198 : vector<16x16xf32> to vector<2x8x16xf32>
    %200 = vector.extract_strided_slice %194 {offsets = [0, 64], sizes = [16, 16], strides = [1, 1]} : vector<16x96xf32> to vector<16x16xf32>
    %201 = vector.shape_cast %200 : vector<16x16xf32> to vector<2x8x16xf32>
    %202 = arith.truncf %197 : vector<2x8x16xf32> to vector<2x8x16xbf16>
    %203 = arith.truncf %199 : vector<2x8x16xf32> to vector<2x8x16xbf16>
    "tpu.trace_start"() <{level = 10 : i32, message = "bqd,bkd->bqk"}> : () -> ()
    %cst_109 = arith.constant dense<0.000000e+00> : vector<2x8x8xf32>
    %204 = tpu.matmul %202, %203, %cst_109 {dimension_numbers = #tpu.dot_dimension_numbers<[2], [2], [1], [1], [0, 0, 0, 1, 1, 1], [0], [0]>} : vector<2x8x16xbf16>, vector<2x8x16xbf16>, vector<2x8x8xf32> -> vector<2x8x8xf32>
    "tpu.trace_stop"() : () -> ()
    %cst_110 = arith.constant 2.500000e-01 : f32
    %205 = vector.broadcast %cst_110 : f32 to vector<2x8x8xf32>
    %206 = arith.mulf %204, %205 : vector<2x8x8xf32>
    %207 = vector.shape_cast %2 : vector<2x8xf32> to vector<2x1x8xf32>
    %208 = vector.broadcast %207 : vector<2x1x8xf32> to vector<2x8x8xf32>
    %209 = arith.addf %206, %208 : vector<2x8x8xf32>
    %cst_111 = arith.constant dense<0xFF800000> : vector<2x8xf32>
    %210 = vector.multi_reduction <maximumf>, %209, %cst_111 [2] : vector<2x8x8xf32> to vector<2x8xf32>
    %211 = vector.shape_cast %210 : vector<2x8xf32> to vector<2x8x1xf32>
    %212 = vector.broadcast %211 : vector<2x8x1xf32> to vector<2x8x8xf32>
    %213 = arith.subf %209, %212 : vector<2x8x8xf32>
    %214 = math.exp %213 : vector<2x8x8xf32>
    %cst_112 = arith.constant dense<0.000000e+00> : vector<2x8xf32>
    %215 = vector.multi_reduction <add>, %214, %cst_112 [2] : vector<2x8x8xf32> to vector<2x8xf32>
    %216 = vector.shape_cast %215 : vector<2x8xf32> to vector<2x8x1xf32>
    %217 = tpu.reciprocal %216 {approx = true} : vector<2x8x1xf32> -> vector<2x8x1xf32>
    %218 = vector.broadcast %217 : vector<2x8x1xf32> to vector<2x8x8xf32>
    %219 = arith.mulf %214, %218 : vector<2x8x8xf32>
    %220 = arith.truncf %219 : vector<2x8x8xf32> to vector<2x8x8xbf16>
    %221 = arith.truncf %201 : vector<2x8x16xf32> to vector<2x8x16xbf16>
    "tpu.trace_start"() <{level = 10 : i32, message = "bqk,bkd->bqd"}> : () -> ()
    %cst_113 = arith.constant dense<0.000000e+00> : vector<2x8x16xf32>
    %222 = tpu.matmul %220, %221, %cst_113 {dimension_numbers = #tpu.dot_dimension_numbers<[2], [1], [1], [2], [0, 0, 0, 1, 1, 2], [0], [0]>} : vector<2x8x8xbf16>, vector<2x8x16xbf16>, vector<2x8x16xf32> -> vector<2x8x16xf32>
    "tpu.trace_stop"() : () -> ()
    %223 = vector.shape_cast %222 : vector<2x8x16xf32> to vector<16x16xf32>
    %224 = arith.truncf %223 : vector<16x16xf32> to vector<16x16xbf16>
    %c0_114 = arith.constant 0 : index
    %c1_115 = arith.constant 1 : index
    %c0_116 = arith.constant 0 : index
    %c0_117 = arith.constant 0 : index
    %c0_118 = arith.constant 0 : index
    %225 = vector.load %arg6[%c0_114, %c1_115, %c0_116, %c0_117, %c0_118] : memref<2x2x2x16x32xbf16, #tpu.memory_space<vmem>>, vector<1x1x1x16x32xbf16>
    %226 = vector.shape_cast %225 : vector<1x1x1x16x32xbf16> to vector<16x32xbf16>
    %cst_119 = arith.constant dense<0.000000e+00> : vector<16x32xf32>
    %227 = tpu.matmul %224, %226, %cst_119 {dimension_numbers = #tpu.dot_dimension_numbers<[1], [0], [0], [1], [0, 0, 1, 1], [], []>} : vector<16x16xbf16>, vector<16x32xbf16>, vector<16x32xf32> -> vector<16x32xf32>
    %228 = arith.addf %195, %227 : vector<16x32xf32>
    %229 = vector.extract_strided_slice %194 {offsets = [0, 16], sizes = [16, 16], strides = [1, 1]} : vector<16x96xf32> to vector<16x16xf32>
    %230 = vector.shape_cast %229 : vector<16x16xf32> to vector<2x8x16xf32>
    %231 = vector.extract_strided_slice %194 {offsets = [0, 48], sizes = [16, 16], strides = [1, 1]} : vector<16x96xf32> to vector<16x16xf32>
    %232 = vector.shape_cast %231 : vector<16x16xf32> to vector<2x8x16xf32>
    %233 = vector.extract_strided_slice %194 {offsets = [0, 80], sizes = [16, 16], strides = [1, 1]} : vector<16x96xf32> to vector<16x16xf32>
    %234 = vector.shape_cast %233 : vector<16x16xf32> to vector<2x8x16xf32>
    %235 = arith.truncf %230 : vector<2x8x16xf32> to vector<2x8x16xbf16>
    %236 = arith.truncf %232 : vector<2x8x16xf32> to vector<2x8x16xbf16>
    "tpu.trace_start"() <{level = 10 : i32, message = "bqd,bkd->bqk"}> : () -> ()
    %cst_120 = arith.constant dense<0.000000e+00> : vector<2x8x8xf32>
    %237 = tpu.matmul %235, %236, %cst_120 {dimension_numbers = #tpu.dot_dimension_numbers<[2], [2], [1], [1], [0, 0, 0, 1, 1, 1], [0], [0]>} : vector<2x8x16xbf16>, vector<2x8x16xbf16>, vector<2x8x8xf32> -> vector<2x8x8xf32>
    "tpu.trace_stop"() : () -> ()
    %cst_121 = arith.constant 2.500000e-01 : f32
    %238 = vector.broadcast %cst_121 : f32 to vector<2x8x8xf32>
    %239 = arith.mulf %237, %238 : vector<2x8x8xf32>
    %240 = vector.shape_cast %2 : vector<2x8xf32> to vector<2x1x8xf32>
    %241 = vector.broadcast %240 : vector<2x1x8xf32> to vector<2x8x8xf32>
    %242 = arith.addf %239, %241 : vector<2x8x8xf32>
    %cst_122 = arith.constant dense<0xFF800000> : vector<2x8xf32>
    %243 = vector.multi_reduction <maximumf>, %242, %cst_122 [2] : vector<2x8x8xf32> to vector<2x8xf32>
    %244 = vector.shape_cast %243 : vector<2x8xf32> to vector<2x8x1xf32>
    %245 = vector.broadcast %244 : vector<2x8x1xf32> to vector<2x8x8xf32>
    %246 = arith.subf %242, %245 : vector<2x8x8xf32>
    %247 = math.exp %246 : vector<2x8x8xf32>
    %cst_123 = arith.constant dense<0.000000e+00> : vector<2x8xf32>
    %248 = vector.multi_reduction <add>, %247, %cst_123 [2] : vector<2x8x8xf32> to vector<2x8xf32>
    %249 = vector.shape_cast %248 : vector<2x8xf32> to vector<2x8x1xf32>
    %250 = tpu.reciprocal %249 {approx = true} : vector<2x8x1xf32> -> vector<2x8x1xf32>
    %251 = vector.broadcast %250 : vector<2x8x1xf32> to vector<2x8x8xf32>
    %252 = arith.mulf %247, %251 : vector<2x8x8xf32>
    %253 = arith.truncf %252 : vector<2x8x8xf32> to vector<2x8x8xbf16>
    %254 = arith.truncf %234 : vector<2x8x16xf32> to vector<2x8x16xbf16>
    "tpu.trace_start"() <{level = 10 : i32, message = "bqk,bkd->bqd"}> : () -> ()
    %cst_124 = arith.constant dense<0.000000e+00> : vector<2x8x16xf32>
    %255 = tpu.matmul %253, %254, %cst_124 {dimension_numbers = #tpu.dot_dimension_numbers<[2], [1], [1], [2], [0, 0, 0, 1, 1, 2], [0], [0]>} : vector<2x8x8xbf16>, vector<2x8x16xbf16>, vector<2x8x16xf32> -> vector<2x8x16xf32>
    "tpu.trace_stop"() : () -> ()
    %256 = vector.shape_cast %255 : vector<2x8x16xf32> to vector<16x16xf32>
    %257 = arith.truncf %256 : vector<16x16xf32> to vector<16x16xbf16>
    %c0_125 = arith.constant 0 : index
    %c1_126 = arith.constant 1 : index
    %c1_127 = arith.constant 1 : index
    %c0_128 = arith.constant 0 : index
    %c0_129 = arith.constant 0 : index
    %258 = vector.load %arg6[%c0_125, %c1_126, %c1_127, %c0_128, %c0_129] : memref<2x2x2x16x32xbf16, #tpu.memory_space<vmem>>, vector<1x1x1x16x32xbf16>
    %259 = vector.shape_cast %258 : vector<1x1x1x16x32xbf16> to vector<16x32xbf16>
    %cst_130 = arith.constant dense<0.000000e+00> : vector<16x32xf32>
    %260 = tpu.matmul %257, %259, %cst_130 {dimension_numbers = #tpu.dot_dimension_numbers<[1], [0], [0], [1], [0, 0, 1, 1], [], []>} : vector<16x16xbf16>, vector<16x32xbf16>, vector<16x32xf32> -> vector<16x32xf32>
    %261 = arith.addf %228, %260 : vector<16x32xf32>
    %c0_131 = arith.constant 0 : index
    %c1_132 = arith.constant 1 : index
    %c0_133 = arith.constant 0 : index
    %c0_134 = arith.constant 0 : index
    %262 = vector.load %arg7[%c0_131, %c1_132, %c0_133, %c0_134] : memref<2x2x1x32xf32, #tpu.memory_space<vmem>>, vector<1x1x1x32xf32>
    %263 = vector.shape_cast %262 : vector<1x1x1x32xf32> to vector<1x32xf32>
    %264 = vector.broadcast %263 : vector<1x32xf32> to vector<16x32xf32>
    %265 = arith.addf %261, %264 : vector<16x32xf32>
    %266 = arith.addf %265, %186 : vector<16x32xf32>
    %c0_135 = arith.constant 0 : index
    %c1_136 = arith.constant 1 : index
    %c0_137 = arith.constant 0 : index
    %c0_138 = arith.constant 0 : index
    %267 = vector.load %arg8[%c0_135, %c1_136, %c0_137, %c0_138] : memref<2x2x1x32xf32, #tpu.memory_space<vmem>>, vector<1x1x1x32xf32>
    %268 = vector.shape_cast %267 : vector<1x1x1x32xf32> to vector<1x32xf32>
    %c0_139 = arith.constant 0 : index
    %c1_140 = arith.constant 1 : index
    %c0_141 = arith.constant 0 : index
    %c0_142 = arith.constant 0 : index
    %269 = vector.load %arg9[%c0_139, %c1_140, %c0_141, %c0_142] : memref<2x2x1x32xf32, #tpu.memory_space<vmem>>, vector<1x1x1x32xf32>
    %270 = vector.shape_cast %269 : vector<1x1x1x32xf32> to vector<1x32xf32>
    %cst_143 = arith.constant dense<0.000000e+00> : vector<16xf32>
    %271 = vector.multi_reduction <add>, %266, %cst_143 [1] : vector<16x32xf32> to vector<16xf32>
    %272 = vector.shape_cast %271 : vector<16xf32> to vector<16x1xf32>
    %cst_144 = arith.constant 3.200000e+01 : f32
    %273 = vector.broadcast %cst_144 : f32 to vector<16x1xf32>
    %274 = arith.divf %272, %273 : vector<16x1xf32>
    %275 = vector.broadcast %274 : vector<16x1xf32> to vector<16x32xf32>
    %276 = arith.subf %266, %275 : vector<16x32xf32>
    %277 = arith.mulf %276, %276 : vector<16x32xf32>
    %cst_145 = arith.constant dense<0.000000e+00> : vector<16xf32>
    %278 = vector.multi_reduction <add>, %277, %cst_145 [1] : vector<16x32xf32> to vector<16xf32>
    %279 = vector.shape_cast %278 : vector<16xf32> to vector<16x1xf32>
    %cst_146 = arith.constant 3.200000e+01 : f32
    %280 = vector.broadcast %cst_146 : f32 to vector<16x1xf32>
    %281 = arith.divf %279, %280 : vector<16x1xf32>
    %cst_147 = arith.constant 9.99999996E-13 : f32
    %282 = vector.broadcast %cst_147 : f32 to vector<16x1xf32>
    %283 = arith.addf %281, %282 : vector<16x1xf32>
    %284 = math.rsqrt %283 : vector<16x1xf32>
    %285 = vector.broadcast %284 : vector<16x1xf32> to vector<16x32xf32>
    %286 = arith.mulf %276, %285 : vector<16x32xf32>
    %287 = vector.broadcast %268 : vector<1x32xf32> to vector<16x32xf32>
    %288 = arith.mulf %286, %287 : vector<16x32xf32>
    %289 = vector.broadcast %270 : vector<1x32xf32> to vector<16x32xf32>
    %290 = arith.addf %288, %289 : vector<16x32xf32>
    %291 = arith.truncf %290 : vector<16x32xf32> to vector<16x32xbf16>
    %c0_148 = arith.constant 0 : index
    %c1_149 = arith.constant 1 : index
    %c0_150 = arith.constant 0 : index
    %c0_151 = arith.constant 0 : index
    %292 = vector.load %arg10[%c0_148, %c1_149, %c0_150, %c0_151] : memref<2x2x32x64xbf16, #tpu.memory_space<vmem>>, vector<1x1x32x64xbf16>
    %293 = vector.shape_cast %292 : vector<1x1x32x64xbf16> to vector<32x64xbf16>
    %cst_152 = arith.constant dense<0.000000e+00> : vector<16x64xf32>
    %294 = tpu.matmul %291, %293, %cst_152 {dimension_numbers = #tpu.dot_dimension_numbers<[1], [0], [0], [1], [0, 0, 1, 1], [], []>} : vector<16x32xbf16>, vector<32x64xbf16>, vector<16x64xf32> -> vector<16x64xf32>
    %c0_153 = arith.constant 0 : index
    %c1_154 = arith.constant 1 : index
    %c0_155 = arith.constant 0 : index
    %c0_156 = arith.constant 0 : index
    %295 = vector.load %arg11[%c0_153, %c1_154, %c0_155, %c0_156] : memref<2x2x1x64xf32, #tpu.memory_space<vmem>>, vector<1x1x1x64xf32>
    %296 = vector.shape_cast %295 : vector<1x1x1x64xf32> to vector<1x64xf32>
    %297 = vector.broadcast %296 : vector<1x64xf32> to vector<16x64xf32>
    %298 = arith.addf %294, %297 : vector<16x64xf32>
    %cst_157 = arith.constant 5.000000e-01 : f32
    %299 = vector.broadcast %cst_157 : f32 to vector<16x64xf32>
    %300 = arith.mulf %299, %298 : vector<16x64xf32>
    %cst_158 = arith.constant 4.471500e-02 : f32
    %301 = vector.broadcast %cst_158 : f32 to vector<16x64xf32>
    %302 = arith.mulf %301, %298 : vector<16x64xf32>
    %303 = arith.mulf %302, %298 : vector<16x64xf32>
    %304 = arith.mulf %303, %298 : vector<16x64xf32>
    %305 = arith.addf %298, %304 : vector<16x64xf32>
    %cst_159 = arith.constant 0.797884583 : f32
    %306 = vector.broadcast %cst_159 : f32 to vector<16x64xf32>
    %307 = arith.mulf %306, %305 : vector<16x64xf32>
    %308 = math.tanh %307 : vector<16x64xf32>
    %cst_160 = arith.constant 1.000000e+00 : f32
    %309 = vector.broadcast %cst_160 : f32 to vector<16x64xf32>
    %310 = arith.addf %309, %308 : vector<16x64xf32>
    %311 = arith.mulf %300, %310 : vector<16x64xf32>
    %312 = arith.truncf %311 : vector<16x64xf32> to vector<16x64xbf16>
    %c0_161 = arith.constant 0 : index
    %c1_162 = arith.constant 1 : index
    %c0_163 = arith.constant 0 : index
    %c0_164 = arith.constant 0 : index
    %313 = vector.load %arg12[%c0_161, %c1_162, %c0_163, %c0_164] : memref<2x2x64x32xbf16, #tpu.memory_space<vmem>>, vector<1x1x64x32xbf16>
    %314 = vector.shape_cast %313 : vector<1x1x64x32xbf16> to vector<64x32xbf16>
    %cst_165 = arith.constant dense<0.000000e+00> : vector<16x32xf32>
    %315 = tpu.matmul %312, %314, %cst_165 {dimension_numbers = #tpu.dot_dimension_numbers<[1], [0], [0], [1], [0, 0, 1, 1], [], []>} : vector<16x64xbf16>, vector<64x32xbf16>, vector<16x32xf32> -> vector<16x32xf32>
    %c0_166 = arith.constant 0 : index
    %c1_167 = arith.constant 1 : index
    %c0_168 = arith.constant 0 : index
    %c0_169 = arith.constant 0 : index
    %316 = vector.load %arg13[%c0_166, %c1_167, %c0_168, %c0_169] : memref<2x2x1x32xf32, #tpu.memory_space<vmem>>, vector<1x1x1x32xf32>
    %317 = vector.shape_cast %316 : vector<1x1x1x32xf32> to vector<1x32xf32>
    %318 = vector.broadcast %317 : vector<1x32xf32> to vector<16x32xf32>
    %319 = arith.addf %315, %318 : vector<16x32xf32>
    %320 = arith.addf %319, %290 : vector<16x32xf32>
    %c0_170 = arith.constant 0 : index
    %c1_171 = arith.constant 1 : index
    %c0_172 = arith.constant 0 : index
    %c0_173 = arith.constant 0 : index
    %321 = vector.load %arg14[%c0_170, %c1_171, %c0_172, %c0_173] : memref<2x2x1x32xf32, #tpu.memory_space<vmem>>, vector<1x1x1x32xf32>
    %322 = vector.shape_cast %321 : vector<1x1x1x32xf32> to vector<1x32xf32>
    %c0_174 = arith.constant 0 : index
    %c1_175 = arith.constant 1 : index
    %c0_176 = arith.constant 0 : index
    %c0_177 = arith.constant 0 : index
    %323 = vector.load %arg15[%c0_174, %c1_175, %c0_176, %c0_177] : memref<2x2x1x32xf32, #tpu.memory_space<vmem>>, vector<1x1x1x32xf32>
    %324 = vector.shape_cast %323 : vector<1x1x1x32xf32> to vector<1x32xf32>
    %cst_178 = arith.constant dense<0.000000e+00> : vector<16xf32>
    %325 = vector.multi_reduction <add>, %320, %cst_178 [1] : vector<16x32xf32> to vector<16xf32>
    %326 = vector.shape_cast %325 : vector<16xf32> to vector<16x1xf32>
    %cst_179 = arith.constant 3.200000e+01 : f32
    %327 = vector.broadcast %cst_179 : f32 to vector<16x1xf32>
    %328 = arith.divf %326, %327 : vector<16x1xf32>
    %329 = vector.broadcast %328 : vector<16x1xf32> to vector<16x32xf32>
    %330 = arith.subf %320, %329 : vector<16x32xf32>
    %331 = arith.mulf %330, %330 : vector<16x32xf32>
    %cst_180 = arith.constant dense<0.000000e+00> : vector<16xf32>
    %332 = vector.multi_reduction <add>, %331, %cst_180 [1] : vector<16x32xf32> to vector<16xf32>
    %333 = vector.shape_cast %332 : vector<16xf32> to vector<16x1xf32>
    %cst_181 = arith.constant 3.200000e+01 : f32
    %334 = vector.broadcast %cst_181 : f32 to vector<16x1xf32>
    %335 = arith.divf %333, %334 : vector<16x1xf32>
    %cst_182 = arith.constant 9.99999996E-13 : f32
    %336 = vector.broadcast %cst_182 : f32 to vector<16x1xf32>
    %337 = arith.addf %335, %336 : vector<16x1xf32>
    %338 = math.rsqrt %337 : vector<16x1xf32>
    %339 = vector.broadcast %338 : vector<16x1xf32> to vector<16x32xf32>
    %340 = arith.mulf %330, %339 : vector<16x32xf32>
    %341 = vector.broadcast %322 : vector<1x32xf32> to vector<16x32xf32>
    %342 = arith.mulf %340, %341 : vector<16x32xf32>
    %343 = vector.broadcast %324 : vector<1x32xf32> to vector<16x32xf32>
    %344 = arith.addf %342, %343 : vector<16x32xf32>
    %345 = vector.shape_cast %344 : vector<16x32xf32> to vector<2x8x32xf32>
    %346 = vector.extract_strided_slice %345 {offsets = [0, 0, 0], sizes = [2, 1, 32], strides = [1, 1, 1]} : vector<2x8x32xf32> to vector<2x1x32xf32>
    %347 = vector.shape_cast %346 : vector<2x1x32xf32> to vector<2x32xf32>
    %348 = arith.truncf %347 : vector<2x32xf32> to vector<2x32xbf16>
    %c0_183 = arith.constant 0 : index
    %c0_184 = arith.constant 0 : index
    %c0_185 = arith.constant 0 : index
    %349 = vector.load %arg16[%c0_183, %c0_184, %c0_185] : memref<2x32x32xbf16, #tpu.memory_space<vmem>>, vector<1x32x32xbf16>
    %350 = vector.shape_cast %349 : vector<1x32x32xbf16> to vector<32x32xbf16>
    %cst_186 = arith.constant dense<0.000000e+00> : vector<2x32xf32>
    %351 = tpu.matmul %348, %350, %cst_186 {dimension_numbers = #tpu.dot_dimension_numbers<[1], [0], [0], [1], [0, 0, 1, 1], [], []>} : vector<2x32xbf16>, vector<32x32xbf16>, vector<2x32xf32> -> vector<2x32xf32>
    %c0_187 = arith.constant 0 : index
    %c0_188 = arith.constant 0 : index
    %c0_189 = arith.constant 0 : index
    %352 = vector.load %arg17[%c0_187, %c0_188, %c0_189] : memref<2x1x32xf32, #tpu.memory_space<vmem>>, vector<1x1x32xf32>
    %353 = vector.shape_cast %352 : vector<1x1x32xf32> to vector<1x32xf32>
    %354 = vector.broadcast %353 : vector<1x32xf32> to vector<2x32xf32>
    %355 = arith.addf %351, %354 : vector<2x32xf32>
    %356 = math.tanh %355 : vector<2x32xf32>
    %357 = arith.truncf %356 : vector<2x32xf32> to vector<2x32xbf16>
    %c0_190 = arith.constant 0 : index
    %c0_191 = arith.constant 0 : index
    %c0_192 = arith.constant 0 : index
    %358 = vector.load %arg18[%c0_190, %c0_191, %c0_192] : memref<2x32x128xbf16, #tpu.memory_space<vmem>>, vector<1x32x128xbf16>
    %359 = vector.shape_cast %358 : vector<1x32x128xbf16> to vector<32x128xbf16>
    %cst_193 = arith.constant dense<0.000000e+00> : vector<2x128xf32>
    %360 = tpu.matmul %357, %359, %cst_193 {dimension_numbers = #tpu.dot_dimension_numbers<[1], [0], [0], [1], [0, 0, 1, 1], [], []>} : vector<2x32xbf16>, vector<32x128xbf16>, vector<2x128xf32> -> vector<2x128xf32>
    %361 = arith.addf %0, %360 : vector<2x128xf32>
    %c1_194 = arith.constant 1 : index
    %c0_195 = arith.constant 0 : index
    %c0_196 = arith.constant 0 : index
    %362 = vector.load %arg1[%c1_194, %c0_195, %c0_196] : memref<2x2x8xf32, #tpu.memory_space<vmem>>, vector<1x2x8xf32>
    %363 = vector.shape_cast %362 : vector<1x2x8xf32> to vector<2x8xf32>
    %c1_197 = arith.constant 1 : index
    %c0_198 = arith.constant 0 : index
    %c0_199 = arith.constant 0 : index
    %364 = vector.load %arg0[%c1_197, %c0_198, %c0_199] : memref<2x16x32xf32, #tpu.memory_space<vmem>>, vector<1x16x32xf32>
    %365 = vector.shape_cast %364 : vector<1x16x32xf32> to vector<16x32xf32>
    %c1_200 = arith.constant 1 : index
    %c0_201 = arith.constant 0 : index
    %c0_202 = arith.constant 0 : index
    %366 = vector.load %arg2[%c1_200, %c0_201, %c0_202] : memref<2x1x32xf32, #tpu.memory_space<vmem>>, vector<1x1x32xf32>
    %367 = vector.shape_cast %366 : vector<1x1x32xf32> to vector<1x32xf32>
    %c1_203 = arith.constant 1 : index
    %c0_204 = arith.constant 0 : index
    %c0_205 = arith.constant 0 : index
    %368 = vector.load %arg3[%c1_203, %c0_204, %c0_205] : memref<2x1x32xf32, #tpu.memory_space<vmem>>, vector<1x1x32xf32>
    %369 = vector.shape_cast %368 : vector<1x1x32xf32> to vector<1x32xf32>
    %cst_206 = arith.constant dense<0.000000e+00> : vector<16xf32>
    %370 = vector.multi_reduction <add>, %365, %cst_206 [1] : vector<16x32xf32> to vector<16xf32>
    %371 = vector.shape_cast %370 : vector<16xf32> to vector<16x1xf32>
    %cst_207 = arith.constant 3.200000e+01 : f32
    %372 = vector.broadcast %cst_207 : f32 to vector<16x1xf32>
    %373 = arith.divf %371, %372 : vector<16x1xf32>
    %374 = vector.broadcast %373 : vector<16x1xf32> to vector<16x32xf32>
    %375 = arith.subf %365, %374 : vector<16x32xf32>
    %376 = arith.mulf %375, %375 : vector<16x32xf32>
    %cst_208 = arith.constant dense<0.000000e+00> : vector<16xf32>
    %377 = vector.multi_reduction <add>, %376, %cst_208 [1] : vector<16x32xf32> to vector<16xf32>
    %378 = vector.shape_cast %377 : vector<16xf32> to vector<16x1xf32>
    %cst_209 = arith.constant 3.200000e+01 : f32
    %379 = vector.broadcast %cst_209 : f32 to vector<16x1xf32>
    %380 = arith.divf %378, %379 : vector<16x1xf32>
    %cst_210 = arith.constant 9.99999996E-13 : f32
    %381 = vector.broadcast %cst_210 : f32 to vector<16x1xf32>
    %382 = arith.addf %380, %381 : vector<16x1xf32>
    %383 = math.rsqrt %382 : vector<16x1xf32>
    %384 = vector.broadcast %383 : vector<16x1xf32> to vector<16x32xf32>
    %385 = arith.mulf %375, %384 : vector<16x32xf32>
    %386 = vector.broadcast %367 : vector<1x32xf32> to vector<16x32xf32>
    %387 = arith.mulf %385, %386 : vector<16x32xf32>
    %388 = vector.broadcast %369 : vector<1x32xf32> to vector<16x32xf32>
    %389 = arith.addf %387, %388 : vector<16x32xf32>
    %390 = arith.truncf %389 : vector<16x32xf32> to vector<16x32xbf16>
    %c1_211 = arith.constant 1 : index
    %c0_212 = arith.constant 0 : index
    %c0_213 = arith.constant 0 : index
    %c0_214 = arith.constant 0 : index
    %391 = vector.load %arg4[%c1_211, %c0_212, %c0_213, %c0_214] : memref<2x2x32x96xbf16, #tpu.memory_space<vmem>>, vector<1x1x32x96xbf16>
    %392 = vector.shape_cast %391 : vector<1x1x32x96xbf16> to vector<32x96xbf16>
    %cst_215 = arith.constant dense<0.000000e+00> : vector<16x96xf32>
    %393 = tpu.matmul %390, %392, %cst_215 {dimension_numbers = #tpu.dot_dimension_numbers<[1], [0], [0], [1], [0, 0, 1, 1], [], []>} : vector<16x32xbf16>, vector<32x96xbf16>, vector<16x96xf32> -> vector<16x96xf32>
    %c1_216 = arith.constant 1 : index
    %c0_217 = arith.constant 0 : index
    %c0_218 = arith.constant 0 : index
    %c0_219 = arith.constant 0 : index
    %394 = vector.load %arg5[%c1_216, %c0_217, %c0_218, %c0_219] : memref<2x2x1x96xf32, #tpu.memory_space<vmem>>, vector<1x1x1x96xf32>
    %395 = vector.shape_cast %394 : vector<1x1x1x96xf32> to vector<1x96xf32>
    %396 = vector.broadcast %395 : vector<1x96xf32> to vector<16x96xf32>
    %397 = arith.addf %393, %396 : vector<16x96xf32>
    %cst_220 = arith.constant 0.000000e+00 : f32
    %398 = vector.broadcast %cst_220 : f32 to vector<16x32xf32>
    %399 = vector.extract_strided_slice %397 {offsets = [0, 0], sizes = [16, 16], strides = [1, 1]} : vector<16x96xf32> to vector<16x16xf32>
    %400 = vector.shape_cast %399 : vector<16x16xf32> to vector<2x8x16xf32>
    %401 = vector.extract_strided_slice %397 {offsets = [0, 32], sizes = [16, 16], strides = [1, 1]} : vector<16x96xf32> to vector<16x16xf32>
    %402 = vector.shape_cast %401 : vector<16x16xf32> to vector<2x8x16xf32>
    %403 = vector.extract_strided_slice %397 {offsets = [0, 64], sizes = [16, 16], strides = [1, 1]} : vector<16x96xf32> to vector<16x16xf32>
    %404 = vector.shape_cast %403 : vector<16x16xf32> to vector<2x8x16xf32>
    %405 = arith.truncf %400 : vector<2x8x16xf32> to vector<2x8x16xbf16>
    %406 = arith.truncf %402 : vector<2x8x16xf32> to vector<2x8x16xbf16>
    "tpu.trace_start"() <{level = 10 : i32, message = "bqd,bkd->bqk"}> : () -> ()
    %cst_221 = arith.constant dense<0.000000e+00> : vector<2x8x8xf32>
    %407 = tpu.matmul %405, %406, %cst_221 {dimension_numbers = #tpu.dot_dimension_numbers<[2], [2], [1], [1], [0, 0, 0, 1, 1, 1], [0], [0]>} : vector<2x8x16xbf16>, vector<2x8x16xbf16>, vector<2x8x8xf32> -> vector<2x8x8xf32>
    "tpu.trace_stop"() : () -> ()
    %cst_222 = arith.constant 2.500000e-01 : f32
    %408 = vector.broadcast %cst_222 : f32 to vector<2x8x8xf32>
    %409 = arith.mulf %407, %408 : vector<2x8x8xf32>
    %410 = vector.shape_cast %363 : vector<2x8xf32> to vector<2x1x8xf32>
    %411 = vector.broadcast %410 : vector<2x1x8xf32> to vector<2x8x8xf32>
    %412 = arith.addf %409, %411 : vector<2x8x8xf32>
    %cst_223 = arith.constant dense<0xFF800000> : vector<2x8xf32>
    %413 = vector.multi_reduction <maximumf>, %412, %cst_223 [2] : vector<2x8x8xf32> to vector<2x8xf32>
    %414 = vector.shape_cast %413 : vector<2x8xf32> to vector<2x8x1xf32>
    %415 = vector.broadcast %414 : vector<2x8x1xf32> to vector<2x8x8xf32>
    %416 = arith.subf %412, %415 : vector<2x8x8xf32>
    %417 = math.exp %416 : vector<2x8x8xf32>
    %cst_224 = arith.constant dense<0.000000e+00> : vector<2x8xf32>
    %418 = vector.multi_reduction <add>, %417, %cst_224 [2] : vector<2x8x8xf32> to vector<2x8xf32>
    %419 = vector.shape_cast %418 : vector<2x8xf32> to vector<2x8x1xf32>
    %420 = tpu.reciprocal %419 {approx = true} : vector<2x8x1xf32> -> vector<2x8x1xf32>
    %421 = vector.broadcast %420 : vector<2x8x1xf32> to vector<2x8x8xf32>
    %422 = arith.mulf %417, %421 : vector<2x8x8xf32>
    %423 = arith.truncf %422 : vector<2x8x8xf32> to vector<2x8x8xbf16>
    %424 = arith.truncf %404 : vector<2x8x16xf32> to vector<2x8x16xbf16>
    "tpu.trace_start"() <{level = 10 : i32, message = "bqk,bkd->bqd"}> : () -> ()
    %cst_225 = arith.constant dense<0.000000e+00> : vector<2x8x16xf32>
    %425 = tpu.matmul %423, %424, %cst_225 {dimension_numbers = #tpu.dot_dimension_numbers<[2], [1], [1], [2], [0, 0, 0, 1, 1, 2], [0], [0]>} : vector<2x8x8xbf16>, vector<2x8x16xbf16>, vector<2x8x16xf32> -> vector<2x8x16xf32>
    "tpu.trace_stop"() : () -> ()
    %426 = vector.shape_cast %425 : vector<2x8x16xf32> to vector<16x16xf32>
    %427 = arith.truncf %426 : vector<16x16xf32> to vector<16x16xbf16>
    %c1_226 = arith.constant 1 : index
    %c0_227 = arith.constant 0 : index
    %c0_228 = arith.constant 0 : index
    %c0_229 = arith.constant 0 : index
    %c0_230 = arith.constant 0 : index
    %428 = vector.load %arg6[%c1_226, %c0_227, %c0_228, %c0_229, %c0_230] : memref<2x2x2x16x32xbf16, #tpu.memory_space<vmem>>, vector<1x1x1x16x32xbf16>
    %429 = vector.shape_cast %428 : vector<1x1x1x16x32xbf16> to vector<16x32xbf16>
    %cst_231 = arith.constant dense<0.000000e+00> : vector<16x32xf32>
    %430 = tpu.matmul %427, %429, %cst_231 {dimension_numbers = #tpu.dot_dimension_numbers<[1], [0], [0], [1], [0, 0, 1, 1], [], []>} : vector<16x16xbf16>, vector<16x32xbf16>, vector<16x32xf32> -> vector<16x32xf32>
    %431 = arith.addf %398, %430 : vector<16x32xf32>
    %432 = vector.extract_strided_slice %397 {offsets = [0, 16], sizes = [16, 16], strides = [1, 1]} : vector<16x96xf32> to vector<16x16xf32>
    %433 = vector.shape_cast %432 : vector<16x16xf32> to vector<2x8x16xf32>
    %434 = vector.extract_strided_slice %397 {offsets = [0, 48], sizes = [16, 16], strides = [1, 1]} : vector<16x96xf32> to vector<16x16xf32>
    %435 = vector.shape_cast %434 : vector<16x16xf32> to vector<2x8x16xf32>
    %436 = vector.extract_strided_slice %397 {offsets = [0, 80], sizes = [16, 16], strides = [1, 1]} : vector<16x96xf32> to vector<16x16xf32>
    %437 = vector.shape_cast %436 : vector<16x16xf32> to vector<2x8x16xf32>
    %438 = arith.truncf %433 : vector<2x8x16xf32> to vector<2x8x16xbf16>
    %439 = arith.truncf %435 : vector<2x8x16xf32> to vector<2x8x16xbf16>
    "tpu.trace_start"() <{level = 10 : i32, message = "bqd,bkd->bqk"}> : () -> ()
    %cst_232 = arith.constant dense<0.000000e+00> : vector<2x8x8xf32>
    %440 = tpu.matmul %438, %439, %cst_232 {dimension_numbers = #tpu.dot_dimension_numbers<[2], [2], [1], [1], [0, 0, 0, 1, 1, 1], [0], [0]>} : vector<2x8x16xbf16>, vector<2x8x16xbf16>, vector<2x8x8xf32> -> vector<2x8x8xf32>
    "tpu.trace_stop"() : () -> ()
    %cst_233 = arith.constant 2.500000e-01 : f32
    %441 = vector.broadcast %cst_233 : f32 to vector<2x8x8xf32>
    %442 = arith.mulf %440, %441 : vector<2x8x8xf32>
    %443 = vector.shape_cast %363 : vector<2x8xf32> to vector<2x1x8xf32>
    %444 = vector.broadcast %443 : vector<2x1x8xf32> to vector<2x8x8xf32>
    %445 = arith.addf %442, %444 : vector<2x8x8xf32>
    %cst_234 = arith.constant dense<0xFF800000> : vector<2x8xf32>
    %446 = vector.multi_reduction <maximumf>, %445, %cst_234 [2] : vector<2x8x8xf32> to vector<2x8xf32>
    %447 = vector.shape_cast %446 : vector<2x8xf32> to vector<2x8x1xf32>
    %448 = vector.broadcast %447 : vector<2x8x1xf32> to vector<2x8x8xf32>
    %449 = arith.subf %445, %448 : vector<2x8x8xf32>
    %450 = math.exp %449 : vector<2x8x8xf32>
    %cst_235 = arith.constant dense<0.000000e+00> : vector<2x8xf32>
    %451 = vector.multi_reduction <add>, %450, %cst_235 [2] : vector<2x8x8xf32> to vector<2x8xf32>
    %452 = vector.shape_cast %451 : vector<2x8xf32> to vector<2x8x1xf32>
    %453 = tpu.reciprocal %452 {approx = true} : vector<2x8x1xf32> -> vector<2x8x1xf32>
    %454 = vector.broadcast %453 : vector<2x8x1xf32> to vector<2x8x8xf32>
    %455 = arith.mulf %450, %454 : vector<2x8x8xf32>
    %456 = arith.truncf %455 : vector<2x8x8xf32> to vector<2x8x8xbf16>
    %457 = arith.truncf %437 : vector<2x8x16xf32> to vector<2x8x16xbf16>
    "tpu.trace_start"() <{level = 10 : i32, message = "bqk,bkd->bqd"}> : () -> ()
    %cst_236 = arith.constant dense<0.000000e+00> : vector<2x8x16xf32>
    %458 = tpu.matmul %456, %457, %cst_236 {dimension_numbers = #tpu.dot_dimension_numbers<[2], [1], [1], [2], [0, 0, 0, 1, 1, 2], [0], [0]>} : vector<2x8x8xbf16>, vector<2x8x16xbf16>, vector<2x8x16xf32> -> vector<2x8x16xf32>
    "tpu.trace_stop"() : () -> ()
    %459 = vector.shape_cast %458 : vector<2x8x16xf32> to vector<16x16xf32>
    %460 = arith.truncf %459 : vector<16x16xf32> to vector<16x16xbf16>
    %c1_237 = arith.constant 1 : index
    %c0_238 = arith.constant 0 : index
    %c1_239 = arith.constant 1 : index
    %c0_240 = arith.constant 0 : index
    %c0_241 = arith.constant 0 : index
    %461 = vector.load %arg6[%c1_237, %c0_238, %c1_239, %c0_240, %c0_241] : memref<2x2x2x16x32xbf16, #tpu.memory_space<vmem>>, vector<1x1x1x16x32xbf16>
    %462 = vector.shape_cast %461 : vector<1x1x1x16x32xbf16> to vector<16x32xbf16>
    %cst_242 = arith.constant dense<0.000000e+00> : vector<16x32xf32>
    %463 = tpu.matmul %460, %462, %cst_242 {dimension_numbers = #tpu.dot_dimension_numbers<[1], [0], [0], [1], [0, 0, 1, 1], [], []>} : vector<16x16xbf16>, vector<16x32xbf16>, vector<16x32xf32> -> vector<16x32xf32>
    %464 = arith.addf %431, %463 : vector<16x32xf32>
    %c1_243 = arith.constant 1 : index
    %c0_244 = arith.constant 0 : index
    %c0_245 = arith.constant 0 : index
    %c0_246 = arith.constant 0 : index
    %465 = vector.load %arg7[%c1_243, %c0_244, %c0_245, %c0_246] : memref<2x2x1x32xf32, #tpu.memory_space<vmem>>, vector<1x1x1x32xf32>
    %466 = vector.shape_cast %465 : vector<1x1x1x32xf32> to vector<1x32xf32>
    %467 = vector.broadcast %466 : vector<1x32xf32> to vector<16x32xf32>
    %468 = arith.addf %464, %467 : vector<16x32xf32>
    %469 = arith.addf %468, %389 : vector<16x32xf32>
    %c1_247 = arith.constant 1 : index
    %c0_248 = arith.constant 0 : index
    %c0_249 = arith.constant 0 : index
    %c0_250 = arith.constant 0 : index
    %470 = vector.load %arg8[%c1_247, %c0_248, %c0_249, %c0_250] : memref<2x2x1x32xf32, #tpu.memory_space<vmem>>, vector<1x1x1x32xf32>
    %471 = vector.shape_cast %470 : vector<1x1x1x32xf32> to vector<1x32xf32>
    %c1_251 = arith.constant 1 : index
    %c0_252 = arith.constant 0 : index
    %c0_253 = arith.constant 0 : index
    %c0_254 = arith.constant 0 : index
    %472 = vector.load %arg9[%c1_251, %c0_252, %c0_253, %c0_254] : memref<2x2x1x32xf32, #tpu.memory_space<vmem>>, vector<1x1x1x32xf32>
    %473 = vector.shape_cast %472 : vector<1x1x1x32xf32> to vector<1x32xf32>
    %cst_255 = arith.constant dense<0.000000e+00> : vector<16xf32>
    %474 = vector.multi_reduction <add>, %469, %cst_255 [1] : vector<16x32xf32> to vector<16xf32>
    %475 = vector.shape_cast %474 : vector<16xf32> to vector<16x1xf32>
    %cst_256 = arith.constant 3.200000e+01 : f32
    %476 = vector.broadcast %cst_256 : f32 to vector<16x1xf32>
    %477 = arith.divf %475, %476 : vector<16x1xf32>
    %478 = vector.broadcast %477 : vector<16x1xf32> to vector<16x32xf32>
    %479 = arith.subf %469, %478 : vector<16x32xf32>
    %480 = arith.mulf %479, %479 : vector<16x32xf32>
    %cst_257 = arith.constant dense<0.000000e+00> : vector<16xf32>
    %481 = vector.multi_reduction <add>, %480, %cst_257 [1] : vector<16x32xf32> to vector<16xf32>
    %482 = vector.shape_cast %481 : vector<16xf32> to vector<16x1xf32>
    %cst_258 = arith.constant 3.200000e+01 : f32
    %483 = vector.broadcast %cst_258 : f32 to vector<16x1xf32>
    %484 = arith.divf %482, %483 : vector<16x1xf32>
    %cst_259 = arith.constant 9.99999996E-13 : f32
    %485 = vector.broadcast %cst_259 : f32 to vector<16x1xf32>
    %486 = arith.addf %484, %485 : vector<16x1xf32>
    %487 = math.rsqrt %486 : vector<16x1xf32>
    %488 = vector.broadcast %487 : vector<16x1xf32> to vector<16x32xf32>
    %489 = arith.mulf %479, %488 : vector<16x32xf32>
    %490 = vector.broadcast %471 : vector<1x32xf32> to vector<16x32xf32>
    %491 = arith.mulf %489, %490 : vector<16x32xf32>
    %492 = vector.broadcast %473 : vector<1x32xf32> to vector<16x32xf32>
    %493 = arith.addf %491, %492 : vector<16x32xf32>
    %494 = arith.truncf %493 : vector<16x32xf32> to vector<16x32xbf16>
    %c1_260 = arith.constant 1 : index
    %c0_261 = arith.constant 0 : index
    %c0_262 = arith.constant 0 : index
    %c0_263 = arith.constant 0 : index
    %495 = vector.load %arg10[%c1_260, %c0_261, %c0_262, %c0_263] : memref<2x2x32x64xbf16, #tpu.memory_space<vmem>>, vector<1x1x32x64xbf16>
    %496 = vector.shape_cast %495 : vector<1x1x32x64xbf16> to vector<32x64xbf16>
    %cst_264 = arith.constant dense<0.000000e+00> : vector<16x64xf32>
    %497 = tpu.matmul %494, %496, %cst_264 {dimension_numbers = #tpu.dot_dimension_numbers<[1], [0], [0], [1], [0, 0, 1, 1], [], []>} : vector<16x32xbf16>, vector<32x64xbf16>, vector<16x64xf32> -> vector<16x64xf32>
    %c1_265 = arith.constant 1 : index
    %c0_266 = arith.constant 0 : index
    %c0_267 = arith.constant 0 : index
    %c0_268 = arith.constant 0 : index
    %498 = vector.load %arg11[%c1_265, %c0_266, %c0_267, %c0_268] : memref<2x2x1x64xf32, #tpu.memory_space<vmem>>, vector<1x1x1x64xf32>
    %499 = vector.shape_cast %498 : vector<1x1x1x64xf32> to vector<1x64xf32>
    %500 = vector.broadcast %499 : vector<1x64xf32> to vector<16x64xf32>
    %501 = arith.addf %497, %500 : vector<16x64xf32>
    %cst_269 = arith.constant 5.000000e-01 : f32
    %502 = vector.broadcast %cst_269 : f32 to vector<16x64xf32>
    %503 = arith.mulf %502, %501 : vector<16x64xf32>
    %cst_270 = arith.constant 4.471500e-02 : f32
    %504 = vector.broadcast %cst_270 : f32 to vector<16x64xf32>
    %505 = arith.mulf %504, %501 : vector<16x64xf32>
    %506 = arith.mulf %505, %501 : vector<16x64xf32>
    %507 = arith.mulf %506, %501 : vector<16x64xf32>
    %508 = arith.addf %501, %507 : vector<16x64xf32>
    %cst_271 = arith.constant 0.797884583 : f32
    %509 = vector.broadcast %cst_271 : f32 to vector<16x64xf32>
    %510 = arith.mulf %509, %508 : vector<16x64xf32>
    %511 = math.tanh %510 : vector<16x64xf32>
    %cst_272 = arith.constant 1.000000e+00 : f32
    %512 = vector.broadcast %cst_272 : f32 to vector<16x64xf32>
    %513 = arith.addf %512, %511 : vector<16x64xf32>
    %514 = arith.mulf %503, %513 : vector<16x64xf32>
    %515 = arith.truncf %514 : vector<16x64xf32> to vector<16x64xbf16>
    %c1_273 = arith.constant 1 : index
    %c0_274 = arith.constant 0 : index
    %c0_275 = arith.constant 0 : index
    %c0_276 = arith.constant 0 : index
    %516 = vector.load %arg12[%c1_273, %c0_274, %c0_275, %c0_276] : memref<2x2x64x32xbf16, #tpu.memory_space<vmem>>, vector<1x1x64x32xbf16>
    %517 = vector.shape_cast %516 : vector<1x1x64x32xbf16> to vector<64x32xbf16>
    %cst_277 = arith.constant dense<0.000000e+00> : vector<16x32xf32>
    %518 = tpu.matmul %515, %517, %cst_277 {dimension_numbers = #tpu.dot_dimension_numbers<[1], [0], [0], [1], [0, 0, 1, 1], [], []>} : vector<16x64xbf16>, vector<64x32xbf16>, vector<16x32xf32> -> vector<16x32xf32>
    %c1_278 = arith.constant 1 : index
    %c0_279 = arith.constant 0 : index
    %c0_280 = arith.constant 0 : index
    %c0_281 = arith.constant 0 : index
    %519 = vector.load %arg13[%c1_278, %c0_279, %c0_280, %c0_281] : memref<2x2x1x32xf32, #tpu.memory_space<vmem>>, vector<1x1x1x32xf32>
    %520 = vector.shape_cast %519 : vector<1x1x1x32xf32> to vector<1x32xf32>
    %521 = vector.broadcast %520 : vector<1x32xf32> to vector<16x32xf32>
    %522 = arith.addf %518, %521 : vector<16x32xf32>
    %523 = arith.addf %522, %493 : vector<16x32xf32>
    %c1_282 = arith.constant 1 : index
    %c0_283 = arith.constant 0 : index
    %c0_284 = arith.constant 0 : index
    %c0_285 = arith.constant 0 : index
    %524 = vector.load %arg14[%c1_282, %c0_283, %c0_284, %c0_285] : memref<2x2x1x32xf32, #tpu.memory_space<vmem>>, vector<1x1x1x32xf32>
    %525 = vector.shape_cast %524 : vector<1x1x1x32xf32> to vector<1x32xf32>
    %c1_286 = arith.constant 1 : index
    %c0_287 = arith.constant 0 : index
    %c0_288 = arith.constant 0 : index
    %c0_289 = arith.constant 0 : index
    %526 = vector.load %arg15[%c1_286, %c0_287, %c0_288, %c0_289] : memref<2x2x1x32xf32, #tpu.memory_space<vmem>>, vector<1x1x1x32xf32>
    %527 = vector.shape_cast %526 : vector<1x1x1x32xf32> to vector<1x32xf32>
    %cst_290 = arith.constant dense<0.000000e+00> : vector<16xf32>
    %528 = vector.multi_reduction <add>, %523, %cst_290 [1] : vector<16x32xf32> to vector<16xf32>
    %529 = vector.shape_cast %528 : vector<16xf32> to vector<16x1xf32>
    %cst_291 = arith.constant 3.200000e+01 : f32
    %530 = vector.broadcast %cst_291 : f32 to vector<16x1xf32>
    %531 = arith.divf %529, %530 : vector<16x1xf32>
    %532 = vector.broadcast %531 : vector<16x1xf32> to vector<16x32xf32>
    %533 = arith.subf %523, %532 : vector<16x32xf32>
    %534 = arith.mulf %533, %533 : vector<16x32xf32>
    %cst_292 = arith.constant dense<0.000000e+00> : vector<16xf32>
    %535 = vector.multi_reduction <add>, %534, %cst_292 [1] : vector<16x32xf32> to vector<16xf32>
    %536 = vector.shape_cast %535 : vector<16xf32> to vector<16x1xf32>
    %cst_293 = arith.constant 3.200000e+01 : f32
    %537 = vector.broadcast %cst_293 : f32 to vector<16x1xf32>
    %538 = arith.divf %536, %537 : vector<16x1xf32>
    %cst_294 = arith.constant 9.99999996E-13 : f32
    %539 = vector.broadcast %cst_294 : f32 to vector<16x1xf32>
    %540 = arith.addf %538, %539 : vector<16x1xf32>
    %541 = math.rsqrt %540 : vector<16x1xf32>
    %542 = vector.broadcast %541 : vector<16x1xf32> to vector<16x32xf32>
    %543 = arith.mulf %533, %542 : vector<16x32xf32>
    %544 = vector.broadcast %525 : vector<1x32xf32> to vector<16x32xf32>
    %545 = arith.mulf %543, %544 : vector<16x32xf32>
    %546 = vector.broadcast %527 : vector<1x32xf32> to vector<16x32xf32>
    %547 = arith.addf %545, %546 : vector<16x32xf32>
    %548 = arith.truncf %547 : vector<16x32xf32> to vector<16x32xbf16>
    %c1_295 = arith.constant 1 : index
    %c1_296 = arith.constant 1 : index
    %c0_297 = arith.constant 0 : index
    %c0_298 = arith.constant 0 : index
    %549 = vector.load %arg4[%c1_295, %c1_296, %c0_297, %c0_298] : memref<2x2x32x96xbf16, #tpu.memory_space<vmem>>, vector<1x1x32x96xbf16>
    %550 = vector.shape_cast %549 : vector<1x1x32x96xbf16> to vector<32x96xbf16>
    %cst_299 = arith.constant dense<0.000000e+00> : vector<16x96xf32>
    %551 = tpu.matmul %548, %550, %cst_299 {dimension_numbers = #tpu.dot_dimension_numbers<[1], [0], [0], [1], [0, 0, 1, 1], [], []>} : vector<16x32xbf16>, vector<32x96xbf16>, vector<16x96xf32> -> vector<16x96xf32>
    %c1_300 = arith.constant 1 : index
    %c1_301 = arith.constant 1 : index
    %c0_302 = arith.constant 0 : index
    %c0_303 = arith.constant 0 : index
    %552 = vector.load %arg5[%c1_300, %c1_301, %c0_302, %c0_303] : memref<2x2x1x96xf32, #tpu.memory_space<vmem>>, vector<1x1x1x96xf32>
    %553 = vector.shape_cast %552 : vector<1x1x1x96xf32> to vector<1x96xf32>
    %554 = vector.broadcast %553 : vector<1x96xf32> to vector<16x96xf32>
    %555 = arith.addf %551, %554 : vector<16x96xf32>
    %cst_304 = arith.constant 0.000000e+00 : f32
    %556 = vector.broadcast %cst_304 : f32 to vector<16x32xf32>
    %557 = vector.extract_strided_slice %555 {offsets = [0, 0], sizes = [16, 16], strides = [1, 1]} : vector<16x96xf32> to vector<16x16xf32>
    %558 = vector.shape_cast %557 : vector<16x16xf32> to vector<2x8x16xf32>
    %559 = vector.extract_strided_slice %555 {offsets = [0, 32], sizes = [16, 16], strides = [1, 1]} : vector<16x96xf32> to vector<16x16xf32>
    %560 = vector.shape_cast %559 : vector<16x16xf32> to vector<2x8x16xf32>
    %561 = vector.extract_strided_slice %555 {offsets = [0, 64], sizes = [16, 16], strides = [1, 1]} : vector<16x96xf32> to vector<16x16xf32>
    %562 = vector.shape_cast %561 : vector<16x16xf32> to vector<2x8x16xf32>
    %563 = arith.truncf %558 : vector<2x8x16xf32> to vector<2x8x16xbf16>
    %564 = arith.truncf %560 : vector<2x8x16xf32> to vector<2x8x16xbf16>
    "tpu.trace_start"() <{level = 10 : i32, message = "bqd,bkd->bqk"}> : () -> ()
    %cst_305 = arith.constant dense<0.000000e+00> : vector<2x8x8xf32>
    %565 = tpu.matmul %563, %564, %cst_305 {dimension_numbers = #tpu.dot_dimension_numbers<[2], [2], [1], [1], [0, 0, 0, 1, 1, 1], [0], [0]>} : vector<2x8x16xbf16>, vector<2x8x16xbf16>, vector<2x8x8xf32> -> vector<2x8x8xf32>
    "tpu.trace_stop"() : () -> ()
    %cst_306 = arith.constant 2.500000e-01 : f32
    %566 = vector.broadcast %cst_306 : f32 to vector<2x8x8xf32>
    %567 = arith.mulf %565, %566 : vector<2x8x8xf32>
    %568 = vector.shape_cast %363 : vector<2x8xf32> to vector<2x1x8xf32>
    %569 = vector.broadcast %568 : vector<2x1x8xf32> to vector<2x8x8xf32>
    %570 = arith.addf %567, %569 : vector<2x8x8xf32>
    %cst_307 = arith.constant dense<0xFF800000> : vector<2x8xf32>
    %571 = vector.multi_reduction <maximumf>, %570, %cst_307 [2] : vector<2x8x8xf32> to vector<2x8xf32>
    %572 = vector.shape_cast %571 : vector<2x8xf32> to vector<2x8x1xf32>
    %573 = vector.broadcast %572 : vector<2x8x1xf32> to vector<2x8x8xf32>
    %574 = arith.subf %570, %573 : vector<2x8x8xf32>
    %575 = math.exp %574 : vector<2x8x8xf32>
    %cst_308 = arith.constant dense<0.000000e+00> : vector<2x8xf32>
    %576 = vector.multi_reduction <add>, %575, %cst_308 [2] : vector<2x8x8xf32> to vector<2x8xf32>
    %577 = vector.shape_cast %576 : vector<2x8xf32> to vector<2x8x1xf32>
    %578 = tpu.reciprocal %577 {approx = true} : vector<2x8x1xf32> -> vector<2x8x1xf32>
    %579 = vector.broadcast %578 : vector<2x8x1xf32> to vector<2x8x8xf32>
    %580 = arith.mulf %575, %579 : vector<2x8x8xf32>
    %581 = arith.truncf %580 : vector<2x8x8xf32> to vector<2x8x8xbf16>
    %582 = arith.truncf %562 : vector<2x8x16xf32> to vector<2x8x16xbf16>
    "tpu.trace_start"() <{level = 10 : i32, message = "bqk,bkd->bqd"}> : () -> ()
    %cst_309 = arith.constant dense<0.000000e+00> : vector<2x8x16xf32>
    %583 = tpu.matmul %581, %582, %cst_309 {dimension_numbers = #tpu.dot_dimension_numbers<[2], [1], [1], [2], [0, 0, 0, 1, 1, 2], [0], [0]>} : vector<2x8x8xbf16>, vector<2x8x16xbf16>, vector<2x8x16xf32> -> vector<2x8x16xf32>
    "tpu.trace_stop"() : () -> ()
    %584 = vector.shape_cast %583 : vector<2x8x16xf32> to vector<16x16xf32>
    %585 = arith.truncf %584 : vector<16x16xf32> to vector<16x16xbf16>
    %c1_310 = arith.constant 1 : index
    %c1_311 = arith.constant 1 : index
    %c0_312 = arith.constant 0 : index
    %c0_313 = arith.constant 0 : index
    %c0_314 = arith.constant 0 : index
    %586 = vector.load %arg6[%c1_310, %c1_311, %c0_312, %c0_313, %c0_314] : memref<2x2x2x16x32xbf16, #tpu.memory_space<vmem>>, vector<1x1x1x16x32xbf16>
    %587 = vector.shape_cast %586 : vector<1x1x1x16x32xbf16> to vector<16x32xbf16>
    %cst_315 = arith.constant dense<0.000000e+00> : vector<16x32xf32>
    %588 = tpu.matmul %585, %587, %cst_315 {dimension_numbers = #tpu.dot_dimension_numbers<[1], [0], [0], [1], [0, 0, 1, 1], [], []>} : vector<16x16xbf16>, vector<16x32xbf16>, vector<16x32xf32> -> vector<16x32xf32>
    %589 = arith.addf %556, %588 : vector<16x32xf32>
    %590 = vector.extract_strided_slice %555 {offsets = [0, 16], sizes = [16, 16], strides = [1, 1]} : vector<16x96xf32> to vector<16x16xf32>
    %591 = vector.shape_cast %590 : vector<16x16xf32> to vector<2x8x16xf32>
    %592 = vector.extract_strided_slice %555 {offsets = [0, 48], sizes = [16, 16], strides = [1, 1]} : vector<16x96xf32> to vector<16x16xf32>
    %593 = vector.shape_cast %592 : vector<16x16xf32> to vector<2x8x16xf32>
    %594 = vector.extract_strided_slice %555 {offsets = [0, 80], sizes = [16, 16], strides = [1, 1]} : vector<16x96xf32> to vector<16x16xf32>
    %595 = vector.shape_cast %594 : vector<16x16xf32> to vector<2x8x16xf32>
    %596 = arith.truncf %591 : vector<2x8x16xf32> to vector<2x8x16xbf16>
    %597 = arith.truncf %593 : vector<2x8x16xf32> to vector<2x8x16xbf16>
    "tpu.trace_start"() <{level = 10 : i32, message = "bqd,bkd->bqk"}> : () -> ()
    %cst_316 = arith.constant dense<0.000000e+00> : vector<2x8x8xf32>
    %598 = tpu.matmul %596, %597, %cst_316 {dimension_numbers = #tpu.dot_dimension_numbers<[2], [2], [1], [1], [0, 0, 0, 1, 1, 1], [0], [0]>} : vector<2x8x16xbf16>, vector<2x8x16xbf16>, vector<2x8x8xf32> -> vector<2x8x8xf32>
    "tpu.trace_stop"() : () -> ()
    %cst_317 = arith.constant 2.500000e-01 : f32
    %599 = vector.broadcast %cst_317 : f32 to vector<2x8x8xf32>
    %600 = arith.mulf %598, %599 : vector<2x8x8xf32>
    %601 = vector.shape_cast %363 : vector<2x8xf32> to vector<2x1x8xf32>
    %602 = vector.broadcast %601 : vector<2x1x8xf32> to vector<2x8x8xf32>
    %603 = arith.addf %600, %602 : vector<2x8x8xf32>
    %cst_318 = arith.constant dense<0xFF800000> : vector<2x8xf32>
    %604 = vector.multi_reduction <maximumf>, %603, %cst_318 [2] : vector<2x8x8xf32> to vector<2x8xf32>
    %605 = vector.shape_cast %604 : vector<2x8xf32> to vector<2x8x1xf32>
    %606 = vector.broadcast %605 : vector<2x8x1xf32> to vector<2x8x8xf32>
    %607 = arith.subf %603, %606 : vector<2x8x8xf32>
    %608 = math.exp %607 : vector<2x8x8xf32>
    %cst_319 = arith.constant dense<0.000000e+00> : vector<2x8xf32>
    %609 = vector.multi_reduction <add>, %608, %cst_319 [2] : vector<2x8x8xf32> to vector<2x8xf32>
    %610 = vector.shape_cast %609 : vector<2x8xf32> to vector<2x8x1xf32>
    %611 = tpu.reciprocal %610 {approx = true} : vector<2x8x1xf32> -> vector<2x8x1xf32>
    %612 = vector.broadcast %611 : vector<2x8x1xf32> to vector<2x8x8xf32>
    %613 = arith.mulf %608, %612 : vector<2x8x8xf32>
    %614 = arith.truncf %613 : vector<2x8x8xf32> to vector<2x8x8xbf16>
    %615 = arith.truncf %595 : vector<2x8x16xf32> to vector<2x8x16xbf16>
    "tpu.trace_start"() <{level = 10 : i32, message = "bqk,bkd->bqd"}> : () -> ()
    %cst_320 = arith.constant dense<0.000000e+00> : vector<2x8x16xf32>
    %616 = tpu.matmul %614, %615, %cst_320 {dimension_numbers = #tpu.dot_dimension_numbers<[2], [1], [1], [2], [0, 0, 0, 1, 1, 2], [0], [0]>} : vector<2x8x8xbf16>, vector<2x8x16xbf16>, vector<2x8x16xf32> -> vector<2x8x16xf32>
    "tpu.trace_stop"() : () -> ()
    %617 = vector.shape_cast %616 : vector<2x8x16xf32> to vector<16x16xf32>
    %618 = arith.truncf %617 : vector<16x16xf32> to vector<16x16xbf16>
    %c1_321 = arith.constant 1 : index
    %c1_322 = arith.constant 1 : index
    %c1_323 = arith.constant 1 : index
    %c0_324 = arith.constant 0 : index
    %c0_325 = arith.constant 0 : index
    %619 = vector.load %arg6[%c1_321, %c1_322, %c1_323, %c0_324, %c0_325] : memref<2x2x2x16x32xbf16, #tpu.memory_space<vmem>>, vector<1x1x1x16x32xbf16>
    %620 = vector.shape_cast %619 : vector<1x1x1x16x32xbf16> to vector<16x32xbf16>
    %cst_326 = arith.constant dense<0.000000e+00> : vector<16x32xf32>
    %621 = tpu.matmul %618, %620, %cst_326 {dimension_numbers = #tpu.dot_dimension_numbers<[1], [0], [0], [1], [0, 0, 1, 1], [], []>} : vector<16x16xbf16>, vector<16x32xbf16>, vector<16x32xf32> -> vector<16x32xf32>
    %622 = arith.addf %589, %621 : vector<16x32xf32>
    %c1_327 = arith.constant 1 : index
    %c1_328 = arith.constant 1 : index
    %c0_329 = arith.constant 0 : index
    %c0_330 = arith.constant 0 : index
    %623 = vector.load %arg7[%c1_327, %c1_328, %c0_329, %c0_330] : memref<2x2x1x32xf32, #tpu.memory_space<vmem>>, vector<1x1x1x32xf32>
    %624 = vector.shape_cast %623 : vector<1x1x1x32xf32> to vector<1x32xf32>
    %625 = vector.broadcast %624 : vector<1x32xf32> to vector<16x32xf32>
    %626 = arith.addf %622, %625 : vector<16x32xf32>
    %627 = arith.addf %626, %547 : vector<16x32xf32>
    %c1_331 = arith.constant 1 : index
    %c1_332 = arith.constant 1 : index
    %c0_333 = arith.constant 0 : index
    %c0_334 = arith.constant 0 : index
    %628 = vector.load %arg8[%c1_331, %c1_332, %c0_333, %c0_334] : memref<2x2x1x32xf32, #tpu.memory_space<vmem>>, vector<1x1x1x32xf32>
    %629 = vector.shape_cast %628 : vector<1x1x1x32xf32> to vector<1x32xf32>
    %c1_335 = arith.constant 1 : index
    %c1_336 = arith.constant 1 : index
    %c0_337 = arith.constant 0 : index
    %c0_338 = arith.constant 0 : index
    %630 = vector.load %arg9[%c1_335, %c1_336, %c0_337, %c0_338] : memref<2x2x1x32xf32, #tpu.memory_space<vmem>>, vector<1x1x1x32xf32>
    %631 = vector.shape_cast %630 : vector<1x1x1x32xf32> to vector<1x32xf32>
    %cst_339 = arith.constant dense<0.000000e+00> : vector<16xf32>
    %632 = vector.multi_reduction <add>, %627, %cst_339 [1] : vector<16x32xf32> to vector<16xf32>
    %633 = vector.shape_cast %632 : vector<16xf32> to vector<16x1xf32>
    %cst_340 = arith.constant 3.200000e+01 : f32
    %634 = vector.broadcast %cst_340 : f32 to vector<16x1xf32>
    %635 = arith.divf %633, %634 : vector<16x1xf32>
    %636 = vector.broadcast %635 : vector<16x1xf32> to vector<16x32xf32>
    %637 = arith.subf %627, %636 : vector<16x32xf32>
    %638 = arith.mulf %637, %637 : vector<16x32xf32>
    %cst_341 = arith.constant dense<0.000000e+00> : vector<16xf32>
    %639 = vector.multi_reduction <add>, %638, %cst_341 [1] : vector<16x32xf32> to vector<16xf32>
    %640 = vector.shape_cast %639 : vector<16xf32> to vector<16x1xf32>
    %cst_342 = arith.constant 3.200000e+01 : f32
    %641 = vector.broadcast %cst_342 : f32 to vector<16x1xf32>
    %642 = arith.divf %640, %641 : vector<16x1xf32>
    %cst_343 = arith.constant 9.99999996E-13 : f32
    %643 = vector.broadcast %cst_343 : f32 to vector<16x1xf32>
    %644 = arith.addf %642, %643 : vector<16x1xf32>
    %645 = math.rsqrt %644 : vector<16x1xf32>
    %646 = vector.broadcast %645 : vector<16x1xf32> to vector<16x32xf32>
    %647 = arith.mulf %637, %646 : vector<16x32xf32>
    %648 = vector.broadcast %629 : vector<1x32xf32> to vector<16x32xf32>
    %649 = arith.mulf %647, %648 : vector<16x32xf32>
    %650 = vector.broadcast %631 : vector<1x32xf32> to vector<16x32xf32>
    %651 = arith.addf %649, %650 : vector<16x32xf32>
    %652 = arith.truncf %651 : vector<16x32xf32> to vector<16x32xbf16>
    %c1_344 = arith.constant 1 : index
    %c1_345 = arith.constant 1 : index
    %c0_346 = arith.constant 0 : index
    %c0_347 = arith.constant 0 : index
    %653 = vector.load %arg10[%c1_344, %c1_345, %c0_346, %c0_347] : memref<2x2x32x64xbf16, #tpu.memory_space<vmem>>, vector<1x1x32x64xbf16>
    %654 = vector.shape_cast %653 : vector<1x1x32x64xbf16> to vector<32x64xbf16>
    %cst_348 = arith.constant dense<0.000000e+00> : vector<16x64xf32>
    %655 = tpu.matmul %652, %654, %cst_348 {dimension_numbers = #tpu.dot_dimension_numbers<[1], [0], [0], [1], [0, 0, 1, 1], [], []>} : vector<16x32xbf16>, vector<32x64xbf16>, vector<16x64xf32> -> vector<16x64xf32>
    %c1_349 = arith.constant 1 : index
    %c1_350 = arith.constant 1 : index
    %c0_351 = arith.constant 0 : index
    %c0_352 = arith.constant 0 : index
    %656 = vector.load %arg11[%c1_349, %c1_350, %c0_351, %c0_352] : memref<2x2x1x64xf32, #tpu.memory_space<vmem>>, vector<1x1x1x64xf32>
    %657 = vector.shape_cast %656 : vector<1x1x1x64xf32> to vector<1x64xf32>
    %658 = vector.broadcast %657 : vector<1x64xf32> to vector<16x64xf32>
    %659 = arith.addf %655, %658 : vector<16x64xf32>
    %cst_353 = arith.constant 5.000000e-01 : f32
    %660 = vector.broadcast %cst_353 : f32 to vector<16x64xf32>
    %661 = arith.mulf %660, %659 : vector<16x64xf32>
    %cst_354 = arith.constant 4.471500e-02 : f32
    %662 = vector.broadcast %cst_354 : f32 to vector<16x64xf32>
    %663 = arith.mulf %662, %659 : vector<16x64xf32>
    %664 = arith.mulf %663, %659 : vector<16x64xf32>
    %665 = arith.mulf %664, %659 : vector<16x64xf32>
    %666 = arith.addf %659, %665 : vector<16x64xf32>
    %cst_355 = arith.constant 0.797884583 : f32
    %667 = vector.broadcast %cst_355 : f32 to vector<16x64xf32>
    %668 = arith.mulf %667, %666 : vector<16x64xf32>
    %669 = math.tanh %668 : vector<16x64xf32>
    %cst_356 = arith.constant 1.000000e+00 : f32
    %670 = vector.broadcast %cst_356 : f32 to vector<16x64xf32>
    %671 = arith.addf %670, %669 : vector<16x64xf32>
    %672 = arith.mulf %661, %671 : vector<16x64xf32>
    %673 = arith.truncf %672 : vector<16x64xf32> to vector<16x64xbf16>
    %c1_357 = arith.constant 1 : index
    %c1_358 = arith.constant 1 : index
    %c0_359 = arith.constant 0 : index
    %c0_360 = arith.constant 0 : index
    %674 = vector.load %arg12[%c1_357, %c1_358, %c0_359, %c0_360] : memref<2x2x64x32xbf16, #tpu.memory_space<vmem>>, vector<1x1x64x32xbf16>
    %675 = vector.shape_cast %674 : vector<1x1x64x32xbf16> to vector<64x32xbf16>
    %cst_361 = arith.constant dense<0.000000e+00> : vector<16x32xf32>
    %676 = tpu.matmul %673, %675, %cst_361 {dimension_numbers = #tpu.dot_dimension_numbers<[1], [0], [0], [1], [0, 0, 1, 1], [], []>} : vector<16x64xbf16>, vector<64x32xbf16>, vector<16x32xf32> -> vector<16x32xf32>
    %c1_362 = arith.constant 1 : index
    %c1_363 = arith.constant 1 : index
    %c0_364 = arith.constant 0 : index
    %c0_365 = arith.constant 0 : index
    %677 = vector.load %arg13[%c1_362, %c1_363, %c0_364, %c0_365] : memref<2x2x1x32xf32, #tpu.memory_space<vmem>>, vector<1x1x1x32xf32>
    %678 = vector.shape_cast %677 : vector<1x1x1x32xf32> to vector<1x32xf32>
    %679 = vector.broadcast %678 : vector<1x32xf32> to vector<16x32xf32>
    %680 = arith.addf %676, %679 : vector<16x32xf32>
    %681 = arith.addf %680, %651 : vector<16x32xf32>
    %c1_366 = arith.constant 1 : index
    %c1_367 = arith.constant 1 : index
    %c0_368 = arith.constant 0 : index
    %c0_369 = arith.constant 0 : index
    %682 = vector.load %arg14[%c1_366, %c1_367, %c0_368, %c0_369] : memref<2x2x1x32xf32, #tpu.memory_space<vmem>>, vector<1x1x1x32xf32>
    %683 = vector.shape_cast %682 : vector<1x1x1x32xf32> to vector<1x32xf32>
    %c1_370 = arith.constant 1 : index
    %c1_371 = arith.constant 1 : index
    %c0_372 = arith.constant 0 : index
    %c0_373 = arith.constant 0 : index
    %684 = vector.load %arg15[%c1_370, %c1_371, %c0_372, %c0_373] : memref<2x2x1x32xf32, #tpu.memory_space<vmem>>, vector<1x1x1x32xf32>
    %685 = vector.shape_cast %684 : vector<1x1x1x32xf32> to vector<1x32xf32>
    %cst_374 = arith.constant dense<0.000000e+00> : vector<16xf32>
    %686 = vector.multi_reduction <add>, %681, %cst_374 [1] : vector<16x32xf32> to vector<16xf32>
    %687 = vector.shape_cast %686 : vector<16xf32> to vector<16x1xf32>
    %cst_375 = arith.constant 3.200000e+01 : f32
    %688 = vector.broadcast %cst_375 : f32 to vector<16x1xf32>
    %689 = arith.divf %687, %688 : vector<16x1xf32>
    %690 = vector.broadcast %689 : vector<16x1xf32> to vector<16x32xf32>
    %691 = arith.subf %681, %690 : vector<16x32xf32>
    %692 = arith.mulf %691, %691 : vector<16x32xf32>
    %cst_376 = arith.constant dense<0.000000e+00> : vector<16xf32>
    %693 = vector.multi_reduction <add>, %692, %cst_376 [1] : vector<16x32xf32> to vector<16xf32>
    %694 = vector.shape_cast %693 : vector<16xf32> to vector<16x1xf32>
    %cst_377 = arith.constant 3.200000e+01 : f32
    %695 = vector.broadcast %cst_377 : f32 to vector<16x1xf32>
    %696 = arith.divf %694, %695 : vector<16x1xf32>
    %cst_378 = arith.constant 9.99999996E-13 : f32
    %697 = vector.broadcast %cst_378 : f32 to vector<16x1xf32>
    %698 = arith.addf %696, %697 : vector<16x1xf32>
    %699 = math.rsqrt %698 : vector<16x1xf32>
    %700 = vector.broadcast %699 : vector<16x1xf32> to vector<16x32xf32>
    %701 = arith.mulf %691, %700 : vector<16x32xf32>
    %702 = vector.broadcast %683 : vector<1x32xf32> to vector<16x32xf32>
    %703 = arith.mulf %701, %702 : vector<16x32xf32>
    %704 = vector.broadcast %685 : vector<1x32xf32> to vector<16x32xf32>
    %705 = arith.addf %703, %704 : vector<16x32xf32>
    %706 = vector.shape_cast %705 : vector<16x32xf32> to vector<2x8x32xf32>
    %707 = vector.extract_strided_slice %706 {offsets = [0, 0, 0], sizes = [2, 1, 32], strides = [1, 1, 1]} : vector<2x8x32xf32> to vector<2x1x32xf32>
    %708 = vector.shape_cast %707 : vector<2x1x32xf32> to vector<2x32xf32>
    %709 = arith.truncf %708 : vector<2x32xf32> to vector<2x32xbf16>
    %c1_379 = arith.constant 1 : index
    %c0_380 = arith.constant 0 : index
    %c0_381 = arith.constant 0 : index
    %710 = vector.load %arg16[%c1_379, %c0_380, %c0_381] : memref<2x32x32xbf16, #tpu.memory_space<vmem>>, vector<1x32x32xbf16>
    %711 = vector.shape_cast %710 : vector<1x32x32xbf16> to vector<32x32xbf16>
    %cst_382 = arith.constant dense<0.000000e+00> : vector<2x32xf32>
    %712 = tpu.matmul %709, %711, %cst_382 {dimension_numbers = #tpu.dot_dimension_numbers<[1], [0], [0], [1], [0, 0, 1, 1], [], []>} : vector<2x32xbf16>, vector<32x32xbf16>, vector<2x32xf32> -> vector<2x32xf32>
    %c1_383 = arith.constant 1 : index
    %c0_384 = arith.constant 0 : index
    %c0_385 = arith.constant 0 : index
    %713 = vector.load %arg17[%c1_383, %c0_384, %c0_385] : memref<2x1x32xf32, #tpu.memory_space<vmem>>, vector<1x1x32xf32>
    %714 = vector.shape_cast %713 : vector<1x1x32xf32> to vector<1x32xf32>
    %715 = vector.broadcast %714 : vector<1x32xf32> to vector<2x32xf32>
    %716 = arith.addf %712, %715 : vector<2x32xf32>
    %717 = math.tanh %716 : vector<2x32xf32>
    %718 = arith.truncf %717 : vector<2x32xf32> to vector<2x32xbf16>
    %c1_386 = arith.constant 1 : index
    %c0_387 = arith.constant 0 : index
    %c0_388 = arith.constant 0 : index
    %719 = vector.load %arg18[%c1_386, %c0_387, %c0_388] : memref<2x32x128xbf16, #tpu.memory_space<vmem>>, vector<1x32x128xbf16>
    %720 = vector.shape_cast %719 : vector<1x32x128xbf16> to vector<32x128xbf16>
    %cst_389 = arith.constant dense<0.000000e+00> : vector<2x128xf32>
    %721 = tpu.matmul %718, %720, %cst_389 {dimension_numbers = #tpu.dot_dimension_numbers<[1], [0], [0], [1], [0, 0, 1, 1], [], []>} : vector<2x32xbf16>, vector<32x128xbf16>, vector<2x128xf32> -> vector<2x128xf32>
    %722 = arith.addf %361, %721 : vector<2x128xf32>
    %c0_390 = arith.constant 0 : index
    %c0_391 = arith.constant 0 : index
    %723 = vector.load %arg19[%c0_390, %c0_391] : memref<1x128xf32, #tpu.memory_space<vmem>>, vector<1x128xf32>
    %724 = vector.broadcast %723 : vector<1x128xf32> to vector<2x128xf32>
    %725 = arith.addf %722, %724 : vector<2x128xf32>
    %c0_392 = arith.constant 0 : index
    %c0_393 = arith.constant 0 : index
    %726 = vector.load %arg20[%c0_392, %c0_393] : memref<2x128xf32, #tpu.memory_space<vmem>>, vector<2x128xf32>
    tpu.vector_store %arg20[%c0_392, %c0_393], %725 {strides = array<i32>} : memref<2x128xf32, #tpu.memory_space<vmem>>, vector<2x128xf32>,
    return
  }
}

</mosaic_0001>

<bundles_post_ra>
// kernel: biencoder_forward.1
= control target key start
LH: loop header
LB: loop body
LE: loop exit
PB: predicated region body
PF: predicated region fallthrough
CT: control target
= control target key end

     0   :  { %s6075_s0 = inlined_call_operand.vmem [shape: f32[2,16,32], index: 0, kind: input, shape index: {}]   ;;  %s6076_s1 = inlined_call_operand.vmem [shape: f32[2,2,8], index: 1, kind: input, shape index: {}]   ;;  %s6077_s2 = inlined_call_operand.vmem [shape: f32[2,1,32], index: 2, kind: input, shape index: {}]   ;;  %s6078_s3 = inlined_call_operand.vmem [shape: f32[2,1,32], index: 3, kind: input, shape index: {}]   ;;  %s6079_s4 = inlined_call_operand.vmem [shape: bf16[2,2,32,96], index: 4, kind: input, shape index: {}]   ;;  %s6080_s5 = inlined_call_operand.vmem [shape: f32[2,2,1,96], index: 5, kind: input, shape index: {}]   ;;  %s6081_s6 = inlined_call_operand.vmem [shape: bf16[2,2,2,16,32], index: 6, kind: input, shape index: {}]   ;;  %s6082_s7 = inlined_call_operand.vmem [shape: f32[2,2,1,32], index: 7, kind: input, shape index: {}]   ;;  %s6083_s8 = inlined_call_operand.vmem [shape: f32[2,2,1,32], index: 8, kind: input, shape index: {}]   ;;  %s6084_s9 = inlined_call_operand.vmem [shape: f32[2,2,1,32], index: 9, kind: input, shape index: {}]   ;;  %s6085_s10 = inlined_call_operand.vmem [shape: bf16[2,2,32,64], index: 10, kind: input, shape index: {}]   ;;  %s6086_s11 = inlined_call_operand.vmem [shape: f32[2,2,1,64], index: 11, kind: input, shape index: {}]   ;;  %s6087_s12 = inlined_call_operand.vmem [shape: bf16[2,2,64,32], index: 12, kind: input, shape index: {}]   ;;  %s6088_s13 = inlined_call_operand.vmem [shape: f32[2,2,1,32], index: 13, kind: input, shape index: {}]   ;;  %s6089_s14 = inlined_call_operand.vmem [shape: f32[2,2,1,32], index: 14, kind: input, shape index: {}]   ;;  %s6090_s15 = inlined_call_operand.vmem [shape: f32[2,2,1,32], index: 15, kind: input, shape index: {}]   ;;  %s6091_s16 = inlined_call_operand.vmem [shape: bf16[2,32,32], index: 16, kind: input, shape index: {}]   ;;  %s6092_s17 = inlined_call_operand.vmem [shape: f32[2,1,32], index: 17, kind: input, shape index: {}]   ;;  %s6093_s18 = inlined_call_operand.vmem [shape: bf16[2,32,128], index: 18, kind: input, shape index: {}]   ;;  %s6094_s19 = inlined_call_operand.vmem [shape: f32[1,128], index: 19, kind: input, shape index: {}]   ;;  %s6095_s20 = inlined_call_operand.hbm [shape: f32[2,128], index: 20, kind: output, shape index: {}]  }
   0x1   :  { %6111 = sst [smem:[#allocation5_spill]] %s6075_s0 }
   0x2   :  { %6112 = sst [smem:[#allocation6_spill]] %s6076_s1 }
   0x3   :  { %6113 = sst [smem:[#allocation7_spill]] %s6077_s2 }
   0x4   :  { %6114 = sst [smem:[#allocation8_spill]] %s6078_s3 }
   0x5   :  { %6115 = sst [smem:[#allocation9_spill]] %s6079_s4 }
   0x6   :  { %6116 = sst [smem:[#allocation10_spill]] %s6095_s20 }
   0x7   :  { %s6117_s23 = sld [smem:[#allocation5_spill]]  ;;  %vm72_vm0 = vcmask 261120  }
   0xd   :  { %v68_v0 = vld [vmem:[%s6117_s23] sm:$0xff]  ;;  %v69_v1 = vld [vmem:[%s6117_s23 + $0x8] sm:$0xff] }
   0xe   :  { %v73_v2 = vsel %vm72_vm0, %v68_v0, 0.0  ;;  %v76_v3 = vsel %vm72_vm0, %v69_v1, 0.0 }
   0xf   :  { %74 = vadd.xlane.f32.xlu0 %v73_v2 }
  0x13   :  { %77 = vadd.xlane.f32.xlu0 %v76_v3 }
  0x14   :  { %25 = vsyncpa [#allocation3], 0  ;;  %s6118_s26 = sld [smem:[#allocation9_spill]]  ;;  %v5116_v15 = vmov 0.0   ;;  %vm5117_vm1 = vmmov 0   ;;  %s6109_s2 = smov 96   ;;  %v299_v49 = vlaneseq }
  0x15   :  { %4529 = vmatprep.subr.bf16.mxu0 %v5116_v15  ;;  %4533 = vmatprep.mubr.msk.bf16.mxu0 %vm5117_vm1, %v5116_v15  ;;  %s6119_s30 = sld [smem:[#allocation7_spill]]  ;;  %v4150_v34 = vld [vmem:[%s6080_s5] ss:$0 sm:$0xff]  ;;  %vm189_vm2 = vcmask 130048   ;;  %v5119_v47 = vmov 1966171168  }
  0x16   :  { %4537 = vmatprep.subr.bf16.mxu1 %v5116_v15  ;;  %4539 = vmatprep.mubr.msk.bf16.mxu1 %vm5117_vm1, %v5116_v15  ;;  %s6120_s1 = sld [smem:[#allocation8_spill]]  ;;  %v297_v48 = vunpack.c.l.s4 %v5119_v47  ;;  %v300_v51 = vshrl.u32 %v299_v49, 7  ;;  %vm322_vm3 = vcmask 64512   ;;  %s6107_s28 = smov 64   ;;  %vm352_vm4 = vcmask 1043456  }
  0x17   :  { %s6121_s27 = sld [smem:[#allocation6_spill]]  ;;  %s6105_s4 = smov 80   ;;  %vm956_vm5 = vcmask 523264   ;;  %vm1971_vm6 = vcmask 1041409  }
  0x18   :  { %v298_v50 = vunpack.c.0.s8 %v297_v48  ;;  %v5298_v55 = vsub.s32 0, %v300_v51  ;;  %s6103_s29 = smov 112   ;;  %s6101_s0 = smov 48  }
  0x19   :  { %s6122_s24 = smov 80   ;;  %s6123_s25 = smov 112  }
  0x1a   :  { %v4922_v14 = vld [vmem:[%s6118_s26 + $0x8] sm:$0xff]   ;;  %v4923_v16 = vld [vmem:[%s6118_s26] sm:$0xff]   ;;  %v5292_v52 = vsub.s32 %v298_v50, %v300_v51 }
  0x1b   :  { %4530 = vmatpush3.bf16.msra.mxu0 %v4922_v14  ;;  %v4148_v25 = vld [vmem:[%s6119_s30] ss:$0 sm:$0xff] }
  0x1c   :  { %4531 = vmatprep.subr.bf16.mxu0 %v5116_v15  ;;  %v4149_v29 = vld [vmem:[%s6120_s1] ss:$0 sm:$0xff] }
  0x1d   :  { %v4156_v53 = vld.sshfl [vmem:[%s6121_s27] sm:$0x11 pattern:$0x75316420] }
  0x1e   :  { %v302_v54 = vrot.slane %v4156_v53, %v5292_v52  ;;  %v295_v56 = vcombine.high %v4156_v53, %v4156_v53 }
  0x1f   :  { %4532 = vmatpush3.bf16.msra.mxu0 %v4923_v16 }
  0x20   :  { %4543 = vmatprep.subr.bf16.mxu0 %v5116_v15  ;;  %v5301_v57 = vrot.slane %v302_v54, %v5298_v55  ;;  %v309_v58 = vrot.slane %v295_v56, %v5292_v52 }
  0x22   :  { %v5306_v63 = vrot.slane %v309_v58, %v5298_v55 }
  0x98   :  { %v75_v4 = vpop.xlane.xlu0 %74 }
  0x99   :  { %v80_v5 = vmul.f32 0.03125, %v75_v4 }
  0x9b   :  { %v82_v6 = vsub.f32 %v68_v0, %v80_v5 }
  0x9c   :  { %v78_v7 = vpop.xlane.xlu0 %77 }
  0x9d   :  { %v81_v8 = vmul.f32 0.03125, %v78_v7  ;;  %v84_v9 = vmul.f32 %v82_v6, %v82_v6 }
  0x9f   :  { %v83_v10 = vsub.f32 %v69_v1, %v81_v8  ;;  %v86_v11 = vsel %vm72_vm0, %v84_v9, 0.0 }
  0xa0   :  { %87 = vadd.xlane.f32.xlu1 %v86_v11 }
  0xa1   :  { %v85_v12 = vmul.f32 %v83_v10, %v83_v10 }
  0xa3   :  { %v89_v13 = vsel %vm72_vm0, %v85_v12, 0.0 }
  0xa4   :  { %90 = vadd.xlane.f32.xlu1 %v89_v13 }
 0x129   :  { %v88_v17 = vpop.xlane.xlu1 %87 }
 0x12a   :  { %v92_v18 = vmul.f32 0.03125, %v88_v17 }
 0x12c   :  { %v94_v19 = vadd.f32 1e-12, %v92_v18 }
 0x12d   :  { %v91_v20 = vpop.xlane.xlu1 %90 }
 0x12e   :  { %4970 = vrsqrt.f32 %v94_v19  ;;  %v93_v21 = vmul.f32 0.03125, %v91_v20 }
 0x130   :  { %v95_v22 = vadd.f32 1e-12, %v93_v21 }
 0x132   :  { %4972 = vrsqrt.f32 %v95_v22 }
 0x13b   :  { %v4971_v23 = vpop.eup %4970 }
 0x13c   :  { %v98_v24 = vmul.f32 %v4971_v23, %v82_v6 }
 0x13e   :  { %v106_v28 = vmul.f32 %v4148_v25, %v98_v24 }
 0x13f   :  { %v4973_v26 = vpop.eup %4972 }
 0x140   :  { %v99_v27 = vmul.f32 %v4973_v26, %v83_v10  ;;  %v5260_v31 = vadd.f32 %v4149_v29, %v106_v28 }
 0x142   :  { %v107_v30 = vmul.f32 %v4148_v25, %v99_v27 }
 0x144   :  { %v5262_v32 = vadd.f32 %v4149_v29, %v107_v30 }
 0x146   :  { %v116_v33 = vpack.c.bf16 %v5262_v32, %v5260_v31 }
 0x148   :  { %4534 = vmatmul.mubr.msk.bf16.vlgmr.msra.gmra.mxu0 %vm72_vm0, %v116_v33 }
 0x149   :  { %4545 = vmatprep.mubr.msk.bf16.mxu0 %vm5117_vm1, %v5116_v15 }
 0x208   :  { %v177_v35 = vpop.f32.mrf.mxu0 }
 0x209   :  { %v178_v36 = vadd.f32 %v4150_v34, %v177_v35 }
 0x20a   :  { %v4535_v37 = vpop.f32.mrf.mxu0 }
 0x20b   :  { %v5272_v38 = vpack.c.bf16 %v178_v36, %v178_v36 }
 0x20c   :  { %v180_v39 = vpop.f32.mrf.mxu0 }
 0x20d   :  { %v181_v40 = vadd.f32 %v4150_v34, %v180_v39  ;;  %187 = vrot.lane.b32.xlu0 %v5272_v38, %s6109_s2 }
 0x20e   :  { %v4536_v41 = vpop.f32.mrf.mxu0 }
 0x20f   :  { %v5276_v42 = vpack.c.bf16 %v181_v40, %v181_v40 }
 0x211   :  { %237 = vrot.lane.b32.xlu1 %v5276_v42, %s6109_s2 }
 0x27f   :  { %v188_v43 = vpop.permute.xlu0 %187 }
 0x280   :  { %v194_v44 = vsel %vm189_vm2, %v188_v43, 0 }
 0x281   :  { %4538 = vmatpush3.bf16.xpose.msra.mxu1 %v194_v44 }
 0x282   :  { %4549 = vmatprep.subr.bf16.mxu1 %v5116_v15 }
 0x283   :  { %v238_v45 = vpop.permute.xlu1 %237 }
 0x284   :  { %v243_v46 = vsel %vm189_vm2, %v238_v45, 0 }
 0x285   :  { %4544 = vmatpush3.bf16.xpose.msra.mxu0 %v243_v46 }
 0x286   :  { %4555 = vmatprep.subr.bf16.mxu0 %v5116_v15 }
 0x288   :  { %4540 = vmatmul.mubr.msk.bf16.vlgmr.msra.gmra.mxu1 %vm189_vm2, %v5272_v38 }
 0x289   :  { %4551 = vmatprep.mubr.msk.bf16.mxu1 %vm5117_vm1, %v5116_v15 }
 0x28c   :  { %4546 = vmatmul.mubr.msk.bf16.vlgmr.msra.gmra.mxu0 %vm189_vm2, %v5276_v42 }
 0x28d   :  { %4557 = vmatprep.mubr.msk.bf16.mxu0 %vm5117_vm1, %v5116_v15 }
 0x348   :  { %v230_v59 = vpop.f32.mrf.mxu1 }
 0x349   :  { %v285_v60 = vmul.f32 0.25, %v230_v59 }
 0x34a   :  { %v4541_v61 = vpop.f32.mrf.mxu1 }
 0x34b   :  { %v320_v62 = vadd.f32 %v5301_v57, %v285_v60 }
 0x34c   :  { %v233_v0 = vpop.f32.mrf.mxu1  ;;  %v279_v1 = vpop.f32.mrf.mxu0 }
 0x34d   :  { %v286_v2 = vmul.f32 0.25, %v279_v1  ;;  %v323_v3 = vsel %vm322_vm3, %v320_v62, -inf }
 0x34e   :  { %v4542_v4 = vpop.f32.mrf.mxu1  ;;  %v4547_v5 = vpop.f32.mrf.mxu0  ;;  %324 = vmax.xlane.f32.xlu1 %v323_v3 }
 0x34f   :  { %v321_v6 = vadd.f32 %v5306_v63, %v286_v2 }
 0x350   :  { %v282_v7 = vpop.f32.mrf.mxu0 }
 0x351   :  { %v326_v8 = vsel %vm322_vm3, %v321_v6, -inf }
 0x352   :  { %v4548_v9 = vpop.f32.mrf.mxu0  ;;  %327 = vmax.xlane.f32.xlu0 %v326_v8 }
 0x35f   :  { %396 = vrot.lane.b32.xlu1 %v5276_v42, %s6107_s28 }
 0x363   :  { %449 = vrot.lane.b32.xlu1 %v5272_v38, %s6105_s4 }
 0x3d7   :  { %v325_v10 = vpop.xlane.xlu1 %324 }
 0x3d8   :  { %v329_v11 = vsub.f32 %v320_v62, %v325_v10 }
 0x3da   :  { %v331_v12 = vmul.f32 1.442695, %v329_v11 }
 0x3db   :  { %v397_v13 = vpop.permute.xlu1 %396  ;;  %v328_v14 = vpop.xlane.xlu0 %327 }
 0x3dc   :  { %4974 = vpow2.f32 %v331_v12  ;;  %v402_v16 = vsel %vm352_vm4, %v397_v13, 0  ;;  %v330_v17 = vsub.f32 %v321_v6, %v328_v14 }
 0x3dd   :  { %4556 = vmatpush3.bf16.msra.mxu0 %v402_v16 }
 0x3de   :  { %v333_v18 = vmul.f32 1.442695, %v330_v17  ;;  %4567 = vmatprep.subr.bf16.mxu0 %v5116_v15 }
 0x3df   :  { %v450_v23 = vpop.permute.xlu1 %449 }
 0x3e0   :  { %4976 = vpow2.f32 %v333_v18  ;;  %v455_v34 = vsel %vm189_vm2, %v450_v23, 0 }
 0x3e9   :  { %v4975_v19 = vpop.eup %4974 }
 0x3ea   :  { %v335_v20 = vsel %vm322_vm3, %v4975_v19, 0.0 }
 0x3eb   :  { %336 = vadd.xlane.f32.xlu0 %v335_v20 }
 0x3ed   :  { %v4977_v21 = vpop.eup %4976 }
 0x3ee   :  { %v338_v22 = vsel %vm322_vm3, %v4977_v21, 0.0 }
 0x3ef   :  { %339 = vadd.xlane.f32.xlu1 %v338_v22 }
 0x400   :  { %499 = vrot.lane.b32.xlu1 %v5276_v42, %s6105_s4 }
 0x401   :  { %347 = vrot.lane.b32.xlu0 %v5272_v38, %s6107_s28 }
 0x404   :  { %497 = vrot.lane.b32.xlu1 %v5276_v42, %s6103_s29 }
 0x405   :  { %447 = vrot.lane.b32.xlu0 %v5272_v38, %s6103_s29  ;;  %s6125_s29 = smov 96  }
 0x474   :  { %v337_v24 = vpop.xlane.xlu0 %336 }
 0x475   :  { %4978 = vrcp.f32 %v337_v24 }
 0x478   :  { %v340_v25 = vpop.xlane.xlu1 %339  ;;  %v348_v26 = vpop.permute.xlu0 %347 }
 0x479   :  { %4980 = vrcp.f32 %v340_v25  ;;  %v354_v27 = vsel %vm352_vm4, %v348_v26, 0 }
 0x47a   :  { %4550 = vmatpush3.bf16.msra.mxu1 %v354_v27 }
 0x47b   :  { %4561 = vmatprep.subr.bf16.mxu1 %v5116_v15 }
 0x47c   :  { %v500_v36 = vpop.permute.xlu1 %499  ;;  %v448_v40 = vpop.permute.xlu0 %447 }
 0x47d   :  { %v505_v39 = vsel %vm189_vm2, %v500_v36, 0 }
 0x480   :  { %v498_v41 = vpop.permute.xlu1 %497 }
 0x482   :  { %v4979_v28 = vpop.eup %4978 }
 0x483   :  { %v343_v29 = vmul.f32 %v4979_v28, %v4975_v19  ;;  %v4925_v28 = vld [vmem:[%s6081_s6 + $0x8] sm:$0xff]  }
 0x485   :  { %v345_v30 = vpack.c.bf16 %v343_v29, %v343_v29 }
 0x486   :  { %v4981_v33 = vpop.eup %4980 }
 0x487   :  { %4552 = vmatmul.mubr.msk.bf16.vlgmr.msra.gmra.mxu1 %vm322_vm3, %v345_v30  ;;  %v344_v35 = vmul.f32 %v4981_v33, %v4977_v21 }
 0x488   :  { %4562 = vmatpush3.bf16.xpose.msra.mxu1 %v455_v34  ;;  %4563 = vmatprep.mubr.msk.bf16.mxu1 %vm5117_vm1, %v5116_v15 }
 0x489   :  { %v346_v37 = vpack.c.bf16 %v344_v35, %v344_v35  ;;  %4573 = vmatprep.subr.bf16.mxu1 %v5116_v15 }
 0x48b   :  { %4558 = vmatmul.mubr.msk.bf16.vlgmr.msra.gmra.mxu0 %vm322_vm3, %v346_v37 }
 0x48c   :  { %4568 = vmatpush3.bf16.xpose.msra.mxu0 %v505_v39  ;;  %4569 = vmatprep.mubr.msk.bf16.mxu0 %vm5117_vm1, %v5116_v15 }
 0x48d   :  { %4579 = vmatprep.subr.bf16.mxu0 %v5116_v15 }
 0x48f   :  { %4564 = vmatmul.mubr.msk.bf16.vlgmr.msra.gmra.mxu1 %vm189_vm2, %v448_v40 }
 0x490   :  { %4575 = vmatprep.mubr.msk.bf16.mxu1 %vm5117_vm1, %v5116_v15 }
 0x493   :  { %4570 = vmatmul.mubr.msk.bf16.vlgmr.msra.gmra.mxu0 %vm189_vm2, %v498_v41 }
 0x494   :  { %4581 = vmatprep.mubr.msk.bf16.mxu0 %vm5117_vm1, %v5116_v15 }
 0x547   :  { %v5345_v43 = vpop.f32.mrf.mxu1 }
 0x549   :  { %v4553_v44 = vpop.f32.mrf.mxu1 }
 0x54b   :  { %v393_v45 = vpop.f32.mrf.mxu1  ;;  %v5347_v46 = vpop.f32.mrf.mxu0 }
 0x54c   :  { %v444_v47 = vpack.c.bf16 %v5347_v46, %v5345_v43 }
 0x54d   :  { %v4554_v48 = vpop.f32.mrf.mxu1  ;;  %v4559_v49 = vpop.f32.mrf.mxu0 }
 0x54f   :  { %v441_v50 = vpop.f32.mrf.mxu0  ;;  %v491_v51 = vpop.f32.mrf.mxu1 }
 0x550   :  { %v547_v53 = vmul.f32 0.25, %v491_v51 }
 0x551   :  { %v4560_v54 = vpop.f32.mrf.mxu0  ;;  %v4565_v56 = vpop.f32.mrf.mxu1 }
 0x552   :  { %v549_v58 = vadd.f32 %v547_v53, %v5301_v57 }
 0x553   :  { %v494_v59 = vpop.f32.mrf.mxu1  ;;  %v541_v60 = vpop.f32.mrf.mxu0 }
 0x554   :  { %v548_v61 = vmul.f32 0.25, %v541_v60  ;;  %v551_v62 = vsel %vm322_vm3, %v549_v58, -inf }
 0x555   :  { %v4571_v0 = vpop.f32.mrf.mxu0  ;;  %552 = vmax.xlane.f32.xlu0 %v551_v62  ;;  %v4566_v1 = vpop.f32.mrf.mxu1 }
 0x556   :  { %v550_v2 = vadd.f32 %v548_v61, %v5306_v63 }
 0x557   :  { %v544_v3 = vpop.f32.mrf.mxu0 }
 0x558   :  { %v554_v4 = vsel %vm322_vm3, %v550_v2, -inf }
 0x559   :  { %555 = vmax.xlane.f32.xlu1 %v554_v4  ;;  %v4572_v5 = vpop.f32.mrf.mxu0 }
 0x56a   :  { %623 = vrot.lane.b32.xlu1 %v5276_v42, %s6101_s0 }
 0x5de   :  { %v553_v6 = vpop.xlane.xlu0 %552 }
 0x5df   :  { %v557_v7 = vsub.f32 %v549_v58, %v553_v6 }
 0x5e1   :  { %v559_v8 = vmul.f32 1.442695, %v557_v7 }
 0x5e2   :  { %v556_v9 = vpop.xlane.xlu1 %555 }
 0x5e3   :  { %4982 = vpow2.f32 %v559_v8  ;;  %v558_v10 = vsub.f32 %v550_v2, %v556_v9  ;;  %v4927_v8 = vld [vmem:[%s6085_s10] sm:$0xff]  }
 0x5e5   :  { %v561_v11 = vmul.f32 1.442695, %v558_v10 }
 0x5e6   :  { %v624_v12 = vpop.permute.xlu1 %623 }
 0x5e7   :  { %4984 = vpow2.f32 %v561_v11  ;;  %v629_v13 = vsel %vm352_vm4, %v624_v12, 0 }
 0x5e8   :  { %4580 = vmatpush3.bf16.msra.mxu0 %v629_v13 }
 0x5e9   :  { %4591 = vmatprep.subr.bf16.mxu0 %v5116_v15 }
 0x5f0   :  { %v4983_v14 = vpop.eup %4982 }
 0x5f1   :  { %v563_v16 = vsel %vm322_vm3, %v4983_v14, 0.0 }
 0x5f2   :  { %564 = vadd.xlane.f32.xlu0 %v563_v16 }
 0x5f4   :  { %v4985_v17 = vpop.eup %4984 }
 0x5f5   :  { %v566_v42 = vsel %vm322_vm3, %v4985_v17, 0.0 }
 0x5f6   :  { %567 = vadd.xlane.f32.xlu0 %v566_v42  ;;  %v4170_v42 = vld [vmem:[%s6083_s8] ss:$0 sm:$0xff] }
 0x60c   :  { %575 = vrot.lane.b32.xlu0 %v5272_v38, %s6101_s0  ;;  %v4924_v38 = vld [vmem:[%s6081_s6] sm:$0xff]   ;;  %s6124_s0 = smov 48  }
 0x67b   :  { %v565_v18 = vpop.xlane.xlu0 %564 }
 0x67c   :  { %4986 = vrcp.f32 %v565_v18 }
 0x67f   :  { %v568_v19 = vpop.xlane.xlu0 %567 }
 0x680   :  { %4988 = vrcp.f32 %v568_v19 }
 0x683   :  { %v576_v20 = vpop.permute.xlu0 %575 }
 0x684   :  { %v581_v21 = vsel %vm352_vm4, %v576_v20, 0 }
 0x685   :  { %4574 = vmatpush3.bf16.msra.mxu1 %v581_v21  ;;  %v4171_v21 = vld [vmem:[%s6084_s9] ss:$0 sm:$0xff] }
 0x686   :  { %4585 = vmatprep.subr.bf16.mxu1 %v5116_v15 }
 0x689   :  { %v4987_v22 = vpop.eup %4986 }
 0x68a   :  { %v571_v23 = vmul.f32 %v4987_v22, %v4983_v14 }
 0x68c   :  { %v573_v24 = vpack.c.bf16 %v571_v23, %v571_v23 }
 0x68d   :  { %v4989_v25 = vpop.eup %4988 }
 0x68e   :  { %4576 = vmatmul.mubr.msk.bf16.vlgmr.msra.gmra.mxu1 %vm322_vm3, %v573_v24  ;;  %v572_v26 = vmul.f32 %v4989_v25, %v4985_v17 }
 0x68f   :  { %4587 = vmatprep.mubr.msk.bf16.mxu1 %vm5117_vm1, %v5116_v15  ;;  %4586 = vmatpush3.bf16.msra.mxu1 %v4925_v28  ;;  %v4931_v28 = vld [vmem:[%s6087_s12] sm:$0xff]  }
 0x690   :  { %v574_v27 = vpack.c.bf16 %v572_v26, %v572_v26  ;;  %4597 = vmatprep.subr.bf16.mxu1 %v5116_v15  ;;  %v4928_v26 = vld [vmem:[%s6087_s12 + $0x18] sm:$0xff]  }
 0x692   :  { %4582 = vmatmul.mubr.msk.bf16.vlgmr.msra.gmra.mxu0 %vm322_vm3, %v574_v27  ;;  %v4930_v27 = vld [vmem:[%s6087_s12 + $0x8] sm:$0xff]  }
 0x693   :  { %4592 = vmatpush3.bf16.msra.mxu0 %v4924_v38  ;;  %4593 = vmatprep.mubr.msk.bf16.mxu0 %vm5117_vm1, %v5116_v15  ;;  %v4929_v38 = vld [vmem:[%s6087_s12 + $0x10] sm:$0xff]  }
 0x694   :  { %4605 = vmatprep.subr.bf16.mxu0 %v5116_v15 }
 0x69a   :  { %4594 = vmatmul.mubr.msk.bf16.vlgmr.msra.gmra.mxu0 %vm189_vm2, %v444_v47  ;;  %v4169_v47 = vld [vmem:[%s6082_s7] ss:$0 sm:$0xff] }
 0x69b   :  { %4613 = vmatprep.mubr.msk.bf16.mxu0 %vm5117_vm1, %v5116_v15  ;;  %4606 = vmatpush3.bf16.msra.mxu0 %v4928_v26 }
 0x69c   :  { %4607 = vmatprep.subr.bf16.mxu0 %v5116_v15 }
 0x69f   :  { %4608 = vmatpush3.bf16.msra.mxu0 %v4929_v38 }
 0x6a0   :  { %4609 = vmatprep.subr.bf16.mxu0 %v5116_v15 }
 0x6a3   :  { %4610 = vmatpush3.bf16.msra.mxu0 %v4930_v27  ;;  %v4182_v27 = vld [vmem:[%s6089_s14] ss:$0 sm:$0xff] }
 0x6a4   :  { %4611 = vmatprep.subr.bf16.mxu0 %v5116_v15 }
 0x6a7   :  { %4612 = vmatpush3.bf16.msra.mxu0 %v4931_v28 }
 0x6a8   :  { %4631 = vmatprep.subr.bf16.mxu0 %v5116_v15 }
 0x74e   :  { %v617_v29 = vpop.f32.mrf.mxu1 }
 0x750   :  { %v4577_v30 = vpop.f32.mrf.mxu1 }
 0x752   :  { %v620_v33 = vpop.f32.mrf.mxu1  ;;  %v665_v34 = vpop.f32.mrf.mxu0 }
 0x753   :  { %v671_v35 = vpack.c.bf16 %v665_v34, %v617_v29  ;;  %v4172_v29 = vld [vmem:[%s6086_s11] ss:$0 sm:$0xff] }
 0x754   :  { %v4578_v36 = vpop.f32.mrf.mxu1  ;;  %v4583_v37 = vpop.f32.mrf.mxu0 }
 0x755   :  { %4588 = vmatmul.mubr.msk.bf16.vlgmr.msra.gmra.mxu1 %vm189_vm2, %v671_v35 }
 0x756   :  { %v668_v39 = vpop.f32.mrf.mxu0  ;;  %4601 = vmatprep.mubr.msk.bf16.mxu1 %vm5117_vm1, %v5116_v15 }
 0x758   :  { %v4584_v40 = vpop.f32.mrf.mxu0 }
 0x75a   :  { %v768_v41 = vpop.f32.mrf.mxu0 }
 0x75c   :  { %v4595_v43 = vpop.f32.mrf.mxu0 }
 0x75e   :  { %v771_v44 = vpop.f32.mrf.mxu0 }
 0x760   :  { %v4596_v45 = vpop.f32.mrf.mxu0 }
 0x815   :  { %v718_v46 = vpop.f32.mrf.mxu1 }
 0x816   :  { %v769_v48 = vadd.f32 %v768_v41, %v718_v46 }
 0x817   :  { %v4589_v49 = vpop.f32.mrf.mxu1 }
 0x818   :  { %v782_v50 = vadd.f32 %v4169_v47, %v769_v48 }
 0x819   :  { %v721_v51 = vpop.f32.mrf.mxu1 }
 0x81a   :  { %v772_v53 = vadd.f32 %v771_v44, %v721_v51  ;;  %v784_v54 = vadd.f32 %v782_v50, %v5260_v31 }
 0x81b   :  { %v4590_v56 = vpop.f32.mrf.mxu1 }
 0x81c   :  { %v783_v58 = vadd.f32 %v4169_v47, %v772_v53  ;;  %v788_v59 = vsel %vm72_vm0, %v784_v54, 0.0 }
 0x81d   :  { %789 = vadd.xlane.f32.xlu1 %v788_v59 }
 0x81e   :  { %v785_v60 = vadd.f32 %v783_v58, %v5262_v32  ;;  %v4926_v32 = vld [vmem:[%s6085_s10 + $0x8] sm:$0xff]  }
 0x81f   :  { %4598 = vmatpush3.bf16.msra.mxu1 %v4926_v32 }
 0x820   :  { %v791_v61 = vsel %vm72_vm0, %v785_v60, 0.0  ;;  %4599 = vmatprep.subr.bf16.mxu1 %v5116_v15 }
 0x821   :  { %792 = vadd.xlane.f32.xlu0 %v791_v61 }
 0x823   :  { %4600 = vmatpush3.bf16.msra.mxu1 %v4927_v8 }
 0x824   :  { %4617 = vmatprep.subr.bf16.mxu1 %v5116_v15 }
 0x8a6   :  { %v790_v62 = vpop.xlane.xlu1 %789 }
 0x8a7   :  { %v794_v0 = vmul.f32 0.03125, %v790_v62  ;;  %v4176_v62 = vld [vmem:[%s6088_s13] ss:$0 sm:$0xff] }
 0x8a9   :  { %v796_v1 = vsub.f32 %v784_v54, %v794_v0 }
 0x8aa   :  { %v793_v2 = vpop.xlane.xlu0 %792 }
 0x8ab   :  { %v795_v3 = vmul.f32 0.03125, %v793_v2  ;;  %v798_v4 = vmul.f32 %v796_v1, %v796_v1 }
 0x8ad   :  { %v797_v5 = vsub.f32 %v785_v60, %v795_v3  ;;  %v800_v6 = vsel %vm72_vm0, %v798_v4, 0.0 }
 0x8ae   :  { %801 = vadd.xlane.f32.xlu0 %v800_v6 }
 0x8af   :  { %v799_v31 = vmul.f32 %v797_v5, %v797_v5 }
 0x8b1   :  { %v803_v7 = vsel %vm72_vm0, %v799_v31, 0.0 }
 0x8b2   :  { %804 = vadd.xlane.f32.xlu1 %v803_v7 }
 0x937   :  { %v802_v9 = vpop.xlane.xlu0 %801 }
 0x938   :  { %v806_v10 = vmul.f32 0.03125, %v802_v9 }
 0x93a   :  { %v808_v11 = vadd.f32 1e-12, %v806_v10 }
 0x93b   :  { %v805_v12 = vpop.xlane.xlu1 %804 }
 0x93c   :  { %4990 = vrsqrt.f32 %v808_v11  ;;  %v807_v13 = vmul.f32 0.03125, %v805_v12 }
 0x93e   :  { %v809_v14 = vadd.f32 1e-12, %v807_v13 }
 0x940   :  { %4992 = vrsqrt.f32 %v809_v14 }
 0x949   :  { %v4991_v16 = vpop.eup %4990 }
 0x94a   :  { %v812_v17 = vmul.f32 %v4991_v16, %v796_v1 }
 0x94c   :  { %v820_v20 = vmul.f32 %v4170_v42, %v812_v17 }
 0x94d   :  { %v4993_v18 = vpop.eup %4992 }
 0x94e   :  { %v813_v19 = vmul.f32 %v4993_v18, %v797_v5  ;;  %v828_v23 = vadd.f32 %v4171_v21, %v820_v20  ;;  %v4932_v18 = vld [vmem:[%s6118_s26 + $0x18] sm:$0xff]  }
 0x950   :  { %v821_v22 = vmul.f32 %v4170_v42, %v813_v19  ;;  %v4933_v19 = vld [vmem:[%s6118_s26 + $0x10] sm:$0xff]  }
 0x952   :  { %v829_v24 = vadd.f32 %v4171_v21, %v821_v22 }
 0x954   :  { %v830_v25 = vpack.c.bf16 %v829_v24, %v828_v23 }
 0x956   :  { %4602 = vmatmul.mubr.msk.bf16.vlgmr.msra.gmra.mxu1 %vm72_vm0, %v830_v25 }
 0x957   :  { %4621 = vmatprep.mubr.msk.bf16.mxu1 %vm5117_vm1, %v5116_v15  ;;  %4618 = vmatpush3.bf16.msra.mxu1 %v4932_v18 }
 0x958   :  { %4619 = vmatprep.subr.bf16.mxu1 %v5116_v15 }
 0x95b   :  { %4620 = vmatpush3.bf16.msra.mxu1 %v4933_v19 }
 0x95c   :  { %4625 = vmatprep.subr.bf16.mxu1 %v5116_v15 }
 0xa16   :  { %v891_v30 = vpop.f32.mrf.mxu1 }
 0xa17   :  { %v892_v33 = vadd.f32 %v4172_v29, %v891_v30 }
 0xa18   :  { %v4603_v34 = vpop.f32.mrf.mxu1 }
 0xa19   :  { %v900_v35 = vmul.f32 0.044715, %v892_v33  ;;  %v898_v54 = vmul.f32 0.5, %v892_v33 }
 0xa1a   :  { %v894_v36 = vpop.f32.mrf.mxu1 }
 0xa1b   :  { %v902_v37 = vmul.f32 %v900_v35, %v892_v33  ;;  %v895_v39 = vadd.f32 %v4172_v29, %v894_v36 }
 0xa1c   :  { %v4604_v40 = vpop.f32.mrf.mxu1 }
 0xa1d   :  { %v904_v41 = vmul.f32 %v902_v37, %v892_v33  ;;  %v901_v43 = vmul.f32 0.044715, %v895_v39  ;;  %v899_v56 = vmul.f32 0.5, %v895_v39 }
 0xa1f   :  { %v906_v44 = vadd.f32 %v904_v41, %v892_v33  ;;  %v903_v45 = vmul.f32 %v901_v43, %v895_v39  ;;  %v4183_v33 = vld [vmem:[%s6090_s15] ss:$0 sm:$0xff] }
 0xa21   :  { %v908_v46 = vmul.f32 0.7978846, %v906_v44  ;;  %v905_v47 = vmul.f32 %v903_v45, %v895_v39 }
 0xa23   :  { %4994 = vtanh.f32 %v908_v46  ;;  %v907_v48 = vadd.f32 %v905_v47, %v895_v39  ;;  %v4189_v39 = vld [vmem:[%s6080_s5 + $0x1] ss:$0 sm:$0xff] }
 0xa25   :  { %v909_v49 = vmul.f32 0.7978846, %v907_v48 }
 0xa27   :  { %4996 = vtanh.f32 %v909_v49 }
 0xa30   :  { %v4995_v50 = vpop.eup %4994 }
 0xa31   :  { %v912_v51 = vadd.f32 1.0, %v4995_v50 }
 0xa33   :  { %v914_v59 = vmul.f32 %v912_v51, %v898_v54 }
 0xa34   :  { %v4997_v53 = vpop.eup %4996 }
 0xa35   :  { %v913_v58 = vadd.f32 1.0, %v4997_v53 }
 0xa37   :  { %v915_v60 = vmul.f32 %v913_v58, %v899_v56 }
 0xa39   :  { %v916_v61 = vpack.c.bf16 %v915_v60, %v914_v59 }
 0xa3b   :  { %4614 = vmatmul.mubr.msk.bf16.vlgmr.msra.gmra.mxu0 %vm956_vm5, %v916_v61 }
 0xa3c   :  { %4633 = vmatprep.mubr.msk.bf16.mxu0 %vm5117_vm1, %v5116_v15 }
 0xafb   :  { %v994_v0 = vpop.f32.mrf.mxu0 }
 0xafc   :  { %v995_v1 = vadd.f32 %v4176_v62, %v994_v0 }
 0xafd   :  { %v4615_v2 = vpop.f32.mrf.mxu0 }
 0xafe   :  { %v1001_v3 = vadd.f32 %v995_v1, %v828_v23 }
 0xaff   :  { %v997_v4 = vpop.f32.mrf.mxu0 }
 0xb00   :  { %v998_v5 = vadd.f32 %v4176_v62, %v997_v4  ;;  %v1005_v6 = vsel %vm72_vm0, %v1001_v3, 0.0 }
 0xb01   :  { %1006 = vadd.xlane.f32.xlu0 %v1005_v6  ;;  %v4616_v31 = vpop.f32.mrf.mxu0 }
 0xb02   :  { %v1002_v7 = vadd.f32 %v998_v5, %v829_v24 }
 0xb04   :  { %v1008_v32 = vsel %vm72_vm0, %v1002_v7, 0.0 }
 0xb05   :  { %1009 = vadd.xlane.f32.xlu1 %v1008_v32 }
 0xb8a   :  { %v1007_v8 = vpop.xlane.xlu0 %1006 }
 0xb8b   :  { %v1011_v9 = vmul.f32 0.03125, %v1007_v8 }
 0xb8d   :  { %v1013_v10 = vsub.f32 %v1001_v3, %v1011_v9 }
 0xb8e   :  { %v1010_v11 = vpop.xlane.xlu1 %1009 }
 0xb8f   :  { %v1012_v12 = vmul.f32 0.03125, %v1010_v11  ;;  %v1015_v13 = vmul.f32 %v1013_v10, %v1013_v10 }
 0xb91   :  { %v1014_v14 = vsub.f32 %v1002_v7, %v1012_v12  ;;  %v1017_v16 = vsel %vm72_vm0, %v1015_v13, 0.0 }
 0xb92   :  { %1018 = vadd.xlane.f32.xlu0 %v1017_v16 }
 0xb93   :  { %v1016_v17 = vmul.f32 %v1014_v14, %v1014_v14 }
 0xb95   :  { %v1020_v42 = vsel %vm72_vm0, %v1016_v17, 0.0 }
 0xb96   :  { %1021 = vadd.xlane.f32.xlu1 %v1020_v42 }
 0xc1b   :  { %v1019_v20 = vpop.xlane.xlu0 %1018 }
 0xc1c   :  { %v1023_v21 = vmul.f32 0.03125, %v1019_v20 }
 0xc1e   :  { %v1025_v22 = vadd.f32 1e-12, %v1023_v21 }
 0xc1f   :  { %v1022_v23 = vpop.xlane.xlu1 %1021 }
 0xc20   :  { %4998 = vrsqrt.f32 %v1025_v22  ;;  %v1024_v24 = vmul.f32 0.03125, %v1022_v23 }
 0xc22   :  { %v1026_v25 = vadd.f32 1e-12, %v1024_v24 }
 0xc24   :  { %5000 = vrsqrt.f32 %v1026_v25 }
 0xc2d   :  { %v4999_v26 = vpop.eup %4998 }
 0xc2e   :  { %v1029_v38 = vmul.f32 %v4999_v26, %v1013_v10 }
 0xc30   :  { %v1037_v30 = vmul.f32 %v4182_v27, %v1029_v38 }
 0xc31   :  { %v5001_v28 = vpop.eup %5000 }
 0xc32   :  { %v1030_v29 = vmul.f32 %v5001_v28, %v1014_v14  ;;  %v5457_v35 = vadd.f32 %v4183_v33, %v1037_v30 }
 0xc34   :  { %v1038_v34 = vmul.f32 %v4182_v27, %v1030_v29 }
 0xc36   :  { %v5459_v36 = vadd.f32 %v4183_v33, %v1038_v34 }
 0xc38   :  { %v1047_v37 = vpack.c.bf16 %v5459_v36, %v5457_v35 }
 0xc3a   :  { %4622 = vmatmul.mubr.msk.bf16.vlgmr.msra.gmra.mxu1 %vm72_vm0, %v1047_v37 }
 0xc3b   :  { %4627 = vmatprep.mubr.msk.bf16.mxu1 %vm5117_vm1, %v5116_v15 }
 0xcfa   :  { %v1110_v40 = vpop.f32.mrf.mxu1 }
 0xcfb   :  { %v1111_v41 = vadd.f32 %v4189_v39, %v1110_v40 }
 0xcfc   :  { %v4623_v43 = vpop.f32.mrf.mxu1 }
 0xcfd   :  { %v5469_v44 = vpack.c.bf16 %v1111_v41, %v1111_v41 }
 0xcfe   :  { %v1113_v45 = vpop.f32.mrf.mxu1 }
 0xcff   :  { %v1114_v46 = vadd.f32 %v4189_v39, %v1113_v45  ;;  %1120 = vrot.lane.b32.xlu0 %v5469_v44, %s6109_s2 }
 0xd00   :  { %v4624_v47 = vpop.f32.mrf.mxu1 }
 0xd01   :  { %v5473_v48 = vpack.c.bf16 %v1114_v46, %v1114_v46 }
 0xd03   :  { %1169 = vrot.lane.b32.xlu1 %v5473_v48, %s6109_s2 }
 0xd71   :  { %v1121_v49 = vpop.permute.xlu0 %1120 }
 0xd72   :  { %v1126_v50 = vsel %vm189_vm2, %v1121_v49, 0 }
 0xd73   :  { %4626 = vmatpush3.bf16.xpose.msra.mxu1 %v1126_v50 }
 0xd74   :  { %4637 = vmatprep.subr.bf16.mxu1 %v5116_v15 }
 0xd75   :  { %v1170_v51 = vpop.permute.xlu1 %1169 }
 0xd76   :  { %v1175_v53 = vsel %vm189_vm2, %v1170_v51, 0 }
 0xd77   :  { %4632 = vmatpush3.bf16.xpose.msra.mxu0 %v1175_v53 }
 0xd78   :  { %4643 = vmatprep.subr.bf16.mxu0 %v5116_v15 }
 0xd7a   :  { %4628 = vmatmul.mubr.msk.bf16.vlgmr.msra.gmra.mxu1 %vm189_vm2, %v5469_v44 }
 0xd7b   :  { %4639 = vmatprep.mubr.msk.bf16.mxu1 %vm5117_vm1, %v5116_v15 }
 0xd7e   :  { %4634 = vmatmul.mubr.msk.bf16.vlgmr.msra.gmra.mxu0 %vm189_vm2, %v5473_v48 }
 0xd7f   :  { %4645 = vmatprep.mubr.msk.bf16.mxu0 %vm5117_vm1, %v5116_v15 }
 0xe3a   :  { %v1162_v54 = vpop.f32.mrf.mxu1 }
 0xe3b   :  { %v1217_v56 = vmul.f32 0.25, %v1162_v54 }
 0xe3c   :  { %v4629_v58 = vpop.f32.mrf.mxu1 }
 0xe3d   :  { %v1219_v59 = vadd.f32 %v1217_v56, %v5301_v57 }
 0xe3e   :  { %v1165_v60 = vpop.f32.mrf.mxu1  ;;  %v1211_v61 = vpop.f32.mrf.mxu0 }
 0xe3f   :  { %v1218_v62 = vmul.f32 0.25, %v1211_v61  ;;  %v1221_v0 = vsel %vm322_vm3, %v1219_v59, -inf }
 0xe40   :  { %v4635_v1 = vpop.f32.mrf.mxu0  ;;  %1222 = vmax.xlane.f32.xlu1 %v1221_v0  ;;  %v4630_v2 = vpop.f32.mrf.mxu1 }
 0xe41   :  { %v1220_v3 = vadd.f32 %v1218_v62, %v5306_v63 }
 0xe42   :  { %v1214_v4 = vpop.f32.mrf.mxu0 }
 0xe43   :  { %v1224_v5 = vsel %vm322_vm3, %v1220_v3, -inf }
 0xe44   :  { %1225 = vmax.xlane.f32.xlu0 %v1224_v5  ;;  %v4636_v6 = vpop.f32.mrf.mxu0 }
 0xe51   :  { %1293 = vrot.lane.b32.xlu1 %v5473_v48, %s6107_s28 }
 0xe55   :  { %1347 = vrot.lane.b32.xlu1 %v5469_v44, %s6122_s24 }
 0xec9   :  { %v1223_v31 = vpop.xlane.xlu1 %1222 }
 0xeca   :  { %v1227_v7 = vsub.f32 %v1219_v59, %v1223_v31 }
 0xecc   :  { %v1229_v32 = vmul.f32 1.442695, %v1227_v7 }
 0xecd   :  { %v1226_v8 = vpop.xlane.xlu0 %1225  ;;  %v1294_v9 = vpop.permute.xlu1 %1293 }
 0xece   :  { %5002 = vpow2.f32 %v1229_v32  ;;  %v1228_v10 = vsub.f32 %v1220_v3, %v1226_v8  ;;  %v1299_v11 = vsel %vm352_vm4, %v1294_v9, 0 }
 0xecf   :  { %4644 = vmatpush3.bf16.msra.mxu0 %v1299_v11 }
 0xed0   :  { %v1231_v12 = vmul.f32 1.442695, %v1228_v10  ;;  %4655 = vmatprep.subr.bf16.mxu0 %v5116_v15 }
 0xed1   :  { %v1348_v42 = vpop.permute.xlu1 %1347 }
 0xed2   :  { %5004 = vpow2.f32 %v1231_v12  ;;  %v1353_v26 = vsel %vm189_vm2, %v1348_v42, 0 }
 0xedb   :  { %v5003_v13 = vpop.eup %5002 }
 0xedc   :  { %v1233_v14 = vsel %vm322_vm3, %v5003_v13, 0.0 }
 0xedd   :  { %1234 = vadd.xlane.f32.xlu0 %v1233_v14 }
 0xedf   :  { %v5005_v16 = vpop.eup %5004 }
 0xee0   :  { %v1236_v17 = vsel %vm322_vm3, %v5005_v16, 0.0 }
 0xee1   :  { %1237 = vadd.xlane.f32.xlu1 %v1236_v17 }
 0xef2   :  { %1397 = vrot.lane.b32.xlu1 %v5473_v48, %s6122_s24 }
 0xef3   :  { %1245 = vrot.lane.b32.xlu0 %v5469_v44, %s6107_s28 }
 0xef6   :  { %1395 = vrot.lane.b32.xlu1 %v5473_v48, %s6123_s25 }
 0xef7   :  { %1345 = vrot.lane.b32.xlu0 %v5469_v44, %s6123_s25 }
 0xf66   :  { %v1235_v18 = vpop.xlane.xlu0 %1234 }
 0xf67   :  { %5006 = vrcp.f32 %v1235_v18 }
 0xf6a   :  { %v1246_v19 = vpop.permute.xlu0 %1245  ;;  %v1238_v20 = vpop.xlane.xlu1 %1237 }
 0xf6b   :  { %v1251_v21 = vsel %vm352_vm4, %v1246_v19, 0  ;;  %5008 = vrcp.f32 %v1238_v20  ;;  %v4935_v20 = vld [vmem:[%s6081_s6 + $0x18] sm:$0xff]  }
 0xf6c   :  { %4638 = vmatpush3.bf16.msra.mxu1 %v1251_v21 }
 0xf6d   :  { %4649 = vmatprep.subr.bf16.mxu1 %v5116_v15 }
 0xf6e   :  { %v1398_v27 = vpop.permute.xlu1 %1397  ;;  %v1346_v30 = vpop.permute.xlu0 %1345 }
 0xf6f   :  { %v1403_v29 = vsel %vm189_vm2, %v1398_v27, 0 }
 0xf72   :  { %v1396_v33 = vpop.permute.xlu1 %1395 }
 0xf74   :  { %v5007_v22 = vpop.eup %5006 }
 0xf75   :  { %v1241_v23 = vmul.f32 %v5007_v22, %v5003_v13 }
 0xf77   :  { %v1243_v24 = vpack.c.bf16 %v1241_v23, %v1241_v23 }
 0xf78   :  { %v5009_v25 = vpop.eup %5008 }
 0xf79   :  { %4640 = vmatmul.mubr.msk.bf16.vlgmr.msra.gmra.mxu1 %vm322_vm3, %v1243_v24  ;;  %v1242_v38 = vmul.f32 %v5009_v25, %v5005_v16 }
 0xf7a   :  { %4650 = vmatpush3.bf16.xpose.msra.mxu1 %v1353_v26  ;;  %4651 = vmatprep.mubr.msk.bf16.mxu1 %vm5117_vm1, %v5116_v15 }
 0xf7b   :  { %v1244_v28 = vpack.c.bf16 %v1242_v38, %v1242_v38  ;;  %4661 = vmatprep.subr.bf16.mxu1 %v5116_v15 }
 0xf7d   :  { %4646 = vmatmul.mubr.msk.bf16.vlgmr.msra.gmra.mxu0 %vm322_vm3, %v1244_v28 }
 0xf7e   :  { %4656 = vmatpush3.bf16.xpose.msra.mxu0 %v1403_v29  ;;  %4657 = vmatprep.mubr.msk.bf16.mxu0 %vm5117_vm1, %v5116_v15 }
 0xf7f   :  { %4667 = vmatprep.subr.bf16.mxu0 %v5116_v15 }
 0xf81   :  { %4652 = vmatmul.mubr.msk.bf16.vlgmr.msra.gmra.mxu1 %vm189_vm2, %v1346_v30 }
 0xf82   :  { %4663 = vmatprep.mubr.msk.bf16.mxu1 %vm5117_vm1, %v5116_v15 }
 0xf85   :  { %4658 = vmatmul.mubr.msk.bf16.vlgmr.msra.gmra.mxu0 %vm189_vm2, %v1396_v33 }
 0xf86   :  { %4669 = vmatprep.mubr.msk.bf16.mxu0 %vm5117_vm1, %v5116_v15 }
0x1039   :  { %v5527_v34 = vpop.f32.mrf.mxu1 }
0x103b   :  { %v4641_v37 = vpop.f32.mrf.mxu1 }
0x103d   :  { %v1290_v39 = vpop.f32.mrf.mxu1  ;;  %v5529_v40 = vpop.f32.mrf.mxu0 }
0x103e   :  { %v1341_v41 = vpack.c.bf16 %v5529_v40, %v5527_v34  ;;  %v4210_v39 = vld [vmem:[%s6082_s7 + $0x1] ss:$0 sm:$0xff] }
0x103f   :  { %v4642_v43 = vpop.f32.mrf.mxu1  ;;  %v4647_v45 = vpop.f32.mrf.mxu0 }
0x1041   :  { %v1338_v46 = vpop.f32.mrf.mxu0  ;;  %v1389_v47 = vpop.f32.mrf.mxu1 }
0x1042   :  { %v1445_v49 = vmul.f32 0.25, %v1389_v47 }
0x1043   :  { %v4648_v50 = vpop.f32.mrf.mxu0  ;;  %v4653_v51 = vpop.f32.mrf.mxu1 }
0x1044   :  { %v1447_v53 = vadd.f32 %v1445_v49, %v5301_v57 }
0x1045   :  { %v1392_v54 = vpop.f32.mrf.mxu1  ;;  %v1439_v56 = vpop.f32.mrf.mxu0 }
0x1046   :  { %v1446_v58 = vmul.f32 0.25, %v1439_v56  ;;  %v1449_v59 = vsel %vm322_vm3, %v1447_v53, -inf }
0x1047   :  { %v4659_v60 = vpop.f32.mrf.mxu0  ;;  %1450 = vmax.xlane.f32.xlu0 %v1449_v59  ;;  %v4654_v61 = vpop.f32.mrf.mxu1 }
0x1048   :  { %v1448_v62 = vadd.f32 %v1446_v58, %v5306_v63 }
0x1049   :  { %v1442_v0 = vpop.f32.mrf.mxu0 }
0x104a   :  { %v1452_v1 = vsel %vm322_vm3, %v1448_v62, -inf }
0x104b   :  { %1453 = vmax.xlane.f32.xlu1 %v1452_v1  ;;  %v4660_v2 = vpop.f32.mrf.mxu0 }
0x105c   :  { %1521 = vrot.lane.b32.xlu1 %v5473_v48, %s6124_s0 }
0x10d0   :  { %v1451_v3 = vpop.xlane.xlu0 %1450 }
0x10d1   :  { %v1455_v57 = vsub.f32 %v1447_v53, %v1451_v3  ;;  %v4937_v3 = vld [vmem:[%s6085_s10 + $0x10] sm:$0xff]  }
0x10d3   :  { %v1457_v4 = vmul.f32 1.442695, %v1455_v57 }
0x10d4   :  { %v1454_v5 = vpop.xlane.xlu1 %1453 }
0x10d5   :  { %5010 = vpow2.f32 %v1457_v4  ;;  %v1456_v6 = vsub.f32 %v1448_v62, %v1454_v5 }
0x10d7   :  { %v1459_v31 = vmul.f32 1.442695, %v1456_v6 }
0x10d8   :  { %v1522_v7 = vpop.permute.xlu1 %1521 }
0x10d9   :  { %5012 = vpow2.f32 %v1459_v31  ;;  %v1527_v32 = vsel %vm352_vm4, %v1522_v7, 0 }
0x10da   :  { %4668 = vmatpush3.bf16.msra.mxu0 %v1527_v32 }
0x10db   :  { %4679 = vmatprep.subr.bf16.mxu0 %v5116_v15 }
0x10e2   :  { %v5011_v63 = vpop.eup %5010 }
0x10e3   :  { %v1461_v8 = vsel %vm322_vm3, %v5011_v63, 0.0 }
0x10e4   :  { %1462 = vadd.xlane.f32.xlu0 %v1461_v8  ;;  %v4213_v8 = vld [vmem:[%s6083_s8 + $0x1] ss:$0 sm:$0xff] }
0x10e6   :  { %v5013_v9 = vpop.eup %5012 }
0x10e7   :  { %v1464_v48 = vsel %vm322_vm3, %v5013_v9, 0.0 }
0x10e8   :  { %1465 = vadd.xlane.f32.xlu0 %v1464_v48 }
0x10fe   :  { %1473 = vrot.lane.b32.xlu0 %v5469_v44, %s6124_s0  ;;  %v4934_v44 = vld [vmem:[%s6081_s6 + $0x10] sm:$0xff]  }
0x116d   :  { %v1463_v10 = vpop.xlane.xlu0 %1462 }
0x116e   :  { %5014 = vrcp.f32 %v1463_v10 }
0x1171   :  { %v1466_v11 = vpop.xlane.xlu0 %1465 }
0x1172   :  { %5016 = vrcp.f32 %v1466_v11  ;;  %v4214_v11 = vld [vmem:[%s6084_s9 + $0x1] ss:$0 sm:$0xff] }
0x1175   :  { %v1474_v12 = vpop.permute.xlu0 %1473 }
0x1176   :  { %v1479_v13 = vsel %vm352_vm4, %v1474_v12, 0 }
0x1177   :  { %4662 = vmatpush3.bf16.msra.mxu1 %v1479_v13 }
0x1178   :  { %4673 = vmatprep.subr.bf16.mxu1 %v5116_v15 }
0x117b   :  { %v5015_v14 = vpop.eup %5014 }
0x117c   :  { %v1469_v16 = vmul.f32 %v5015_v14, %v5011_v63 }
0x117e   :  { %v1471_v17 = vpack.c.bf16 %v1469_v16, %v1469_v16 }
0x117f   :  { %v5017_v42 = vpop.eup %5016 }
0x1180   :  { %4664 = vmatmul.mubr.msk.bf16.vlgmr.msra.gmra.mxu1 %vm322_vm3, %v1471_v17  ;;  %v1470_v18 = vmul.f32 %v5017_v42, %v5013_v9  ;;  %v4938_v17 = vld [vmem:[%s6087_s12 + $0x38] sm:$0xff]   ;;  %v4939_v42 = vld [vmem:[%s6087_s12 + $0x30] sm:$0xff]  }
0x1181   :  { %4675 = vmatprep.mubr.msk.bf16.mxu1 %vm5117_vm1, %v5116_v15  ;;  %4674 = vmatpush3.bf16.msra.mxu1 %v4935_v20 }
0x1182   :  { %v1472_v19 = vpack.c.bf16 %v1470_v18, %v1470_v18  ;;  %4685 = vmatprep.subr.bf16.mxu1 %v5116_v15  ;;  %v4940_v18 = vld [vmem:[%s6087_s12 + $0x28] sm:$0xff]  }
0x1184   :  { %4670 = vmatmul.mubr.msk.bf16.vlgmr.msra.gmra.mxu0 %vm322_vm3, %v1472_v19  ;;  %v4220_v19 = vld [vmem:[%s6086_s11 + $0x1] ss:$0 sm:$0xff] }
0x1185   :  { %4680 = vmatpush3.bf16.msra.mxu0 %v4934_v44  ;;  %4681 = vmatprep.mubr.msk.bf16.mxu0 %vm5117_vm1, %v5116_v15  ;;  %v4941_v44 = vld [vmem:[%s6087_s12 + $0x20] sm:$0xff]  }
0x1186   :  { %4693 = vmatprep.subr.bf16.mxu0 %v5116_v15 }
0x118c   :  { %4682 = vmatmul.mubr.msk.bf16.vlgmr.msra.gmra.mxu0 %vm189_vm2, %v1341_v41 }
0x118d   :  { %4701 = vmatprep.mubr.msk.bf16.mxu0 %vm5117_vm1, %v5116_v15  ;;  %4694 = vmatpush3.bf16.msra.mxu0 %v4938_v17 }
0x118e   :  { %4695 = vmatprep.subr.bf16.mxu0 %v5116_v15 }
0x1191   :  { %4696 = vmatpush3.bf16.msra.mxu0 %v4939_v42 }
0x1192   :  { %4697 = vmatprep.subr.bf16.mxu0 %v5116_v15 }
0x1195   :  { %4698 = vmatpush3.bf16.msra.mxu0 %v4940_v18 }
0x1196   :  { %4699 = vmatprep.subr.bf16.mxu0 %v5116_v15 }
0x1199   :  { %4700 = vmatpush3.bf16.msra.mxu0 %v4941_v44 }
0x119a   :  { %4721 = vmatprep.subr.bf16.mxu0 %v5116_v15 }
0x1240   :  { %v1515_v21 = vpop.f32.mrf.mxu1 }
0x1242   :  { %v4665_v22 = vpop.f32.mrf.mxu1 }
0x1244   :  { %v1518_v23 = vpop.f32.mrf.mxu1  ;;  %v1563_v24 = vpop.f32.mrf.mxu0 }
0x1245   :  { %v1569_v25 = vpack.c.bf16 %v1563_v24, %v1515_v21 }
0x1246   :  { %v4666_v26 = vpop.f32.mrf.mxu1  ;;  %v4671_v38 = vpop.f32.mrf.mxu0 }
0x1247   :  { %4676 = vmatmul.mubr.msk.bf16.vlgmr.msra.gmra.mxu1 %vm189_vm2, %v1569_v25 }
0x1248   :  { %v1566_v27 = vpop.f32.mrf.mxu0  ;;  %4689 = vmatprep.mubr.msk.bf16.mxu1 %vm5117_vm1, %v5116_v15 }
0x124a   :  { %v4672_v28 = vpop.f32.mrf.mxu0 }
0x124c   :  { %v1666_v29 = vpop.f32.mrf.mxu0 }
0x124e   :  { %v4683_v30 = vpop.f32.mrf.mxu0 }
0x1250   :  { %v1669_v33 = vpop.f32.mrf.mxu0 }
0x1252   :  { %v4684_v34 = vpop.f32.mrf.mxu0 }
0x1307   :  { %v1616_v37 = vpop.f32.mrf.mxu1 }
0x1308   :  { %v1667_v40 = vadd.f32 %v1666_v29, %v1616_v37 }
0x1309   :  { %v4677_v41 = vpop.f32.mrf.mxu1 }
0x130a   :  { %v1681_v43 = vadd.f32 %v4210_v39, %v1667_v40 }
0x130b   :  { %v1619_v45 = vpop.f32.mrf.mxu1 }
0x130c   :  { %v1670_v46 = vadd.f32 %v1669_v33, %v1619_v45  ;;  %v1683_v47 = vadd.f32 %v1681_v43, %v5457_v35 }
0x130d   :  { %v4678_v49 = vpop.f32.mrf.mxu1 }
0x130e   :  { %v1682_v50 = vadd.f32 %v4210_v39, %v1670_v46  ;;  %v1689_v51 = vsel %vm72_vm0, %v1683_v47, 0.0 }
0x130f   :  { %1690 = vadd.xlane.f32.xlu1 %v1689_v51 }
0x1310   :  { %v1684_v53 = vadd.f32 %v1682_v50, %v5459_v36  ;;  %v4936_v36 = vld [vmem:[%s6085_s10 + $0x18] sm:$0xff]  }
0x1311   :  { %4686 = vmatpush3.bf16.msra.mxu1 %v4936_v36  ;;  %v4248_v36 = vld [vmem:[%s6117_s23 + $0x10] sm:$0xff] }
0x1312   :  { %v1692_v54 = vsel %vm72_vm0, %v1684_v53, 0.0  ;;  %4687 = vmatprep.subr.bf16.mxu1 %v5116_v15 }
0x1313   :  { %1693 = vadd.xlane.f32.xlu0 %v1692_v54 }
0x1315   :  { %4688 = vmatpush3.bf16.msra.mxu1 %v4937_v3 }
0x1316   :  { %4705 = vmatprep.subr.bf16.mxu1 %v5116_v15 }
0x1398   :  { %v1691_v56 = vpop.xlane.xlu1 %1690 }
0x1399   :  { %v1695_v58 = vmul.f32 0.03125, %v1691_v56 }
0x139b   :  { %v1697_v59 = vsub.f32 %v1683_v47, %v1695_v58 }
0x139c   :  { %v1694_v60 = vpop.xlane.xlu0 %1693 }
0x139d   :  { %v1696_v61 = vmul.f32 0.03125, %v1694_v60  ;;  %v1699_v62 = vmul.f32 %v1697_v59, %v1697_v59 }
0x139f   :  { %v1698_v0 = vsub.f32 %v1684_v53, %v1696_v61  ;;  %v1701_v1 = vsel %vm72_vm0, %v1699_v62, 0.0  ;;  %v4233_v53 = vld [vmem:[%s6088_s13 + $0x1] ss:$0 sm:$0xff]  ;;  %v4249_v61 = vld [vmem:[%s6117_s23 + $0x18] sm:$0xff] }
0x13a0   :  { %1702 = vadd.xlane.f32.xlu0 %v1701_v1 }
0x13a1   :  { %v1700_v35 = vmul.f32 %v1698_v0, %v1698_v0 }
0x13a3   :  { %v1704_v2 = vsel %vm72_vm0, %v1700_v35, 0.0  ;;  %v2047_v35 = vsel %vm72_vm0, %v4249_v61, 0.0 }
0x13a4   :  { %1705 = vadd.xlane.f32.xlu1 %v1704_v2 }
0x1429   :  { %v1703_v57 = vpop.xlane.xlu0 %1702 }
0x142a   :  { %v1707_v4 = vmul.f32 0.03125, %v1703_v57  ;;  %v2044_v57 = vsel %vm72_vm0, %v4248_v36, 0.0 }
0x142c   :  { %v1709_v5 = vadd.f32 1e-12, %v1707_v4 }
0x142d   :  { %v1706_v6 = vpop.xlane.xlu1 %1705 }
0x142e   :  { %5018 = vrsqrt.f32 %v1709_v5  ;;  %v1708_v31 = vmul.f32 0.03125, %v1706_v6 }
0x1430   :  { %v1710_v7 = vadd.f32 1e-12, %v1708_v31 }
0x1432   :  { %5020 = vrsqrt.f32 %v1710_v7 }
0x143b   :  { %v5019_v32 = vpop.eup %5018 }
0x143c   :  { %v1713_v63 = vmul.f32 %v5019_v32, %v1697_v59 }
0x143e   :  { %v1721_v10 = vmul.f32 %v4213_v8, %v1713_v63 }
0x143f   :  { %v5021_v9 = vpop.eup %5020 }
0x1440   :  { %v1714_v48 = vmul.f32 %v5021_v9, %v1698_v0  ;;  %v1729_v13 = vadd.f32 %v4214_v11, %v1721_v10 }
0x1442   :  { %v1722_v12 = vmul.f32 %v4213_v8, %v1714_v48 }
0x1444   :  { %v1730_v14 = vadd.f32 %v4214_v11, %v1722_v12 }
0x1446   :  { %v1731_v16 = vpack.c.bf16 %v1730_v14, %v1729_v13 }
0x1448   :  { %4690 = vmatmul.mubr.msk.bf16.vlgmr.msra.gmra.mxu1 %vm72_vm0, %v1731_v16 }
0x1449   :  { %4709 = vmatprep.mubr.msk.bf16.mxu1 %vm5117_vm1, %v5116_v15 }
0x1508   :  { %v1794_v20 = vpop.f32.mrf.mxu1 }
0x1509   :  { %v1795_v21 = vadd.f32 %v4220_v19, %v1794_v20  ;;  %v4943_v20 = vld [vmem:[%s6091_s16] sm:$0xff]  }
0x150a   :  { %v4691_v22 = vpop.f32.mrf.mxu1 }
0x150b   :  { %v1803_v23 = vmul.f32 0.044715, %v1795_v21  ;;  %v1801_v45 = vmul.f32 0.5, %v1795_v21 }
0x150c   :  { %v1797_v24 = vpop.f32.mrf.mxu1 }
0x150d   :  { %v1805_v25 = vmul.f32 %v1803_v23, %v1795_v21  ;;  %v1798_v26 = vadd.f32 %v4220_v19, %v1797_v24  ;;  %v4942_v19 = vld [vmem:[%s6091_s16 + $0x8] sm:$0xff]  }
0x150e   :  { %v4692_v38 = vpop.f32.mrf.mxu1  ;;  %4706 = vmatpush3.bf16.msra.mxu1 %v4942_v19  ;;  %v4265_v19 = vld.sshfl [vmem:[%s6121_s27 + $0x2] sm:$0x11 pattern:$0x75316420]  ;;  %s6126_s27 = smov 64  }
0x150f   :  { %v1807_v27 = vmul.f32 %v1805_v25, %v1795_v21  ;;  %v1804_v28 = vmul.f32 0.044715, %v1798_v26  ;;  %v1802_v46 = vmul.f32 0.5, %v1798_v26  ;;  %4707 = vmatprep.subr.bf16.mxu1 %v5116_v15 }
0x1511   :  { %v1809_v29 = vadd.f32 %v1807_v27, %v1795_v21  ;;  %v1806_v30 = vmul.f32 %v1804_v28, %v1798_v26 }
0x1512   :  { %4708 = vmatpush3.bf16.msra.mxu1 %v4943_v20  ;;  %v2273_v20 = vrot.slane %v4265_v19, %v5292_v52 }
0x1513   :  { %v1811_v33 = vmul.f32 0.7978846, %v1809_v29  ;;  %v1808_v34 = vmul.f32 %v1806_v30, %v1798_v26  ;;  %4713 = vmatprep.subr.bf16.mxu1 %v5116_v15 }
0x1515   :  { %5022 = vtanh.f32 %v1811_v33  ;;  %v1810_v37 = vadd.f32 %v1808_v34, %v1798_v26 }
0x1517   :  { %v1812_v39 = vmul.f32 0.7978846, %v1810_v37  ;;  %v4241_v37 = vld [vmem:[%s6089_s14 + $0x1] ss:$0 sm:$0xff] }
0x1519   :  { %5024 = vtanh.f32 %v1812_v39 }
0x1522   :  { %v5023_v40 = vpop.eup %5022 }
0x1523   :  { %v1815_v41 = vadd.f32 1.0, %v5023_v40 }
0x1525   :  { %v1817_v49 = vmul.f32 %v1815_v41, %v1801_v45 }
0x1526   :  { %v5025_v43 = vpop.eup %5024 }
0x1527   :  { %v1816_v47 = vadd.f32 1.0, %v5025_v43  ;;  %v4242_v43 = vld [vmem:[%s6090_s15 + $0x1] ss:$0 sm:$0xff] }
0x1529   :  { %v1818_v50 = vmul.f32 %v1816_v47, %v1802_v46 }
0x152b   :  { %v1819_v51 = vpack.c.bf16 %v1818_v50, %v1817_v49 }
0x152d   :  { %4702 = vmatmul.mubr.msk.bf16.vlgmr.msra.gmra.mxu0 %vm956_vm5, %v1819_v51 }
0x152e   :  { %4723 = vmatprep.mubr.msk.bf16.mxu0 %vm5117_vm1, %v5116_v15 }
0x15ed   :  { %v1898_v54 = vpop.f32.mrf.mxu0 }
0x15ee   :  { %v1899_v56 = vadd.f32 %v4233_v53, %v1898_v54 }
0x15ef   :  { %v4703_v58 = vpop.f32.mrf.mxu0 }
0x15f0   :  { %v1905_v59 = vadd.f32 %v1899_v56, %v1729_v13 }
0x15f1   :  { %v1901_v60 = vpop.f32.mrf.mxu0 }
0x15f2   :  { %v1902_v62 = vadd.f32 %v4233_v53, %v1901_v60  ;;  %v1911_v0 = vsel %vm72_vm0, %v1905_v59, 0.0 }
0x15f3   :  { %1912 = vadd.xlane.f32.xlu1 %v1911_v0  ;;  %v4704_v1 = vpop.f32.mrf.mxu0  ;;  %v4944_v0 = vld [vmem:[%s6118_s26 + $0x28] sm:$0xff]  }
0x15f4   :  { %v1906_v2 = vadd.f32 %v1902_v62, %v1730_v14  ;;  %v4252_v1 = vld [vmem:[%s6119_s30 + $0x1] ss:$0 sm:$0xff] }
0x15f6   :  { %v1914_v3 = vsel %vm72_vm0, %v1906_v2, 0.0 }
0x15f7   :  { %2048 = vadd.xlane.f32.xlu1 %v2047_v35  ;;  %1915 = vadd.xlane.f32.xlu0 %v1914_v3  ;;  %v4945_v3 = vld [vmem:[%s6118_s26 + $0x20] sm:$0xff]  }
0x15fb   :  { %2045 = vadd.xlane.f32.xlu0 %v2044_v57  ;;  %v4253_v57 = vld [vmem:[%s6120_s1 + $0x1] ss:$0 sm:$0xff] }
0x167c   :  { %v1913_v4 = vpop.xlane.xlu1 %1912 }
0x167d   :  { %v1917_v5 = vmul.f32 0.03125, %v1913_v4 }
0x167f   :  { %v1919_v6 = vsub.f32 %v1905_v59, %v1917_v5 }
0x1680   :  { %v2049_v31 = vpop.xlane.xlu1 %2048  ;;  %v1916_v7 = vpop.xlane.xlu0 %1915 }
0x1681   :  { %v2051_v32 = vmul.f32 0.03125, %v2049_v31  ;;  %v1918_v63 = vmul.f32 0.03125, %v1916_v7  ;;  %v1921_v8 = vmul.f32 %v1919_v6, %v1919_v6 }
0x1683   :  { %v2053_v9 = vsub.f32 %v4249_v61, %v2051_v32  ;;  %v1920_v48 = vsub.f32 %v1906_v2, %v1918_v63  ;;  %v1923_v10 = vsel %vm72_vm0, %v1921_v8, 0.0  ;;  %v4259_v8 = vld [vmem:[%s6080_s5 + $0x2] ss:$0 sm:$0xff] }
0x1684   :  { %1924 = vadd.xlane.f32.xlu1 %v1923_v10  ;;  %v2046_v11 = vpop.xlane.xlu0 %2045 }
0x1685   :  { %v2050_v12 = vmul.f32 0.03125, %v2046_v11  ;;  %v2055_v13 = vmul.f32 %v2053_v9, %v2053_v9  ;;  %v1922_v14 = vmul.f32 %v1920_v48, %v1920_v48 }
0x1687   :  { %v2052_v16 = vsub.f32 %v4248_v36, %v2050_v12  ;;  %v2059_v17 = vsel %vm72_vm0, %v2055_v13, 0.0  ;;  %v1926_v42 = vsel %vm72_vm0, %v1922_v14, 0.0 }
0x1688   :  { %2060 = vadd.xlane.f32.xlu1 %v2059_v17  ;;  %1927 = vadd.xlane.f32.xlu0 %v1926_v42 }
0x1689   :  { %v2054_v18 = vmul.f32 %v2052_v16, %v2052_v16 }
0x168b   :  { %v2056_v44 = vsel %vm72_vm0, %v2054_v18, 0.0 }
0x168c   :  { %2057 = vadd.xlane.f32.xlu0 %v2056_v44 }
0x170d   :  { %v1925_v21 = vpop.xlane.xlu1 %1924 }
0x170e   :  { %v1929_v22 = vmul.f32 0.03125, %v1925_v21  ;;  %v2266_v21 = vcombine.high %v4265_v19, %v4265_v19 }
0x1710   :  { %v1931_v23 = vadd.f32 1e-12, %v1929_v22  ;;  %v5703_v22 = vrot.slane %v2273_v20, %v5298_v55 }
0x1711   :  { %v1928_v24 = vpop.xlane.xlu0 %1927  ;;  %v2061_v38 = vpop.xlane.xlu1 %2060 }
0x1712   :  { %5026 = vrsqrt.f32 %v1931_v23  ;;  %v1930_v25 = vmul.f32 0.03125, %v1928_v24  ;;  %v2063_v29 = vmul.f32 0.03125, %v2061_v38  ;;  %v2280_v23 = vrot.slane %v2266_v21, %v5292_v52 }
0x1714   :  { %v1932_v26 = vadd.f32 1e-12, %v1930_v25  ;;  %v2065_v33 = vadd.f32 1e-12, %v2063_v29 }
0x1715   :  { %v2058_v27 = vpop.xlane.xlu0 %2057 }
0x1716   :  { %v2062_v28 = vmul.f32 0.03125, %v2058_v27  ;;  %5028 = vrsqrt.f32 %v1932_v26  ;;  %v5708_v27 = vrot.slane %v2280_v23, %v5298_v55 }
0x1718   :  { %v2064_v30 = vadd.f32 1e-12, %v2062_v28 }
0x171a   :  { %5030 = vrsqrt.f32 %v2064_v30 }
0x171b   :  { %5032 = vrsqrt.f32 %v2065_v33 }
0x171f   :  { %v5027_v34 = vpop.eup %5026 }
0x1720   :  { %v1935_v39 = vmul.f32 %v5027_v34, %v1919_v6 }
0x1722   :  { %v1943_v40 = vmul.f32 %v4241_v37, %v1935_v39 }
0x1723   :  { %v5029_v41 = vpop.eup %5028 }
0x1724   :  { %v1936_v45 = vmul.f32 %v5029_v41, %v1920_v48  ;;  %v1951_v47 = vadd.f32 %v4242_v43, %v1943_v40 }
0x1726   :  { %v1944_v46 = vmul.f32 %v4241_v37, %v1936_v45  ;;  %v1953_v51 = vpack.c.bf16 %v1951_v47, %v1951_v47 }
0x1727   :  { %v5031_v50 = vpop.eup %5030 }
0x1728   :  { %v1952_v49 = vadd.f32 %v4242_v43, %v1944_v46  ;;  %v5033_v54 = vpop.eup %5032  ;;  %v2068_v58 = vmul.f32 %v5031_v50, %v2052_v16  ;;  %v1968_v59 = vunpack.c.l.b16 %v1953_v51 }
0x1729   :  { %v2069_v61 = vmul.f32 %v5033_v54, %v2053_v9 }
0x172a   :  { %v1954_v53 = vpack.c.bf16 %v1952_v49, %v1952_v49  ;;  %v2076_v2 = vmul.f32 %v4252_v1, %v2068_v58 }
0x172b   :  { %v2077_v36 = vmul.f32 %v4252_v1, %v2069_v61 }
0x172c   :  { %v1969_v56 = vunpack.c.l.b16 %v1954_v53  ;;  %v5663_v4 = vadd.f32 %v4253_v57, %v2076_v2 }
0x172d   :  { %v5665_v5 = vadd.f32 %v4253_v57, %v2077_v36 }
0x172e   :  { %v1970_v60 = vrot.slane %v1969_v56, 7 }
0x172f   :  { %v2086_v6 = vpack.c.bf16 %v5665_v5, %v5663_v4 }
0x1730   :  { %v1972_v62 = vsel %vm1971_vm6, %v1970_v60, %v1968_v59 }
0x1731   :  { %v1973_v35 = vpack.c.b16 %v1972_v62, %v1972_v62 }
0x1733   :  { %4710 = vmatmul.mubr.msk.bf16.vlgmr.msra.gmra.mxu1 %vm72_vm0, %v1973_v35 }
0x1734   :  { %4714 = vmatpush3.bf16.msra.mxu1 %v4944_v0  ;;  %4717 = vmatprep.mubr.msk.bf16.mxu1 %vm5117_vm1, %v5116_v15 }
0x1735   :  { %4715 = vmatprep.subr.bf16.mxu1 %v5116_v15 }
0x1738   :  { %4716 = vmatpush3.bf16.msra.mxu1 %v4945_v3 }
0x1739   :  { %4727 = vmatprep.subr.bf16.mxu1 %v5116_v15 }
0x173b   :  { %4718 = vmatmul.mubr.msk.bf16.vlgmr.msra.gmra.mxu1 %vm72_vm0, %v2086_v6 }
0x173c   :  { %4729 = vmatprep.mubr.msk.bf16.mxu1 %vm5117_vm1, %v5116_v15 }
0x17f3   :  { %v5673_v31 = vpop.f32.mrf.mxu1 }
0x17f5   :  { %v4711_v7 = vpop.f32.mrf.mxu1 }
0x17f7   :  { %v2026_v32 = vpop.f32.mrf.mxu1 }
0x17f9   :  { %v4712_v63 = vpop.f32.mrf.mxu1 }
0x17fb   :  { %v2149_v9 = vpop.f32.mrf.mxu1 }
0x17fc   :  { %v2150_v48 = vadd.f32 %v4259_v8, %v2149_v9 }
0x17fd   :  { %v4719_v10 = vpop.f32.mrf.mxu1 }
0x17fe   :  { %v5678_v11 = vpack.c.bf16 %v2150_v48, %v2150_v48 }
0x17ff   :  { %v2152_v12 = vpop.f32.mrf.mxu1 }
0x1800   :  { %v2153_v13 = vadd.f32 %v4259_v8, %v2152_v12  ;;  %2159 = vrot.lane.b32.xlu0 %v5678_v11, %s6125_s29 }
0x1801   :  { %v4720_v14 = vpop.f32.mrf.mxu1 }
0x1802   :  { %v5682_v16 = vpack.c.bf16 %v2153_v13, %v2153_v13 }
0x1804   :  { %2208 = vrot.lane.b32.xlu1 %v5682_v16, %s6125_s29 }
0x1872   :  { %v2160_v17 = vpop.permute.xlu0 %2159 }
0x1873   :  { %v2165_v42 = vsel %vm189_vm2, %v2160_v17, 0 }
0x1874   :  { %4722 = vmatpush3.bf16.xpose.msra.mxu0 %v2165_v42 }
0x1875   :  { %4733 = vmatprep.subr.bf16.mxu0 %v5116_v15 }
0x1876   :  { %v2209_v18 = vpop.permute.xlu1 %2208 }
0x1877   :  { %v2214_v44 = vsel %vm189_vm2, %v2209_v18, 0 }
0x1878   :  { %4728 = vmatpush3.bf16.xpose.msra.mxu1 %v2214_v44 }
0x1879   :  { %4739 = vmatprep.subr.bf16.mxu1 %v5116_v15 }
0x187b   :  { %4724 = vmatmul.mubr.msk.bf16.vlgmr.msra.gmra.mxu0 %vm189_vm2, %v5678_v11 }
0x187c   :  { %4735 = vmatprep.mubr.msk.bf16.mxu0 %vm5117_vm1, %v5116_v15 }
0x187f   :  { %4730 = vmatmul.mubr.msk.bf16.vlgmr.msra.gmra.mxu1 %vm189_vm2, %v5682_v16 }
0x1880   :  { %4741 = vmatprep.mubr.msk.bf16.mxu1 %vm5117_vm1, %v5116_v15 }
0x193b   :  { %v2201_v24 = vpop.f32.mrf.mxu0 }
0x193c   :  { %v2256_v25 = vmul.f32 0.25, %v2201_v24 }
0x193d   :  { %v4725_v26 = vpop.f32.mrf.mxu0 }
0x193e   :  { %v2291_v38 = vadd.f32 %v5703_v22, %v2256_v25 }
0x193f   :  { %v2204_v28 = vpop.f32.mrf.mxu0  ;;  %v2250_v29 = vpop.f32.mrf.mxu1 }
0x1940   :  { %v2257_v30 = vmul.f32 0.25, %v2250_v29  ;;  %v2293_v33 = vsel %vm322_vm3, %v2291_v38, -inf }
0x1941   :  { %v4726_v34 = vpop.f32.mrf.mxu0  ;;  %2294 = vmax.xlane.f32.xlu1 %v2293_v33  ;;  %v4731_v37 = vpop.f32.mrf.mxu1 }
0x1942   :  { %v2292_v39 = vadd.f32 %v5708_v27, %v2257_v30 }
0x1943   :  { %v2253_v40 = vpop.f32.mrf.mxu1 }
0x1944   :  { %v2296_v52 = vsel %vm322_vm3, %v2292_v39, -inf }
0x1945   :  { %2297 = vmax.xlane.f32.xlu0 %v2296_v52  ;;  %v4732_v41 = vpop.f32.mrf.mxu1 }
0x1952   :  { %2365 = vrot.lane.b32.xlu1 %v5682_v16, %s6126_s27 }
0x1956   :  { %2419 = vrot.lane.b32.xlu1 %v5678_v11, %s6122_s24 }
0x19ca   :  { %v2295_v55 = vpop.xlane.xlu1 %2294 }
0x19cb   :  { %v2299_v43 = vsub.f32 %v2291_v38, %v2295_v55 }
0x19cd   :  { %v2301_v45 = vmul.f32 1.442695, %v2299_v43 }
0x19ce   :  { %v2366_v46 = vpop.permute.xlu1 %2365  ;;  %v2298_v47 = vpop.xlane.xlu0 %2297 }
0x19cf   :  { %5034 = vpow2.f32 %v2301_v45  ;;  %v2371_v49 = vsel %vm352_vm4, %v2366_v46, 0  ;;  %v2300_v50 = vsub.f32 %v2292_v39, %v2298_v47 }
0x19d0   :  { %4740 = vmatpush3.bf16.msra.mxu1 %v2371_v49 }
0x19d1   :  { %v2303_v51 = vmul.f32 1.442695, %v2300_v50  ;;  %4751 = vmatprep.subr.bf16.mxu1 %v5116_v15 }
0x19d2   :  { %v2420_v59 = vpop.permute.xlu1 %2419 }
0x19d3   :  { %5036 = vpow2.f32 %v2303_v51  ;;  %v2425_v3 = vsel %vm189_vm2, %v2420_v59, 0 }
0x19dc   :  { %v5035_v53 = vpop.eup %5034 }
0x19dd   :  { %v2305_v54 = vsel %vm322_vm3, %v5035_v53, 0.0 }
0x19de   :  { %2306 = vadd.xlane.f32.xlu0 %v2305_v54 }
0x19e0   :  { %v5037_v56 = vpop.eup %5036 }
0x19e1   :  { %v2308_v58 = vsel %vm322_vm3, %v5037_v56, 0.0 }
0x19e2   :  { %2309 = vadd.xlane.f32.xlu1 %v2308_v58 }
0x19f3   :  { %2469 = vrot.lane.b32.xlu1 %v5682_v16, %s6122_s24 }
0x19f4   :  { %2317 = vrot.lane.b32.xlu0 %v5678_v11, %s6126_s27 }
0x19f7   :  { %2467 = vrot.lane.b32.xlu1 %v5682_v16, %s6123_s25 }
0x19f8   :  { %2417 = vrot.lane.b32.xlu0 %v5678_v11, %s6123_s25 }
0x1a67   :  { %v2307_v60 = vpop.xlane.xlu0 %2306 }
0x1a68   :  { %5038 = vrcp.f32 %v2307_v60 }
0x1a6b   :  { %v2310_v61 = vpop.xlane.xlu1 %2309  ;;  %v2318_v62 = vpop.permute.xlu0 %2317 }
0x1a6c   :  { %5040 = vrcp.f32 %v2310_v61  ;;  %v2323_v0 = vsel %vm352_vm4, %v2318_v62, 0 }
0x1a6d   :  { %4734 = vmatpush3.bf16.msra.mxu0 %v2323_v0  ;;  %v4947_v0 = vld [vmem:[%s6081_s6 + $0x28] sm:$0xff]  }
0x1a6e   :  { %4745 = vmatprep.subr.bf16.mxu0 %v5116_v15 }
0x1a6f   :  { %v2470_v6 = vpop.permute.xlu1 %2469  ;;  %v2418_v63 = vpop.permute.xlu0 %2417 }
0x1a70   :  { %v2475_v32 = vsel %vm189_vm2, %v2470_v6, 0 }
0x1a73   :  { %v2468_v8 = vpop.permute.xlu1 %2467 }
0x1a75   :  { %v5039_v1 = vpop.eup %5038 }
0x1a76   :  { %v2313_v35 = vmul.f32 %v5039_v1, %v5035_v53 }
0x1a78   :  { %v2315_v2 = vpack.c.bf16 %v2313_v35, %v2313_v35 }
0x1a79   :  { %v5041_v36 = vpop.eup %5040 }
0x1a7a   :  { %4736 = vmatmul.mubr.msk.bf16.vlgmr.msra.gmra.mxu0 %vm322_vm3, %v2315_v2  ;;  %v2314_v57 = vmul.f32 %v5041_v36, %v5037_v56 }
0x1a7b   :  { %4746 = vmatpush3.bf16.xpose.msra.mxu0 %v2425_v3  ;;  %4747 = vmatprep.mubr.msk.bf16.mxu0 %vm5117_vm1, %v5116_v15 }
0x1a7c   :  { %v2316_v7 = vpack.c.bf16 %v2314_v57, %v2314_v57  ;;  %4757 = vmatprep.subr.bf16.mxu0 %v5116_v15 }
0x1a7e   :  { %4742 = vmatmul.mubr.msk.bf16.vlgmr.msra.gmra.mxu1 %vm322_vm3, %v2316_v7 }
0x1a7f   :  { %4752 = vmatpush3.bf16.xpose.msra.mxu1 %v2475_v32  ;;  %4753 = vmatprep.mubr.msk.bf16.mxu1 %vm5117_vm1, %v5116_v15 }
0x1a80   :  { %4763 = vmatprep.subr.bf16.mxu1 %v5116_v15 }
0x1a82   :  { %4748 = vmatmul.mubr.msk.bf16.vlgmr.msra.gmra.mxu0 %vm189_vm2, %v2418_v63 }
0x1a83   :  { %4759 = vmatprep.mubr.msk.bf16.mxu0 %vm5117_vm1, %v5116_v15 }
0x1a86   :  { %4754 = vmatmul.mubr.msk.bf16.vlgmr.msra.gmra.mxu1 %vm189_vm2, %v2468_v8 }
0x1a87   :  { %4765 = vmatprep.mubr.msk.bf16.mxu1 %vm5117_vm1, %v5116_v15 }
0x1b3a   :  { %v5747_v9 = vpop.f32.mrf.mxu0 }
0x1b3c   :  { %v4737_v48 = vpop.f32.mrf.mxu0 }
0x1b3e   :  { %v2362_v10 = vpop.f32.mrf.mxu0  ;;  %v5749_v12 = vpop.f32.mrf.mxu1 }
0x1b3f   :  { %v2413_v13 = vpack.c.bf16 %v5749_v12, %v5747_v9  ;;  %v4281_v12 = vld [vmem:[%s6082_s7 + $0x2] ss:$0 sm:$0xff] }
0x1b40   :  { %v4738_v14 = vpop.f32.mrf.mxu0  ;;  %v4743_v17 = vpop.f32.mrf.mxu1 }
0x1b42   :  { %v2410_v42 = vpop.f32.mrf.mxu1  ;;  %v2461_v18 = vpop.f32.mrf.mxu0 }
0x1b43   :  { %v2517_v44 = vmul.f32 0.25, %v2461_v18 }
0x1b44   :  { %v4744_v19 = vpop.f32.mrf.mxu1  ;;  %v4749_v20 = vpop.f32.mrf.mxu0 }
0x1b45   :  { %v2519_v21 = vadd.f32 %v2517_v44, %v5703_v22 }
0x1b46   :  { %v2464_v23 = vpop.f32.mrf.mxu0  ;;  %v2511_v24 = vpop.f32.mrf.mxu1 }
0x1b47   :  { %v2518_v25 = vmul.f32 0.25, %v2511_v24  ;;  %v2521_v26 = vsel %vm322_vm3, %v2519_v21, -inf }
0x1b48   :  { %2522 = vmax.xlane.f32.xlu0 %v2521_v26  ;;  %v4750_v38 = vpop.f32.mrf.mxu0  ;;  %v4755_v28 = vpop.f32.mrf.mxu1 }
0x1b49   :  { %v2520_v29 = vadd.f32 %v2518_v25, %v5708_v27 }
0x1b4a   :  { %v2514_v30 = vpop.f32.mrf.mxu1 }
0x1b4b   :  { %v2524_v33 = vsel %vm322_vm3, %v2520_v29, -inf }
0x1b4c   :  { %2525 = vmax.xlane.f32.xlu1 %v2524_v33  ;;  %v4756_v34 = vpop.f32.mrf.mxu1 }
0x1b5d   :  { %2593 = vrot.lane.b32.xlu1 %v5682_v16, %s6124_s0 }
0x1bd1   :  { %v2523_v37 = vpop.xlane.xlu0 %2522 }
0x1bd2   :  { %v2527_v39 = vsub.f32 %v2519_v21, %v2523_v37 }
0x1bd4   :  { %v2529_v40 = vmul.f32 1.442695, %v2527_v39  ;;  %v4949_v39 = vld [vmem:[%s6085_s10 + $0x20] sm:$0xff]  }
0x1bd5   :  { %v2526_v52 = vpop.xlane.xlu1 %2525 }
0x1bd6   :  { %5042 = vpow2.f32 %v2529_v40  ;;  %v2528_v41 = vsub.f32 %v2520_v29, %v2526_v52 }
0x1bd8   :  { %v2531_v55 = vmul.f32 1.442695, %v2528_v41 }
0x1bd9   :  { %v2594_v43 = vpop.permute.xlu1 %2593 }
0x1bda   :  { %5044 = vpow2.f32 %v2531_v55  ;;  %v2599_v45 = vsel %vm352_vm4, %v2594_v43, 0 }
0x1bdb   :  { %4764 = vmatpush3.bf16.msra.mxu1 %v2599_v45 }
0x1bdc   :  { %4775 = vmatprep.subr.bf16.mxu1 %v5116_v15 }
0x1be3   :  { %v5043_v46 = vpop.eup %5042 }
0x1be4   :  { %v2533_v47 = vsel %vm322_vm3, %v5043_v46, 0.0 }
0x1be5   :  { %2534 = vadd.xlane.f32.xlu0 %v2533_v47 }
0x1be7   :  { %v5045_v49 = vpop.eup %5044 }
0x1be8   :  { %v2536_v16 = vsel %vm322_vm3, %v5045_v49, 0.0 }
0x1be9   :  { %2537 = vadd.xlane.f32.xlu0 %v2536_v16 }
0x1bff   :  { %2545 = vrot.lane.b32.xlu0 %v5678_v11, %s6124_s0  ;;  %v4946_v11 = vld [vmem:[%s6081_s6 + $0x20] sm:$0xff]  }
0x1c6e   :  { %v2535_v50 = vpop.xlane.xlu0 %2534 }
0x1c6f   :  { %5046 = vrcp.f32 %v2535_v50 }
0x1c72   :  { %v2538_v51 = vpop.xlane.xlu0 %2537 }
0x1c73   :  { %5048 = vrcp.f32 %v2538_v51 }
0x1c76   :  { %v2546_v53 = vpop.permute.xlu0 %2545 }
0x1c77   :  { %v2551_v54 = vsel %vm352_vm4, %v2546_v53, 0  ;;  %v4285_v53 = vld [vmem:[%s6084_s9 + $0x2] ss:$0 sm:$0xff] }
0x1c78   :  { %4758 = vmatpush3.bf16.msra.mxu0 %v2551_v54 }
0x1c79   :  { %4769 = vmatprep.subr.bf16.mxu0 %v5116_v15 }
0x1c7c   :  { %v5047_v56 = vpop.eup %5046 }
0x1c7d   :  { %v2541_v58 = vmul.f32 %v5047_v56, %v5043_v46 }
0x1c7f   :  { %v2543_v59 = vpack.c.bf16 %v2541_v58, %v2541_v58 }
0x1c80   :  { %v5049_v60 = vpop.eup %5048 }
0x1c81   :  { %4760 = vmatmul.mubr.msk.bf16.vlgmr.msra.gmra.mxu0 %vm322_vm3, %v2543_v59  ;;  %v2542_v61 = vmul.f32 %v5049_v60, %v5045_v49  ;;  %v4284_v49 = vld [vmem:[%s6083_s8 + $0x2] ss:$0 sm:$0xff]  ;;  %v4950_v60 = vld [vmem:[%s6087_s12 + $0x58] sm:$0xff]  }
0x1c82   :  { %4771 = vmatprep.mubr.msk.bf16.mxu0 %vm5117_vm1, %v5116_v15  ;;  %4770 = vmatpush3.bf16.msra.mxu0 %v4947_v0  ;;  %v4291_v0 = vld [vmem:[%s6086_s11 + $0x2] ss:$0 sm:$0xff] }
0x1c83   :  { %v2544_v62 = vpack.c.bf16 %v2542_v61, %v2542_v61  ;;  %4781 = vmatprep.subr.bf16.mxu0 %v5116_v15  ;;  %v4951_v61 = vld [vmem:[%s6087_s12 + $0x50] sm:$0xff]  }
0x1c85   :  { %4766 = vmatmul.mubr.msk.bf16.vlgmr.msra.gmra.mxu1 %vm322_vm3, %v2544_v62  ;;  %v4953_v62 = vld [vmem:[%s6087_s12 + $0x40] sm:$0xff]  }
0x1c86   :  { %4776 = vmatpush3.bf16.msra.mxu1 %v4946_v11  ;;  %4777 = vmatprep.mubr.msk.bf16.mxu1 %vm5117_vm1, %v5116_v15  ;;  %v4952_v11 = vld [vmem:[%s6087_s12 + $0x48] sm:$0xff]  }
0x1c87   :  { %4789 = vmatprep.subr.bf16.mxu1 %v5116_v15 }
0x1c8d   :  { %4778 = vmatmul.mubr.msk.bf16.vlgmr.msra.gmra.mxu1 %vm189_vm2, %v2413_v13 }
0x1c8e   :  { %4797 = vmatprep.mubr.msk.bf16.mxu1 %vm5117_vm1, %v5116_v15  ;;  %4790 = vmatpush3.bf16.msra.mxu1 %v4950_v60 }
0x1c8f   :  { %4791 = vmatprep.subr.bf16.mxu1 %v5116_v15 }
0x1c92   :  { %4792 = vmatpush3.bf16.msra.mxu1 %v4951_v61  ;;  %v4312_v61 = vld [vmem:[%s6089_s14 + $0x2] ss:$0 sm:$0xff] }
0x1c93   :  { %4793 = vmatprep.subr.bf16.mxu1 %v5116_v15 }
0x1c96   :  { %4794 = vmatpush3.bf16.msra.mxu1 %v4952_v11 }
0x1c97   :  { %4795 = vmatprep.subr.bf16.mxu1 %v5116_v15 }
0x1c9a   :  { %4796 = vmatpush3.bf16.msra.mxu1 %v4953_v62 }
0x1c9b   :  { %4815 = vmatprep.subr.bf16.mxu1 %v5116_v15 }
0x1d41   :  { %v2587_v1 = vpop.f32.mrf.mxu0 }
0x1d43   :  { %v4761_v35 = vpop.f32.mrf.mxu0 }
0x1d45   :  { %v2590_v2 = vpop.f32.mrf.mxu0  ;;  %v2635_v36 = vpop.f32.mrf.mxu1 }
0x1d46   :  { %v2641_v3 = vpack.c.bf16 %v2635_v36, %v2587_v1 }
0x1d47   :  { %v4762_v57 = vpop.f32.mrf.mxu0  ;;  %v4767_v6 = vpop.f32.mrf.mxu1 }
0x1d48   :  { %4772 = vmatmul.mubr.msk.bf16.vlgmr.msra.gmra.mxu0 %vm189_vm2, %v2641_v3 }
0x1d49   :  { %v2638_v7 = vpop.f32.mrf.mxu1  ;;  %4785 = vmatprep.mubr.msk.bf16.mxu0 %vm5117_vm1, %v5116_v15 }
0x1d4b   :  { %v4768_v32 = vpop.f32.mrf.mxu1 }
0x1d4d   :  { %v2738_v63 = vpop.f32.mrf.mxu1 }
0x1d4f   :  { %v4779_v8 = vpop.f32.mrf.mxu1 }
0x1d51   :  { %v2741_v9 = vpop.f32.mrf.mxu1 }
0x1d53   :  { %v4780_v48 = vpop.f32.mrf.mxu1 }
0x1e08   :  { %v2688_v10 = vpop.f32.mrf.mxu0 }
0x1e09   :  { %v2739_v13 = vadd.f32 %v2738_v63, %v2688_v10 }
0x1e0a   :  { %v4773_v14 = vpop.f32.mrf.mxu0 }
0x1e0b   :  { %v2753_v17 = vadd.f32 %v4281_v12, %v2739_v13 }
0x1e0c   :  { %v2691_v42 = vpop.f32.mrf.mxu0 }
0x1e0d   :  { %v2742_v18 = vadd.f32 %v2741_v9, %v2691_v42  ;;  %v2755_v44 = vadd.f32 %v2753_v17, %v5663_v4 }
0x1e0e   :  { %v4774_v19 = vpop.f32.mrf.mxu0 }
0x1e0f   :  { %v2754_v20 = vadd.f32 %v4281_v12, %v2742_v18  ;;  %v2761_v21 = vsel %vm72_vm0, %v2755_v44, 0.0 }
0x1e10   :  { %2762 = vadd.xlane.f32.xlu1 %v2761_v21 }
0x1e11   :  { %v2756_v23 = vadd.f32 %v2754_v20, %v5665_v5  ;;  %v4948_v5 = vld [vmem:[%s6085_s10 + $0x28] sm:$0xff]  }
0x1e12   :  { %4782 = vmatpush3.bf16.msra.mxu0 %v4948_v5 }
0x1e13   :  { %v2764_v24 = vsel %vm72_vm0, %v2756_v23, 0.0  ;;  %4783 = vmatprep.subr.bf16.mxu0 %v5116_v15 }
0x1e14   :  { %2765 = vadd.xlane.f32.xlu0 %v2764_v24  ;;  %v4304_v24 = vld [vmem:[%s6088_s13 + $0x2] ss:$0 sm:$0xff] }
0x1e16   :  { %4784 = vmatpush3.bf16.msra.mxu0 %v4949_v39 }
0x1e17   :  { %4801 = vmatprep.subr.bf16.mxu0 %v5116_v15 }
0x1e99   :  { %v2763_v25 = vpop.xlane.xlu1 %2762 }
0x1e9a   :  { %v2767_v26 = vmul.f32 0.03125, %v2763_v25 }
0x1e9c   :  { %v2769_v38 = vsub.f32 %v2755_v44, %v2767_v26 }
0x1e9d   :  { %v2766_v28 = vpop.xlane.xlu0 %2765 }
0x1e9e   :  { %v2768_v29 = vmul.f32 0.03125, %v2766_v28  ;;  %v2771_v30 = vmul.f32 %v2769_v38, %v2769_v38 }
0x1ea0   :  { %v2770_v33 = vsub.f32 %v2756_v23, %v2768_v29  ;;  %v2773_v34 = vsel %vm72_vm0, %v2771_v30, 0.0 }
0x1ea1   :  { %2774 = vadd.xlane.f32.xlu0 %v2773_v34 }
0x1ea2   :  { %v2772_v4 = vmul.f32 %v2770_v33, %v2770_v33 }
0x1ea4   :  { %v2776_v37 = vsel %vm72_vm0, %v2772_v4, 0.0 }
0x1ea5   :  { %2777 = vadd.xlane.f32.xlu1 %v2776_v37 }
0x1f2a   :  { %v2775_v40 = vpop.xlane.xlu0 %2774 }
0x1f2b   :  { %v2779_v52 = vmul.f32 0.03125, %v2775_v40 }
0x1f2d   :  { %v2781_v41 = vadd.f32 1e-12, %v2779_v52 }
0x1f2e   :  { %v2778_v55 = vpop.xlane.xlu1 %2777 }
0x1f2f   :  { %5050 = vrsqrt.f32 %v2781_v41  ;;  %v2780_v43 = vmul.f32 0.03125, %v2778_v55 }
0x1f31   :  { %v2782_v45 = vadd.f32 1e-12, %v2780_v43 }
0x1f33   :  { %5052 = vrsqrt.f32 %v2782_v45 }
0x1f3c   :  { %v5051_v46 = vpop.eup %5050 }
0x1f3d   :  { %v2785_v47 = vmul.f32 %v5051_v46, %v2769_v38 }
0x1f3f   :  { %v2793_v51 = vmul.f32 %v4284_v49, %v2785_v47 }
0x1f40   :  { %v5053_v16 = vpop.eup %5052 }
0x1f41   :  { %v2786_v50 = vmul.f32 %v5053_v16, %v2770_v33  ;;  %v2801_v56 = vadd.f32 %v4285_v53, %v2793_v51  ;;  %v4955_v16 = vld [vmem:[%s6118_s26 + $0x30] sm:$0xff]  }
0x1f43   :  { %v2794_v54 = vmul.f32 %v4284_v49, %v2786_v50  ;;  %v4954_v49 = vld [vmem:[%s6118_s26 + $0x38] sm:$0xff]  }
0x1f45   :  { %v2802_v58 = vadd.f32 %v4285_v53, %v2794_v54 }
0x1f47   :  { %v2803_v59 = vpack.c.bf16 %v2802_v58, %v2801_v56 }
0x1f49   :  { %4786 = vmatmul.mubr.msk.bf16.vlgmr.msra.gmra.mxu0 %vm72_vm0, %v2803_v59 }
0x1f4a   :  { %4805 = vmatprep.mubr.msk.bf16.mxu0 %vm5117_vm1, %v5116_v15  ;;  %4802 = vmatpush3.bf16.msra.mxu0 %v4954_v49 }
0x1f4b   :  { %4803 = vmatprep.subr.bf16.mxu0 %v5116_v15 }
0x1f4e   :  { %4804 = vmatpush3.bf16.msra.mxu0 %v4955_v16 }
0x1f4f   :  { %4809 = vmatprep.subr.bf16.mxu0 %v5116_v15 }
0x2009   :  { %v2866_v1 = vpop.f32.mrf.mxu0 }
0x200a   :  { %v2867_v35 = vadd.f32 %v4291_v0, %v2866_v1  ;;  %v4313_v1 = vld [vmem:[%s6090_s15 + $0x2] ss:$0 sm:$0xff] }
0x200b   :  { %v4787_v2 = vpop.f32.mrf.mxu0 }
0x200c   :  { %v2875_v36 = vmul.f32 0.044715, %v2867_v35  ;;  %v2873_v18 = vmul.f32 0.5, %v2867_v35 }
0x200d   :  { %v2869_v3 = vpop.f32.mrf.mxu0 }
0x200e   :  { %v2877_v57 = vmul.f32 %v2875_v36, %v2867_v35  ;;  %v2870_v6 = vadd.f32 %v4291_v0, %v2869_v3 }
0x200f   :  { %v4788_v7 = vpop.f32.mrf.mxu0 }
0x2010   :  { %v2879_v32 = vmul.f32 %v2877_v57, %v2867_v35  ;;  %v2876_v63 = vmul.f32 0.044715, %v2870_v6  ;;  %v2874_v44 = vmul.f32 0.5, %v2870_v6  ;;  %v4319_v57 = vld [vmem:[%s6080_s5 + $0x3] ss:$0 sm:$0xff] }
0x2012   :  { %v2881_v8 = vadd.f32 %v2879_v32, %v2867_v35  ;;  %v2878_v9 = vmul.f32 %v2876_v63, %v2870_v6 }
0x2014   :  { %v2883_v48 = vmul.f32 0.7978846, %v2881_v8  ;;  %v2880_v10 = vmul.f32 %v2878_v9, %v2870_v6 }
0x2016   :  { %5054 = vtanh.f32 %v2883_v48  ;;  %v2882_v12 = vadd.f32 %v2880_v10, %v2870_v6 }
0x2018   :  { %v2884_v13 = vmul.f32 0.7978846, %v2882_v12 }
0x201a   :  { %5056 = vtanh.f32 %v2884_v13 }
0x2023   :  { %v5055_v14 = vpop.eup %5054 }
0x2024   :  { %v2887_v17 = vadd.f32 1.0, %v5055_v14 }
0x2026   :  { %v2889_v20 = vmul.f32 %v2887_v17, %v2873_v18 }
0x2027   :  { %v5057_v42 = vpop.eup %5056 }
0x2028   :  { %v2888_v19 = vadd.f32 1.0, %v5057_v42 }
0x202a   :  { %v2890_v21 = vmul.f32 %v2888_v19, %v2874_v44 }
0x202c   :  { %v2891_v23 = vpack.c.bf16 %v2890_v21, %v2889_v20 }
0x202e   :  { %4798 = vmatmul.mubr.msk.bf16.vlgmr.msra.gmra.mxu1 %vm956_vm5, %v2891_v23 }
0x202f   :  { %4817 = vmatprep.mubr.msk.bf16.mxu1 %vm5117_vm1, %v5116_v15 }
0x20ee   :  { %v2970_v25 = vpop.f32.mrf.mxu1 }
0x20ef   :  { %v2971_v26 = vadd.f32 %v4304_v24, %v2970_v25 }
0x20f0   :  { %v4799_v38 = vpop.f32.mrf.mxu1 }
0x20f1   :  { %v2977_v28 = vadd.f32 %v2971_v26, %v2801_v56 }
0x20f2   :  { %v2973_v29 = vpop.f32.mrf.mxu1 }
0x20f3   :  { %v2974_v30 = vadd.f32 %v4304_v24, %v2973_v29  ;;  %v2983_v33 = vsel %vm72_vm0, %v2977_v28, 0.0 }
0x20f4   :  { %2984 = vadd.xlane.f32.xlu0 %v2983_v33  ;;  %v4800_v34 = vpop.f32.mrf.mxu1 }
0x20f5   :  { %v2978_v4 = vadd.f32 %v2974_v30, %v2802_v58 }
0x20f7   :  { %v2986_v37 = vsel %vm72_vm0, %v2978_v4, 0.0 }
0x20f8   :  { %2987 = vadd.xlane.f32.xlu1 %v2986_v37 }
0x217d   :  { %v2985_v5 = vpop.xlane.xlu0 %2984 }
0x217e   :  { %v2989_v39 = vmul.f32 0.03125, %v2985_v5 }
0x2180   :  { %v2991_v40 = vsub.f32 %v2977_v28, %v2989_v39 }
0x2181   :  { %v2988_v52 = vpop.xlane.xlu1 %2987 }
0x2182   :  { %v2990_v41 = vmul.f32 0.03125, %v2988_v52  ;;  %v2993_v55 = vmul.f32 %v2991_v40, %v2991_v40 }
0x2184   :  { %v2992_v43 = vsub.f32 %v2978_v4, %v2990_v41  ;;  %v2995_v45 = vsel %vm72_vm0, %v2993_v55, 0.0 }
0x2185   :  { %2996 = vadd.xlane.f32.xlu0 %v2995_v45 }
0x2186   :  { %v2994_v46 = vmul.f32 %v2992_v43, %v2992_v43 }
0x2188   :  { %v2998_v47 = vsel %vm72_vm0, %v2994_v46, 0.0 }
0x2189   :  { %2999 = vadd.xlane.f32.xlu1 %v2998_v47 }
0x220e   :  { %v2997_v50 = vpop.xlane.xlu0 %2996 }
0x220f   :  { %v3001_v51 = vmul.f32 0.03125, %v2997_v50 }
0x2211   :  { %v3003_v53 = vadd.f32 1e-12, %v3001_v51 }
0x2212   :  { %v3000_v54 = vpop.xlane.xlu1 %2999 }
0x2213   :  { %5058 = vrsqrt.f32 %v3003_v53  ;;  %v3002_v56 = vmul.f32 0.03125, %v3000_v54 }
0x2215   :  { %v3004_v58 = vadd.f32 1e-12, %v3002_v56 }
0x2217   :  { %5060 = vrsqrt.f32 %v3004_v58 }
0x2220   :  { %v5059_v59 = vpop.eup %5058 }
0x2221   :  { %v3007_v60 = vmul.f32 %v5059_v59, %v2991_v40 }
0x2223   :  { %v3015_v0 = vmul.f32 %v4312_v61, %v3007_v60 }
0x2224   :  { %v5061_v11 = vpop.eup %5060 }
0x2225   :  { %v3008_v62 = vmul.f32 %v5061_v11, %v2992_v43  ;;  %v5856_v2 = vadd.f32 %v4313_v1, %v3015_v0 }
0x2227   :  { %v3016_v35 = vmul.f32 %v4312_v61, %v3008_v62 }
0x2229   :  { %v5858_v36 = vadd.f32 %v4313_v1, %v3016_v35 }
0x222b   :  { %v3025_v3 = vpack.c.bf16 %v5858_v36, %v5856_v2 }
0x222d   :  { %4806 = vmatmul.mubr.msk.bf16.vlgmr.msra.gmra.mxu0 %vm72_vm0, %v3025_v3 }
0x222e   :  { %4811 = vmatprep.mubr.msk.bf16.mxu0 %vm5117_vm1, %v5116_v15 }
0x22ed   :  { %v3088_v6 = vpop.f32.mrf.mxu0 }
0x22ee   :  { %v3089_v7 = vadd.f32 %v4319_v57, %v3088_v6 }
0x22ef   :  { %v4807_v32 = vpop.f32.mrf.mxu0 }
0x22f0   :  { %v5868_v63 = vpack.c.bf16 %v3089_v7, %v3089_v7 }
0x22f1   :  { %v3091_v8 = vpop.f32.mrf.mxu0 }
0x22f2   :  { %v3092_v9 = vadd.f32 %v4319_v57, %v3091_v8  ;;  %3098 = vrot.lane.b32.xlu0 %v5868_v63, %s6125_s29 }
0x22f3   :  { %v4808_v48 = vpop.f32.mrf.mxu0 }
0x22f4   :  { %v5872_v10 = vpack.c.bf16 %v3092_v9, %v3092_v9 }
0x22f6   :  { %3147 = vrot.lane.b32.xlu1 %v5872_v10, %s6125_s29 }
0x2364   :  { %v3099_v12 = vpop.permute.xlu0 %3098 }
0x2365   :  { %v3104_v13 = vsel %vm189_vm2, %v3099_v12, 0 }
0x2366   :  { %4810 = vmatpush3.bf16.xpose.msra.mxu0 %v3104_v13 }
0x2367   :  { %4821 = vmatprep.subr.bf16.mxu0 %v5116_v15 }
0x2368   :  { %v3148_v14 = vpop.permute.xlu1 %3147 }
0x2369   :  { %v3153_v17 = vsel %vm189_vm2, %v3148_v14, 0 }
0x236a   :  { %4816 = vmatpush3.bf16.xpose.msra.mxu1 %v3153_v17 }
0x236b   :  { %4827 = vmatprep.subr.bf16.mxu1 %v5116_v15 }
0x236d   :  { %4812 = vmatmul.mubr.msk.bf16.vlgmr.msra.gmra.mxu0 %vm189_vm2, %v5868_v63 }
0x236e   :  { %4823 = vmatprep.mubr.msk.bf16.mxu0 %vm5117_vm1, %v5116_v15 }
0x2371   :  { %4818 = vmatmul.mubr.msk.bf16.vlgmr.msra.gmra.mxu1 %vm189_vm2, %v5872_v10 }
0x2372   :  { %4829 = vmatprep.mubr.msk.bf16.mxu1 %vm5117_vm1, %v5116_v15 }
0x242d   :  { %v3140_v42 = vpop.f32.mrf.mxu0 }
0x242e   :  { %v3195_v18 = vmul.f32 0.25, %v3140_v42 }
0x242f   :  { %v4813_v44 = vpop.f32.mrf.mxu0 }
0x2430   :  { %v3197_v19 = vadd.f32 %v3195_v18, %v5703_v22 }
0x2431   :  { %v3143_v20 = vpop.f32.mrf.mxu0  ;;  %v3189_v21 = vpop.f32.mrf.mxu1 }
0x2432   :  { %v3196_v23 = vmul.f32 0.25, %v3189_v21  ;;  %v3199_v24 = vsel %vm322_vm3, %v3197_v19, -inf }
0x2433   :  { %3200 = vmax.xlane.f32.xlu1 %v3199_v24  ;;  %v4814_v25 = vpop.f32.mrf.mxu0  ;;  %v4819_v26 = vpop.f32.mrf.mxu1 }
0x2434   :  { %v3198_v38 = vadd.f32 %v3196_v23, %v5708_v27 }
0x2435   :  { %v3192_v28 = vpop.f32.mrf.mxu1 }
0x2436   :  { %v3202_v29 = vsel %vm322_vm3, %v3198_v38, -inf }
0x2437   :  { %3203 = vmax.xlane.f32.xlu0 %v3202_v29  ;;  %v4820_v30 = vpop.f32.mrf.mxu1 }
0x2444   :  { %3271 = vrot.lane.b32.xlu1 %v5872_v10, %s6126_s27 }
0x2448   :  { %3325 = vrot.lane.b32.xlu1 %v5868_v63, %s6122_s24 }
0x24bc   :  { %v3201_v33 = vpop.xlane.xlu1 %3200 }
0x24bd   :  { %v3205_v34 = vsub.f32 %v3197_v19, %v3201_v33 }
0x24bf   :  { %v3207_v4 = vmul.f32 1.442695, %v3205_v34 }
0x24c0   :  { %v3272_v37 = vpop.permute.xlu1 %3271  ;;  %v3204_v5 = vpop.xlane.xlu0 %3203 }
0x24c1   :  { %5062 = vpow2.f32 %v3207_v4  ;;  %v3277_v39 = vsel %vm352_vm4, %v3272_v37, 0  ;;  %v3206_v40 = vsub.f32 %v3198_v38, %v3204_v5 }
0x24c2   :  { %4828 = vmatpush3.bf16.msra.mxu1 %v3277_v39 }
0x24c3   :  { %v3209_v52 = vmul.f32 1.442695, %v3206_v40  ;;  %4839 = vmatprep.subr.bf16.mxu1 %v5116_v15 }
0x24c4   :  { %v3326_v46 = vpop.permute.xlu1 %3325 }
0x24c5   :  { %5064 = vpow2.f32 %v3209_v52  ;;  %v3331_v58 = vsel %vm189_vm2, %v3326_v46, 0 }
0x24ce   :  { %v5063_v41 = vpop.eup %5062 }
0x24cf   :  { %v3211_v55 = vsel %vm322_vm3, %v5063_v41, 0.0 }
0x24d0   :  { %3212 = vadd.xlane.f32.xlu0 %v3211_v55 }
0x24d2   :  { %v5065_v43 = vpop.eup %5064 }
0x24d3   :  { %v3214_v45 = vsel %vm322_vm3, %v5065_v43, 0.0 }
0x24d4   :  { %3215 = vadd.xlane.f32.xlu1 %v3214_v45 }
0x24e5   :  { %3375 = vrot.lane.b32.xlu1 %v5872_v10, %s6122_s24 }
0x24e6   :  { %3223 = vrot.lane.b32.xlu0 %v5868_v63, %s6126_s27 }
0x24e9   :  { %3373 = vrot.lane.b32.xlu1 %v5872_v10, %s6123_s25 }
0x24ea   :  { %3323 = vrot.lane.b32.xlu0 %v5868_v63, %s6123_s25 }
0x2559   :  { %v3213_v47 = vpop.xlane.xlu0 %3212 }
0x255a   :  { %5066 = vrcp.f32 %v3213_v47 }
0x255d   :  { %v3216_v49 = vpop.xlane.xlu1 %3215  ;;  %v3224_v16 = vpop.permute.xlu0 %3223 }
0x255e   :  { %5068 = vrcp.f32 %v3216_v49  ;;  %v3229_v50 = vsel %vm352_vm4, %v3224_v16, 0  ;;  %v4957_v49 = vld [vmem:[%s6081_s6 + $0x38] sm:$0xff]  }
0x255f   :  { %4822 = vmatpush3.bf16.msra.mxu0 %v3229_v50 }
0x2560   :  { %4833 = vmatprep.subr.bf16.mxu0 %v5116_v15 }
0x2561   :  { %v3376_v60 = vpop.permute.xlu1 %3375  ;;  %v3324_v62 = vpop.permute.xlu0 %3323 }
0x2562   :  { %v3381_v11 = vsel %vm189_vm2, %v3376_v60, 0 }
0x2565   :  { %v3374_v0 = vpop.permute.xlu1 %3373 }
0x2567   :  { %v5067_v51 = vpop.eup %5066 }
0x2568   :  { %v3219_v53 = vmul.f32 %v5067_v51, %v5063_v41 }
0x256a   :  { %v3221_v54 = vpack.c.bf16 %v3219_v53, %v3219_v53 }
0x256b   :  { %v5069_v56 = vpop.eup %5068 }
0x256c   :  { %4824 = vmatmul.mubr.msk.bf16.vlgmr.msra.gmra.mxu0 %vm322_vm3, %v3221_v54  ;;  %v3220_v59 = vmul.f32 %v5069_v56, %v5065_v43 }
0x256d   :  { %4834 = vmatpush3.bf16.xpose.msra.mxu0 %v3331_v58  ;;  %4835 = vmatprep.mubr.msk.bf16.mxu0 %vm5117_vm1, %v5116_v15 }
0x256e   :  { %v3222_v61 = vpack.c.bf16 %v3220_v59, %v3220_v59  ;;  %4845 = vmatprep.subr.bf16.mxu0 %v5116_v15 }
0x2570   :  { %4830 = vmatmul.mubr.msk.bf16.vlgmr.msra.gmra.mxu1 %vm322_vm3, %v3222_v61 }
0x2571   :  { %4840 = vmatpush3.bf16.xpose.msra.mxu1 %v3381_v11  ;;  %4841 = vmatprep.mubr.msk.bf16.mxu1 %vm5117_vm1, %v5116_v15 }
0x2572   :  { %4851 = vmatprep.subr.bf16.mxu1 %v5116_v15 }
0x2574   :  { %4836 = vmatmul.mubr.msk.bf16.vlgmr.msra.gmra.mxu0 %vm189_vm2, %v3324_v62 }
0x2575   :  { %4847 = vmatprep.mubr.msk.bf16.mxu0 %vm5117_vm1, %v5116_v15 }
0x2578   :  { %4842 = vmatmul.mubr.msk.bf16.vlgmr.msra.gmra.mxu1 %vm189_vm2, %v3374_v0 }
0x2579   :  { %4853 = vmatprep.mubr.msk.bf16.mxu1 %vm5117_vm1, %v5116_v15 }
0x262c   :  { %v5926_v1 = vpop.f32.mrf.mxu0 }
0x262e   :  { %v4825_v35 = vpop.f32.mrf.mxu0 }
0x262f   :  { %v4340_v35 = vld [vmem:[%s6082_s7 + $0x3] ss:$0 sm:$0xff] }
0x2630   :  { %v3268_v3 = vpop.f32.mrf.mxu0  ;;  %v5928_v57 = vpop.f32.mrf.mxu1 }
0x2631   :  { %v3319_v6 = vpack.c.bf16 %v5928_v57, %v5926_v1 }
0x2632   :  { %v4826_v7 = vpop.f32.mrf.mxu0  ;;  %v4831_v32 = vpop.f32.mrf.mxu1 }
0x2634   :  { %v3316_v8 = vpop.f32.mrf.mxu1  ;;  %v3367_v9 = vpop.f32.mrf.mxu0 }
0x2635   :  { %v3423_v48 = vmul.f32 0.25, %v3367_v9 }
0x2636   :  { %v4832_v12 = vpop.f32.mrf.mxu1  ;;  %v4837_v13 = vpop.f32.mrf.mxu0 }
0x2637   :  { %v3425_v14 = vadd.f32 %v3423_v48, %v5703_v22 }
0x2638   :  { %v3370_v17 = vpop.f32.mrf.mxu0  ;;  %v3417_v42 = vpop.f32.mrf.mxu1 }
0x2639   :  { %v3424_v18 = vmul.f32 0.25, %v3417_v42  ;;  %v3427_v44 = vsel %vm322_vm3, %v3425_v14, -inf }
0x263a   :  { %3428 = vmax.xlane.f32.xlu0 %v3427_v44  ;;  %v4838_v19 = vpop.f32.mrf.mxu0  ;;  %v4843_v20 = vpop.f32.mrf.mxu1 }
0x263b   :  { %v3426_v21 = vadd.f32 %v3424_v18, %v5708_v27 }
0x263c   :  { %v3420_v23 = vpop.f32.mrf.mxu1 }
0x263d   :  { %v3430_v24 = vsel %vm322_vm3, %v3426_v21, -inf }
0x263e   :  { %3431 = vmax.xlane.f32.xlu1 %v3430_v24  ;;  %v4844_v25 = vpop.f32.mrf.mxu1 }
0x263f   :  { %v4959_v25 = vld [vmem:[%s6085_s10 + $0x30] sm:$0xff]  }
0x264f   :  { %3499 = vrot.lane.b32.xlu1 %v5872_v10, %s6124_s0 }
0x26c3   :  { %v3429_v26 = vpop.xlane.xlu0 %3428 }
0x26c4   :  { %v3433_v22 = vsub.f32 %v3425_v14, %v3429_v26 }
0x26c6   :  { %v3435_v38 = vmul.f32 1.442695, %v3433_v22 }
0x26c7   :  { %v3432_v28 = vpop.xlane.xlu1 %3431 }
0x26c8   :  { %5070 = vpow2.f32 %v3435_v38  ;;  %v3434_v29 = vsub.f32 %v3426_v21, %v3432_v28 }
0x26ca   :  { %v3437_v30 = vmul.f32 1.442695, %v3434_v29 }
0x26cb   :  { %v3500_v33 = vpop.permute.xlu1 %3499 }
0x26cc   :  { %5072 = vpow2.f32 %v3437_v30  ;;  %v3505_v34 = vsel %vm352_vm4, %v3500_v33, 0 }
0x26cd   :  { %4852 = vmatpush3.bf16.msra.mxu1 %v3505_v34 }
0x26ce   :  { %4863 = vmatprep.subr.bf16.mxu1 %v5116_v15 }
0x26d5   :  { %v5071_v27 = vpop.eup %5070 }
0x26d6   :  { %v3439_v4 = vsel %vm322_vm3, %v5071_v27, 0.0 }
0x26d7   :  { %3440 = vadd.xlane.f32.xlu0 %v3439_v4 }
0x26d9   :  { %v5073_v37 = vpop.eup %5072 }
0x26da   :  { %v3442_v10 = vsel %vm322_vm3, %v5073_v37, 0.0 }
0x26db   :  { %3443 = vadd.xlane.f32.xlu0 %v3442_v10 }
0x26f1   :  { %3451 = vrot.lane.b32.xlu0 %v5868_v63, %s6124_s0  ;;  %v4956_v63 = vld [vmem:[%s6081_s6 + $0x30] sm:$0xff]  }
0x2760   :  { %v3441_v5 = vpop.xlane.xlu0 %3440 }
0x2761   :  { %5074 = vrcp.f32 %v3441_v5  ;;  %v4344_v5 = vld [vmem:[%s6084_s9 + $0x3] ss:$0 sm:$0xff] }
0x2764   :  { %v3444_v39 = vpop.xlane.xlu0 %3443 }
0x2765   :  { %5076 = vrcp.f32 %v3444_v39 }
0x2768   :  { %v3452_v40 = vpop.permute.xlu0 %3451 }
0x2769   :  { %v3457_v52 = vsel %vm352_vm4, %v3452_v40, 0 }
0x276a   :  { %4846 = vmatpush3.bf16.msra.mxu0 %v3457_v52 }
0x276b   :  { %4857 = vmatprep.subr.bf16.mxu0 %v5116_v15 }
0x276e   :  { %v5075_v41 = vpop.eup %5074 }
0x276f   :  { %v3447_v55 = vmul.f32 %v5075_v41, %v5071_v27  ;;  %v4343_v27 = vld [vmem:[%s6083_s8 + $0x3] ss:$0 sm:$0xff] }
0x2771   :  { %v3449_v43 = vpack.c.bf16 %v3447_v55, %v3447_v55  ;;  %v4960_v55 = vld [vmem:[%s6087_s12 + $0x78] sm:$0xff]  }
0x2772   :  { %v5077_v45 = vpop.eup %5076 }
0x2773   :  { %4848 = vmatmul.mubr.msk.bf16.vlgmr.msra.gmra.mxu0 %vm322_vm3, %v3449_v43  ;;  %v3448_v46 = vmul.f32 %v5077_v45, %v5073_v37  ;;  %v4961_v43 = vld [vmem:[%s6087_s12 + $0x70] sm:$0xff]   ;;  %v4962_v45 = vld [vmem:[%s6087_s12 + $0x68] sm:$0xff]  }
0x2774   :  { %4859 = vmatprep.mubr.msk.bf16.mxu0 %vm5117_vm1, %v5116_v15  ;;  %4858 = vmatpush3.bf16.msra.mxu0 %v4957_v49 }
0x2775   :  { %v3450_v47 = vpack.c.bf16 %v3448_v46, %v3448_v46  ;;  %4869 = vmatprep.subr.bf16.mxu0 %v5116_v15  ;;  %v4963_v46 = vld [vmem:[%s6087_s12 + $0x60] sm:$0xff]  }
0x2777   :  { %4854 = vmatmul.mubr.msk.bf16.vlgmr.msra.gmra.mxu1 %vm322_vm3, %v3450_v47 }
0x2778   :  { %4864 = vmatpush3.bf16.msra.mxu1 %v4956_v63  ;;  %4865 = vmatprep.mubr.msk.bf16.mxu1 %vm5117_vm1, %v5116_v15  ;;  %v4350_v63 = vld [vmem:[%s6086_s11 + $0x3] ss:$0 sm:$0xff] }
0x2779   :  { %4877 = vmatprep.subr.bf16.mxu1 %v5116_v15 }
0x277f   :  { %4866 = vmatmul.mubr.msk.bf16.vlgmr.msra.gmra.mxu1 %vm189_vm2, %v3319_v6 }
0x2780   :  { %4885 = vmatprep.mubr.msk.bf16.mxu1 %vm5117_vm1, %v5116_v15  ;;  %4878 = vmatpush3.bf16.msra.mxu1 %v4960_v55 }
0x2781   :  { %4879 = vmatprep.subr.bf16.mxu1 %v5116_v15 }
0x2784   :  { %4880 = vmatpush3.bf16.msra.mxu1 %v4961_v43 }
0x2785   :  { %4881 = vmatprep.subr.bf16.mxu1 %v5116_v15 }
0x2788   :  { %4882 = vmatpush3.bf16.msra.mxu1 %v4962_v45 }
0x2789   :  { %4883 = vmatprep.subr.bf16.mxu1 %v5116_v15 }
0x278c   :  { %4884 = vmatpush3.bf16.msra.mxu1 %v4963_v46 }
0x278d   :  { %4905 = vmatprep.subr.bf16.mxu1 %v5116_v15 }
0x2833   :  { %v3493_v16 = vpop.f32.mrf.mxu0 }
0x2835   :  { %v4849_v50 = vpop.f32.mrf.mxu0 }
0x2837   :  { %v3496_v51 = vpop.f32.mrf.mxu0  ;;  %v3541_v53 = vpop.f32.mrf.mxu1 }
0x2838   :  { %v3547_v54 = vpack.c.bf16 %v3541_v53, %v3493_v16 }
0x2839   :  { %v4850_v56 = vpop.f32.mrf.mxu0  ;;  %v4855_v58 = vpop.f32.mrf.mxu1 }
0x283a   :  { %4860 = vmatmul.mubr.msk.bf16.vlgmr.msra.gmra.mxu0 %vm189_vm2, %v3547_v54 }
0x283b   :  { %v3544_v59 = vpop.f32.mrf.mxu1  ;;  %4873 = vmatprep.mubr.msk.bf16.mxu0 %vm5117_vm1, %v5116_v15 }
0x283d   :  { %v4856_v60 = vpop.f32.mrf.mxu1 }
0x283f   :  { %v3644_v61 = vpop.f32.mrf.mxu1 }
0x2841   :  { %v4867_v11 = vpop.f32.mrf.mxu1 }
0x2843   :  { %v3647_v62 = vpop.f32.mrf.mxu1 }
0x2845   :  { %v4868_v0 = vpop.f32.mrf.mxu1 }
0x28fa   :  { %v3594_v1 = vpop.f32.mrf.mxu0 }
0x28fb   :  { %v3645_v3 = vadd.f32 %v3644_v61, %v3594_v1 }
0x28fc   :  { %v4861_v57 = vpop.f32.mrf.mxu0 }
0x28fd   :  { %v3659_v6 = vadd.f32 %v4340_v35, %v3645_v3 }
0x28fe   :  { %v3597_v7 = vpop.f32.mrf.mxu0 }
0x28ff   :  { %v3648_v32 = vadd.f32 %v3647_v62, %v3597_v7  ;;  %v3661_v8 = vadd.f32 %v3659_v6, %v5856_v2 }
0x2900   :  { %v4862_v9 = vpop.f32.mrf.mxu0 }
0x2901   :  { %v3660_v48 = vadd.f32 %v4340_v35, %v3648_v32  ;;  %v3667_v12 = vsel %vm72_vm0, %v3661_v8, 0.0  ;;  %v4243_v35 = vld [vmem:[%s6092_s17] ss:$0 sm:$0xff] }
0x2902   :  { %3668 = vadd.xlane.f32.xlu1 %v3667_v12  ;;  %v2024_v3 = vadd.f32 %v4243_v35, %v5673_v31  ;;  %v4965_v31 = vld [vmem:[%s6093_s18] sm:$0xff]  }
0x2903   :  { %v3662_v13 = vadd.f32 %v3660_v48, %v5858_v36  ;;  %v4958_v36 = vld [vmem:[%s6085_s10 + $0x38] sm:$0xff]  }
0x2904   :  { %4870 = vmatpush3.bf16.msra.mxu0 %v4958_v36 }
0x2905   :  { %v3670_v14 = vsel %vm72_vm0, %v3662_v13, 0.0  ;;  %4871 = vmatprep.subr.bf16.mxu0 %v5116_v15 }
0x2906   :  { %3671 = vadd.xlane.f32.xlu0 %v3670_v14 }
0x2908   :  { %4872 = vmatpush3.bf16.msra.mxu0 %v4959_v25 }
0x2909   :  { %4889 = vmatprep.subr.bf16.mxu0 %v5116_v15 }
0x298b   :  { %v3669_v17 = vpop.xlane.xlu1 %3668 }
0x298c   :  { %v3673_v42 = vmul.f32 0.03125, %v3669_v17 }
0x298e   :  { %v3675_v18 = vsub.f32 %v3661_v8, %v3673_v42 }
0x298f   :  { %v3672_v44 = vpop.xlane.xlu0 %3671 }
0x2990   :  { %v3674_v19 = vmul.f32 0.03125, %v3672_v44  ;;  %v3677_v20 = vmul.f32 %v3675_v18, %v3675_v18 }
0x2992   :  { %v3676_v21 = vsub.f32 %v3662_v13, %v3674_v19  ;;  %v3679_v23 = vsel %vm72_vm0, %v3677_v20, 0.0  ;;  %v4964_v13 = vld [vmem:[%s6093_s18 + $0x8] sm:$0xff]  }
0x2993   :  { %3680 = vadd.xlane.f32.xlu0 %v3679_v23 }
0x2994   :  { %v3678_v2 = vmul.f32 %v3676_v21, %v3676_v21 }
0x2996   :  { %v3682_v24 = vsel %vm72_vm0, %v3678_v2, 0.0 }
0x2997   :  { %3683 = vadd.xlane.f32.xlu1 %v3682_v24 }
0x2a1c   :  { %v3681_v26 = vpop.xlane.xlu0 %3680 }
0x2a1d   :  { %v3685_v22 = vmul.f32 0.03125, %v3681_v26 }
0x2a1f   :  { %v3687_v38 = vadd.f32 1e-12, %v3685_v22 }
0x2a20   :  { %v3684_v28 = vpop.xlane.xlu1 %3683 }
0x2a21   :  { %5078 = vrsqrt.f32 %v3687_v38  ;;  %v3686_v29 = vmul.f32 0.03125, %v3684_v28 }
0x2a23   :  { %v3688_v30 = vadd.f32 1e-12, %v3686_v29 }
0x2a25   :  { %5080 = vrsqrt.f32 %v3688_v30 }
0x2a2e   :  { %v5079_v33 = vpop.eup %5078 }
0x2a2f   :  { %v3691_v34 = vmul.f32 %v5079_v33, %v3675_v18  ;;  %v4363_v18 = vld [vmem:[%s6088_s13 + $0x3] ss:$0 sm:$0xff] }
0x2a31   :  { %v3699_v10 = vmul.f32 %v4343_v27, %v3691_v34 }
0x2a32   :  { %v5081_v4 = vpop.eup %5080 }
0x2a33   :  { %v3692_v37 = vmul.f32 %v5081_v4, %v3676_v21  ;;  %v3707_v40 = vadd.f32 %v4344_v5, %v3699_v10 }
0x2a35   :  { %v3700_v39 = vmul.f32 %v4343_v27, %v3692_v37 }
0x2a37   :  { %v5989_v52 = vadd.f32 %v4344_v5, %v3700_v39 }
0x2a39   :  { %v3709_v41 = vpack.c.bf16 %v5989_v52, %v3707_v40 }
0x2a3b   :  { %4874 = vmatmul.mubr.msk.bf16.vlgmr.msra.gmra.mxu0 %vm72_vm0, %v3709_v41  ;;  %v4967_v41 = vld [vmem:[%s6091_s16 + $0x10] sm:$0xff]  }
0x2a3c   :  { %4893 = vmatprep.mubr.msk.bf16.mxu0 %vm5117_vm1, %v5116_v15 }
0x2afb   :  { %v3772_v47 = vpop.f32.mrf.mxu0 }
0x2afc   :  { %v3773_v49 = vadd.f32 %v4350_v63, %v3772_v47 }
0x2afd   :  { %v4875_v16 = vpop.f32.mrf.mxu0 }
0x2afe   :  { %v3781_v50 = vmul.f32 0.044715, %v3773_v49  ;;  %v3779_v32 = vmul.f32 0.5, %v3773_v49  ;;  %v4371_v16 = vld [vmem:[%s6089_s14 + $0x3] ss:$0 sm:$0xff] }
0x2aff   :  { %v3775_v51 = vpop.f32.mrf.mxu0 }
0x2b00   :  { %v3783_v53 = vmul.f32 %v3781_v50, %v3773_v49  ;;  %v3776_v54 = vadd.f32 %v4350_v63, %v3775_v51 }
0x2b01   :  { %v4876_v56 = vpop.f32.mrf.mxu0 }
0x2b02   :  { %v3785_v58 = vmul.f32 %v3783_v53, %v3773_v49  ;;  %v3782_v59 = vmul.f32 0.044715, %v3776_v54  ;;  %v3780_v8 = vmul.f32 0.5, %v3776_v54 }
0x2b04   :  { %v3787_v60 = vadd.f32 %v3785_v58, %v3773_v49  ;;  %v3784_v61 = vmul.f32 %v3782_v59, %v3776_v54 }
0x2b06   :  { %v3789_v11 = vmul.f32 0.7978846, %v3787_v60  ;;  %v3786_v62 = vmul.f32 %v3784_v61, %v3776_v54 }
0x2b08   :  { %5082 = vtanh.f32 %v3789_v11  ;;  %v3788_v0 = vadd.f32 %v3786_v62, %v3776_v54  ;;  %v4372_v54 = vld [vmem:[%s6090_s15 + $0x3] ss:$0 sm:$0xff] }
0x2b0a   :  { %v3790_v1 = vmul.f32 0.7978846, %v3788_v0 }
0x2b0c   :  { %5084 = vtanh.f32 %v3790_v1 }
0x2b0d   :  { %5086 = vtanh.f32 %v2024_v3 }
0x2b15   :  { %v5083_v57 = vpop.eup %5082 }
0x2b16   :  { %v3793_v6 = vadd.f32 1.0, %v5083_v57  ;;  %v4968_v57 = vld [vmem:[%s6093_s18 + $0x18] sm:$0xff]  }
0x2b18   :  { %v3795_v48 = vmul.f32 %v3793_v6, %v3779_v32  ;;  %v4969_v6 = vld [vmem:[%s6093_s18 + $0x10] sm:$0xff]   ;;  %s5124_s18 = smov [#allocation2]  }
0x2b19   :  { %v5085_v7 = vpop.eup %5084  ;;  %s4140_s2 = sshll.u32 %s5124_s18, 4  ;;  %s4141_s2 = int_to_ptr.vmem [resolvable:$true] %s4140_s2 }
0x2b1a   :  { %v3794_v9 = vadd.f32 1.0, %v5085_v7  ;;  %v5087_v17 = vpop.eup %5086  ;;  %v4378_v7 = vld [vmem:[%s6092_s17 + $0x1] ss:$0 sm:$0xff]  ;;  %s5094_s17 = scalar_lea.vmem %s4141_s2, 32  ;;  %p5099_p1 = scmp.lt.s32.totalorder %s4141_s2, %s4141_s2 }
0x2b1b   :  { %v2030_v42 = vpack.c.bf16 %v5087_v17, %v5087_v17  ;;  %p5095_p0 = scmp.ne.s32.totalorder %s4141_s2, %s5094_s17  ;;  %p5100_p2 = scmp.lt.s32.totalorder %s5094_s17, %s5094_s17 }
0x2b1c   :  { %v3796_v12 = vmul.f32 %v3794_v9, %v3780_v8 }
0x2b1d   :  { %p5101_p3 = por %p5100_p2, %p5099_p1 }
0x2b1e   :  { %v3797_v14 = vpack.c.bf16 %v3796_v12, %v3795_v48 }
0x2b1f   :  { %p5102_p4 = pnand %p5101_p3, %p5095_p0 }
0x2b20   :  { %4886 = vmatmul.mubr.msk.bf16.vlgmr.msra.gmra.mxu1 %vm956_vm5, %v3797_v14 }
0x2b21   :  { %4906 = vmatpush3.bf16.msra.mxu1 %v4964_v13  ;;  %4909 = vmatprep.mubr.msk.bf16.mxu1 %vm5117_vm1, %v5116_v15 }
0x2b22   :  { %4907 = vmatprep.subr.bf16.mxu1 %v5116_v15 }
0x2b25   :  { %4908 = vmatpush3.bf16.msra.mxu1 %v4965_v31  ;;  %v4392_v31 = vld [vmem:[%s6094_s19] ss:$0 sm:$0xff] }
0x2b28   :  { %4910 = vmatmul.mubr.msk.bf16.vlgmr.msra.gmra.mxu1 %vm72_vm0, %v2030_v42 }
0x2be0   :  { %v3876_v44 = vpop.f32.mrf.mxu1 }
0x2be1   :  { %v3877_v19 = vadd.f32 %v4363_v18, %v3876_v44 }
0x2be2   :  { %v4887_v20 = vpop.f32.mrf.mxu1 }
0x2be3   :  { %v3883_v21 = vadd.f32 %v3877_v19, %v3707_v40 }
0x2be4   :  { %v3879_v23 = vpop.f32.mrf.mxu1 }
0x2be5   :  { %v3880_v2 = vadd.f32 %v4363_v18, %v3879_v23  ;;  %v3889_v24 = vsel %vm72_vm0, %v3883_v21, 0.0 }
0x2be6   :  { %3890 = vadd.xlane.f32.xlu1 %v3889_v24  ;;  %v4888_v36 = vpop.f32.mrf.mxu1 }
0x2be7   :  { %v3884_v25 = vadd.f32 %v3880_v2, %v5989_v52  ;;  %v4966_v52 = vld [vmem:[%s6091_s16 + $0x18] sm:$0xff]  }
0x2be8   :  { %v6034_v26 = vpop.f32.mrf.mxu1  ;;  %4890 = vmatpush3.bf16.msra.mxu0 %v4966_v52 }
0x2be9   :  { %v3892_v22 = vsel %vm72_vm0, %v3884_v25, 0.0  ;;  %4891 = vmatprep.subr.bf16.mxu0 %v5116_v15 }
0x2bea   :  { %3893 = vadd.xlane.f32.xlu0 %v3892_v22  ;;  %v4911_v38 = vpop.f32.mrf.mxu1 }
0x2bec   :  { %v4122_v28 = vpop.f32.mrf.mxu1  ;;  %4892 = vmatpush3.bf16.msra.mxu0 %v4967_v41 }
0x2bed   :  { %4897 = vmatprep.subr.bf16.mxu0 %v5116_v15 }
0x2bee   :  { %v4912_v29 = vpop.f32.mrf.mxu1 }
0x2c6f   :  { %v3891_v30 = vpop.xlane.xlu1 %3890 }
0x2c70   :  { %v3895_v33 = vmul.f32 0.03125, %v3891_v30 }
0x2c72   :  { %v3897_v34 = vsub.f32 %v3883_v21, %v3895_v33 }
0x2c73   :  { %v3894_v27 = vpop.xlane.xlu0 %3893 }
0x2c74   :  { %v3896_v4 = vmul.f32 0.03125, %v3894_v27  ;;  %v3899_v37 = vmul.f32 %v3897_v34, %v3897_v34 }
0x2c76   :  { %v3898_v10 = vsub.f32 %v3884_v25, %v3896_v4  ;;  %v3901_v5 = vsel %vm72_vm0, %v3899_v37, 0.0 }
0x2c77   :  { %3902 = vadd.xlane.f32.xlu1 %v3901_v5 }
0x2c78   :  { %v3900_v39 = vmul.f32 %v3898_v10, %v3898_v10 }
0x2c7a   :  { %v3904_v40 = vsel %vm72_vm0, %v3900_v39, 0.0 }
0x2c7b   :  { %3905 = vadd.xlane.f32.xlu0 %v3904_v40 }
0x2d00   :  { %v3903_v55 = vpop.xlane.xlu1 %3902 }
0x2d01   :  { %v3907_v43 = vmul.f32 0.03125, %v3903_v55 }
0x2d03   :  { %v3909_v45 = vadd.f32 1e-12, %v3907_v43 }
0x2d04   :  { %v3906_v46 = vpop.xlane.xlu0 %3905 }
0x2d05   :  { %5088 = vrsqrt.f32 %v3909_v45  ;;  %v3908_v63 = vmul.f32 0.03125, %v3906_v46 }
0x2d07   :  { %v3910_v47 = vadd.f32 1e-12, %v3908_v63 }
0x2d09   :  { %5090 = vrsqrt.f32 %v3910_v47 }
0x2d12   :  { %v5089_v49 = vpop.eup %5088 }
0x2d13   :  { %v3913_v50 = vmul.f32 %v5089_v49, %v3897_v34 }
0x2d15   :  { %v3921_v51 = vmul.f32 %v4371_v16, %v3913_v50 }
0x2d16   :  { %v5091_v53 = vpop.eup %5090 }
0x2d17   :  { %v3914_v56 = vmul.f32 %v5091_v53, %v3898_v10  ;;  %v3929_v59 = vadd.f32 %v4372_v54, %v3921_v51 }
0x2d19   :  { %v3922_v58 = vmul.f32 %v4371_v16, %v3914_v56  ;;  %v3931_v61 = vpack.c.bf16 %v3929_v59, %v3929_v59 }
0x2d1b   :  { %v3930_v60 = vadd.f32 %v4372_v54, %v3922_v58  ;;  %v3948_v0 = vunpack.c.l.b16 %v3931_v61 }
0x2d1d   :  { %v3932_v11 = vpack.c.bf16 %v3930_v60, %v3930_v60 }
0x2d1f   :  { %v3949_v62 = vunpack.c.l.b16 %v3932_v11 }
0x2d21   :  { %v3950_v1 = vrot.slane %v3949_v62, 7 }
0x2d23   :  { %v3951_v35 = vsel %vm1971_vm6, %v3950_v1, %v3948_v0 }
0x2d24   :  { %v3952_v3 = vpack.c.b16 %v3951_v35, %v3951_v35 }
0x2d26   :  { %4894 = vmatmul.mubr.msk.bf16.vlgmr.msra.gmra.mxu0 %vm72_vm0, %v3952_v3 }
0x2d27   :  { %4901 = vmatprep.mubr.msk.bf16.mxu0 %vm5117_vm1, %v5116_v15  ;;  %4898 = vmatpush3.bf16.msra.mxu0 %v4968_v57 }
0x2d28   :  { %4899 = vmatprep.subr.bf16.mxu0 %v5116_v15 }
0x2d2b   :  { %4900 = vmatpush3.bf16.msra.mxu0 %v4969_v6 }
0x2de6   :  { %v4002_v32 = vpop.f32.mrf.mxu0 }
0x2de7   :  { %v4003_v8 = vadd.f32 %v4378_v7, %v4002_v32 }
0x2de8   :  { %v4895_v9 = vpop.f32.mrf.mxu0 }
0x2de9   :  { %5092 = vtanh.f32 %v4003_v8 }
0x2dea   :  { %v4005_v48 = vpop.f32.mrf.mxu0 }
0x2dec   :  { %v4896_v12 = vpop.f32.mrf.mxu0 }
0x2df6   :  { %v5093_v13 = vpop.eup %5092 }
0x2df7   :  { %v4009_v14 = vpack.c.bf16 %v5093_v13, %v5093_v13 }
0x2df9   :  { %4902 = vmatmul.mubr.msk.bf16.vlgmr.msra.gmra.mxu0 %vm72_vm0, %v4009_v14 }
0x2eb9   :  { %v4064_v15 = vpop.f32.mrf.mxu0 }
0x2eba   :  { %v4120_v17 = vadd.f32 %v6034_v26, %v4064_v15 }
0x2ebb   :  { %v4903_v42 = vpop.f32.mrf.mxu0 }
0x2ebc   :  { %v4132_v18 = vadd.f32 %v4392_v31, %v4120_v17 }
0x2ebd   :  { %v4067_v44 = vpop.f32.mrf.mxu0 }
0x2ebe   :  { %4133 = vst [vmem:[#allocation2] sm:$0x3] %v4132_v18 }
0x2ebf   :  { %v4904_v19 = vpop.f32.mrf.mxu0 }
0x2ec0   :  { %5105 = shalt.err (!%p5102_p4)
}
0x2ec1   :  { %s6127_s19 = sld [smem:[#allocation10_spill]] }
0x2ec7   :  { %4143 = dma.vmem_to_hbm [thread:$0]  %s4141_s2, 32, %s6127_s19, [#allocation3]  }
0x2ec8   :  { %5114 = dma.done.wait [#allocation3], 32  }
0x2ec9   :  { %5115 = vsyncadd [#allocation3], 4294967264 }
0x2eca   :  { %4147 = vsyncpa [#allocation3], 1 }

</bundles_post_ra>
